<compile_context>
chip_gen: v5e
topology: v5e:2x2
jax: 0.10.0
libtpu: 0.0.40
codegen_flags: <defaults>
</compile_context>

<pallas_src>
import jax
import jax.numpy as jnp
import numpy as np
from jax import lax
from jax.experimental import pallas as pl
from jax.experimental.pallas import tpu as pltpu


def _zero_halo(ref, H, W):
    """Zero only the 1-pixel halo of a (H+2, W+2, C) padded VMEM scratch."""
    C = ref.shape[-1]
    zr = jnp.zeros((1, W + 2, C), ref.dtype)
    zc = jnp.zeros((H + 2, 1, C), ref.dtype)
    ref[0:1, :, :] = zr
    ref[H + 1:H + 2, :, :] = zr
    ref[:, 0:1, :] = zc
    ref[:, W + 1:W + 2, :] = zc


def _im2col_3x3(src_ref, H, W):
    """Build the (H*W, 9*C) im2col patch for a 3x3 / stride-1 conv from a padded
    (H+2, W+2, C) VMEM ref.  Tap order (dy, dx, c) matches a row-major reshape
    of HWIO weights to (9*C, Cout)."""
    C = src_ref.shape[-1]
    taps = []
    for dy in range(3):
        for dx in range(3):
            taps.append(src_ref[dy:dy + H, dx:dx + W, :].reshape(H * W, C))
    return jnp.concatenate(taps, axis=-1)


def basic_block_kernel(x_ref, w1_ref, s1_ref, b1_ref, w2_ref, s2_ref, b2_ref,
                       o_ref, xpad_ref, midpad_ref):
    # x_ref      : (1, H, W, Cin)      unpadded input block (also the residual)
    # w1_ref     : (9*Cin, Cout)       conv1 weights, im2col layout, compute dtype
    # s1/b1_ref  : (1, Cout)           fused eval-mode BN1 scale / bias (f32)
    # w2_ref     : (9*Cout, Cout)      conv2 weights, im2col layout, compute dtype
    # s2/b2_ref  : (1, Cout)           fused eval-mode BN2 scale / bias (f32)
    # o_ref      : (1, H, W, Cout)
    # xpad_ref   : VMEM (H+2, W+2, Cin)  f32 padded input
    # midpad_ref : VMEM (H+2, W+2, Cout) f32 padded conv1 output
    H = o_ref.shape[1]
    W = o_ref.shape[2]
    Cout = o_ref.shape[3]
    Cin = x_ref.shape[3]
    cdt = w1_ref.dtype  # MXU compute dtype (float32 or bfloat16)

    # In-kernel zero padding: clear only the halo; interior is overwritten below.
    _zero_halo(xpad_ref, H, W)
    _zero_halo(midpad_ref, H, W)
    xpad_ref[1:1 + H, 1:1 + W, :] = x_ref[0].astype(xpad_ref.dtype)

    s1 = s1_ref[...]
    b1 = b1_ref[...]
    s2 = s2_ref[...]
    b2 = b2_ref[...]

    # ---- conv1 (one matmul) + BN1 + ReLU ----
    p1 = _im2col_3x3(xpad_ref, H, W).astype(cdt)                 # (H*W, 9*Cin)
    h1 = jnp.dot(p1, w1_ref[...], preferred_element_type=jnp.float32)
    mid = jnp.maximum(h1 * s1 + b1, 0.0)                         # f32 epilogue
    # TODO(synk): nn.Dropout(0.3) is identity in eval mode; train-mode dropout not implemented.
    midpad_ref[1:1 + H, 1:1 + W, :] = mid.reshape(H, W, Cout)

    # ---- conv2 (one matmul) + BN2 + residual add + ReLU ----
    p2 = _im2col_3x3(midpad_ref, H, W).astype(cdt)               # (H*W, 9*Cout)
    h2 = jnp.dot(p2, w2_ref[...], preferred_element_type=jnp.float32)
    ident = xpad_ref[1:1 + H, 1:1 + W, :].reshape(H * W, Cin).astype(jnp.float32)
    out = jnp.maximum(h2 * s2 + b2 + ident, 0.0)
    o_ref[...] = out.reshape(1, H, W, Cout).astype(o_ref.dtype)


def _fuse_bn(bn, eps):
    gamma, beta, mean, var = bn
    s = gamma / jnp.sqrt(var + eps)
    b = beta - mean * s
    return (s.reshape(1, -1).astype(jnp.float32),
            b.reshape(1, -1).astype(jnp.float32))


def basic_block_forward(x_nchw, w1_oihw, bn1, w2_oihw, bn2, *, eps=1e-5,
                        compute_dtype=jnp.float32):
    """x_nchw: (N, Cin, H, W); weights OIHW (Cout, Cin, 3, 3); bn = (gamma, beta, mean, var).

    compute_dtype controls the MXU operand dtype (float32 or bfloat16);
    accumulation and all elementwise math stay in float32.
    """
    N, Cin, H, W = x_nchw.shape
    Cout = w1_oihw.shape[0]
    assert Cin == Cout, "downsample is None => in_channels must equal out_channels"

    x = jnp.transpose(x_nchw, (0, 2, 3, 1)).astype(jnp.float32)          # NHWC
    # OIHW -> HWIO -> (9*Cin, Cout); row order (dy, dx, cin) matches im2col taps.
    w1 = jnp.transpose(w1_oihw, (2, 3, 1, 0)).reshape(9 * Cin, Cout).astype(compute_dtype)
    w2 = jnp.transpose(w2_oihw, (2, 3, 1, 0)).reshape(9 * Cout, Cout).astype(compute_dtype)
    s1, b1 = _fuse_bn(bn1, eps)
    s2, b2 = _fuse_bn(bn2, eps)

    out_nhwc = pl.pallas_call(
        basic_block_kernel,
        out_shape=jax.ShapeDtypeStruct((N, H, W, Cout), jnp.float32),
        grid_spec=pltpu.PrefetchScalarGridSpec(
            num_scalar_prefetch=0,
            grid=(N,),
            in_specs=[
                pl.BlockSpec((1, H, W, Cin), lambda n: (n, 0, 0, 0)),
                pl.BlockSpec((9 * Cin, Cout), lambda n: (0, 0)),
                pl.BlockSpec((1, Cout), lambda n: (0, 0)),
                pl.BlockSpec((1, Cout), lambda n: (0, 0)),
                pl.BlockSpec((9 * Cout, Cout), lambda n: (0, 0)),
                pl.BlockSpec((1, Cout), lambda n: (0, 0)),
                pl.BlockSpec((1, Cout), lambda n: (0, 0)),
            ],
            out_specs=pl.BlockSpec((1, H, W, Cout), lambda n: (n, 0, 0, 0)),
            scratch_shapes=[
                pltpu.VMEM((H + 2, W + 2, Cin), jnp.float32),
                pltpu.VMEM((H + 2, W + 2, Cout), jnp.float32),
            ],
        ),
        compiler_params=pltpu.CompilerParams(dimension_semantics=("parallel",)),
    )(x, w1, s1, b1, w2, s2, b2)

    return jnp.transpose(out_nhwc, (0, 3, 1, 2))                         # back to NCHW


def reference_forward(x_nchw, w1, bn1, w2, bn2, *, eps=1e-5):
    """Pure-JAX reference (NCHW / OIHW), eval-mode BN, dropout = identity."""
    def conv(x, w):
        return lax.conv_general_dilated(
            x, w, window_strides=(1, 1), padding=((1, 1), (1, 1)),
            dimension_numbers=("NCHW", "OIHW", "NCHW"))

    def bn(x, p):
        g, b, m, v = (a[None, :, None, None] for a in p)
        return (x - m) / jnp.sqrt(v + eps) * g + b

    out = jnp.maximum(bn(conv(x_nchw, w1), bn1), 0.0)
    out = bn(conv(out, w2), bn2)
    return jnp.maximum(out + x_nchw, 0.0)


if __name__ == "__main__":
    N, C, H, W = 2, 4, 16, 16          # in_channels == out_channels, stride=1, downsample=None
    key = jax.random.PRNGKey(0)
    kx, kw1, kw2, kb1, kb2 = jax.random.split(key, 5)

    x = jax.random.normal(kx, (N, C, H, W), jnp.float32)
    w1 = jax.random.normal(kw1, (C, C, 3, 3), jnp.float32) * 0.2
    w2 = jax.random.normal(kw2, (C, C, 3, 3), jnp.float32) * 0.2

    def make_bn(k):
        kg, kb, km, kv = jax.random.split(k, 4)
        gamma = 1.0 + 0.1 * jax.random.normal(kg, (C,), jnp.float32)
        beta = 0.1 * jax.random.normal(kb, (C,), jnp.float32)
        mean = 0.1 * jax.random.normal(km, (C,), jnp.float32)
        var = 0.5 + jnp.abs(jax.random.normal(kv, (C,), jnp.float32))
        return (gamma, beta, mean, var)

    bn1 = make_bn(kb1)
    bn2 = make_bn(kb2)

    ref = jax.block_until_ready(reference_forward(x, w1, bn1, w2, bn2))

    # f32 MXU path (tight tolerance)
    out = jax.block_until_ready(basic_block_forward(x, w1, bn1, w2, bn2))
    np.testing.assert_allclose(np.asarray(out), np.asarray(ref), rtol=1e-4, atol=1e-4)

    # bf16 MXU path (operands cast at the dot boundary only; f32 accumulate/epilogue)
    out_bf16 = jax.block_until_ready(
        basic_block_forward(x, w1, bn1, w2, bn2, compute_dtype=jnp.bfloat16))
    np.testing.assert_allclose(np.asarray(out_bf16), np.asarray(ref), rtol=1e-1, atol=1e-1)

    print("KERNEL_OK")
</pallas_src>

<mosaic_0001>
module attributes {stable_mosaic.version = 11 : i64} {
  func.func @basic_block_kernel(%arg0: i32, %arg1: memref<1x16x16x4xf32, #tpu.memory_space<vmem>>, %arg2: memref<36x4xf32, #tpu.memory_space<vmem>>, %arg3: memref<1x4xf32, #tpu.memory_space<vmem>>, %arg4: memref<1x4xf32, #tpu.memory_space<vmem>>, %arg5: memref<36x4xf32, #tpu.memory_space<vmem>>, %arg6: memref<1x4xf32, #tpu.memory_space<vmem>>, %arg7: memref<1x4xf32, #tpu.memory_space<vmem>>, %arg8: memref<1x16x16x4xf32, #tpu.memory_space<vmem>>, %arg9: memref<18x18x4xf32, #tpu.memory_space<vmem>>, %arg10: memref<18x18x4xf32, #tpu.memory_space<vmem>>) attributes {dimension_semantics = [#tpu.dimension_semantics<parallel>], iteration_bounds = array<i64: 2>, scalar_prefetch = 0 : i64, scratch_operands = 2 : i64, tpu.core_type = #tpu.core_type<tc>, window_params = [{transform_indices = @transform_0, window_bounds = array<i64: 1, 16, 16, 4>}, {pipeline_mode = #tpu.pipeline_mode<synchronous>, transform_indices = @transform_1, window_bounds = array<i64: 36, 4>}, {pipeline_mode = #tpu.pipeline_mode<synchronous>, transform_indices = @transform_2, window_bounds = array<i64: 1, 4>}, {pipeline_mode = #tpu.pipeline_mode<synchronous>, transform_indices = @transform_3, window_bounds = array<i64: 1, 4>}, {pipeline_mode = #tpu.pipeline_mode<synchronous>, transform_indices = @transform_4, window_bounds = array<i64: 36, 4>}, {pipeline_mode = #tpu.pipeline_mode<synchronous>, transform_indices = @transform_5, window_bounds = array<i64: 1, 4>}, {pipeline_mode = #tpu.pipeline_mode<synchronous>, transform_indices = @transform_6, window_bounds = array<i64: 1, 4>}, {transform_indices = @transform_7, window_bounds = array<i64: 1, 16, 16, 4>}]} {
    %cst = arith.constant 0.000000e+00 : f32
    %0 = vector.broadcast %cst : f32 to vector<1x18x4xf32>
    %cst_0 = arith.constant 0.000000e+00 : f32
    %1 = vector.broadcast %cst_0 : f32 to vector<18x1x4xf32>
    %c0 = arith.constant 0 : index
    %c0_1 = arith.constant 0 : index
    %c0_2 = arith.constant 0 : index
    %2 = vector.load %arg9[%c0, %c0_1, %c0_2] : memref<18x18x4xf32, #tpu.memory_space<vmem>>, vector<1x18x4xf32>
    tpu.vector_store %arg9[%c0, %c0_1, %c0_2], %0 {strides = array<i32>} : memref<18x18x4xf32, #tpu.memory_space<vmem>>, vector<1x18x4xf32>,
    %c17 = arith.constant 17 : index
    %c0_3 = arith.constant 0 : index
    %c0_4 = arith.constant 0 : index
    %3 = vector.load %arg9[%c17, %c0_3, %c0_4] : memref<18x18x4xf32, #tpu.memory_space<vmem>>, vector<1x18x4xf32>
    tpu.vector_store %arg9[%c17, %c0_3, %c0_4], %0 {strides = array<i32>} : memref<18x18x4xf32, #tpu.memory_space<vmem>>, vector<1x18x4xf32>,
    %c0_5 = arith.constant 0 : index
    %c0_6 = arith.constant 0 : index
    %c0_7 = arith.constant 0 : index
    %4 = vector.load %arg9[%c0_5, %c0_6, %c0_7] : memref<18x18x4xf32, #tpu.memory_space<vmem>>, vector<18x1x4xf32>
    tpu.vector_store %arg9[%c0_5, %c0_6, %c0_7], %1 {strides = array<i32>} : memref<18x18x4xf32, #tpu.memory_space<vmem>>, vector<18x1x4xf32>,
    %c0_8 = arith.constant 0 : index
    %c17_9 = arith.constant 17 : index
    %c0_10 = arith.constant 0 : index
    %5 = vector.load %arg9[%c0_8, %c17_9, %c0_10] : memref<18x18x4xf32, #tpu.memory_space<vmem>>, vector<18x1x4xf32>
    tpu.vector_store %arg9[%c0_8, %c17_9, %c0_10], %1 {strides = array<i32>} : memref<18x18x4xf32, #tpu.memory_space<vmem>>, vector<18x1x4xf32>,
    %cst_11 = arith.constant 0.000000e+00 : f32
    %6 = vector.broadcast %cst_11 : f32 to vector<1x18x4xf32>
    %cst_12 = arith.constant 0.000000e+00 : f32
    %7 = vector.broadcast %cst_12 : f32 to vector<18x1x4xf32>
    %c0_13 = arith.constant 0 : index
    %c0_14 = arith.constant 0 : index
    %c0_15 = arith.constant 0 : index
    %8 = vector.load %arg10[%c0_13, %c0_14, %c0_15] : memref<18x18x4xf32, #tpu.memory_space<vmem>>, vector<1x18x4xf32>
    tpu.vector_store %arg10[%c0_13, %c0_14, %c0_15], %6 {strides = array<i32>} : memref<18x18x4xf32, #tpu.memory_space<vmem>>, vector<1x18x4xf32>,
    %c17_16 = arith.constant 17 : index
    %c0_17 = arith.constant 0 : index
    %c0_18 = arith.constant 0 : index
    %9 = vector.load %arg10[%c17_16, %c0_17, %c0_18] : memref<18x18x4xf32, #tpu.memory_space<vmem>>, vector<1x18x4xf32>
    tpu.vector_store %arg10[%c17_16, %c0_17, %c0_18], %6 {strides = array<i32>} : memref<18x18x4xf32, #tpu.memory_space<vmem>>, vector<1x18x4xf32>,
    %c0_19 = arith.constant 0 : index
    %c0_20 = arith.constant 0 : index
    %c0_21 = arith.constant 0 : index
    %10 = vector.load %arg10[%c0_19, %c0_20, %c0_21] : memref<18x18x4xf32, #tpu.memory_space<vmem>>, vector<18x1x4xf32>
    tpu.vector_store %arg10[%c0_19, %c0_20, %c0_21], %7 {strides = array<i32>} : memref<18x18x4xf32, #tpu.memory_space<vmem>>, vector<18x1x4xf32>,
    %c0_22 = arith.constant 0 : index
    %c17_23 = arith.constant 17 : index
    %c0_24 = arith.constant 0 : index
    %11 = vector.load %arg10[%c0_22, %c17_23, %c0_24] : memref<18x18x4xf32, #tpu.memory_space<vmem>>, vector<18x1x4xf32>
    tpu.vector_store %arg10[%c0_22, %c17_23, %c0_24], %7 {strides = array<i32>} : memref<18x18x4xf32, #tpu.memory_space<vmem>>, vector<18x1x4xf32>,
    %c0_25 = arith.constant 0 : index
    %c0_26 = arith.constant 0 : index
    %c0_27 = arith.constant 0 : index
    %c0_28 = arith.constant 0 : index
    %12 = vector.load %arg1[%c0_25, %c0_26, %c0_27, %c0_28] : memref<1x16x16x4xf32, #tpu.memory_space<vmem>>, vector<1x16x16x4xf32>
    %13 = vector.shape_cast %12 : vector<1x16x16x4xf32> to vector<16x16x4xf32>
    %c1 = arith.constant 1 : index
    %c1_29 = arith.constant 1 : index
    %c0_30 = arith.constant 0 : index
    %14 = vector.load %arg9[%c1, %c1_29, %c0_30] : memref<18x18x4xf32, #tpu.memory_space<vmem>>, vector<16x16x4xf32>
    tpu.vector_store %arg9[%c1, %c1_29, %c0_30], %13 {strides = array<i32>} : memref<18x18x4xf32, #tpu.memory_space<vmem>>, vector<16x16x4xf32>,
    %c0_31 = arith.constant 0 : index
    %c0_32 = arith.constant 0 : index
    %15 = vector.load %arg3[%c0_31, %c0_32] : memref<1x4xf32, #tpu.memory_space<vmem>>, vector<1x4xf32>
    %c0_33 = arith.constant 0 : index
    %c0_34 = arith.constant 0 : index
    %16 = vector.load %arg4[%c0_33, %c0_34] : memref<1x4xf32, #tpu.memory_space<vmem>>, vector<1x4xf32>
    %c0_35 = arith.constant 0 : index
    %c0_36 = arith.constant 0 : index
    %17 = vector.load %arg6[%c0_35, %c0_36] : memref<1x4xf32, #tpu.memory_space<vmem>>, vector<1x4xf32>
    %c0_37 = arith.constant 0 : index
    %c0_38 = arith.constant 0 : index
    %18 = vector.load %arg7[%c0_37, %c0_38] : memref<1x4xf32, #tpu.memory_space<vmem>>, vector<1x4xf32>
    %c0_39 = arith.constant 0 : index
    %c0_40 = arith.constant 0 : index
    %c0_41 = arith.constant 0 : index
    %19 = vector.load %arg9[%c0_39, %c0_40, %c0_41] : memref<18x18x4xf32, #tpu.memory_space<vmem>>, vector<16x16x4xf32>
    %20 = vector.shape_cast %19 : vector<16x16x4xf32> to vector<256x4xf32>
    %c0_42 = arith.constant 0 : index
    %c1_43 = arith.constant 1 : index
    %c0_44 = arith.constant 0 : index
    %21 = vector.load %arg9[%c0_42, %c1_43, %c0_44] : memref<18x18x4xf32, #tpu.memory_space<vmem>>, vector<16x16x4xf32>
    %22 = vector.shape_cast %21 : vector<16x16x4xf32> to vector<256x4xf32>
    %c0_45 = arith.constant 0 : index
    %c2 = arith.constant 2 : index
    %c0_46 = arith.constant 0 : index
    %23 = vector.load %arg9[%c0_45, %c2, %c0_46] : memref<18x18x4xf32, #tpu.memory_space<vmem>>, vector<16x16x4xf32>
    %24 = vector.shape_cast %23 : vector<16x16x4xf32> to vector<256x4xf32>
    %c1_47 = arith.constant 1 : index
    %c0_48 = arith.constant 0 : index
    %c0_49 = arith.constant 0 : index
    %25 = vector.load %arg9[%c1_47, %c0_48, %c0_49] : memref<18x18x4xf32, #tpu.memory_space<vmem>>, vector<16x16x4xf32>
    %26 = vector.shape_cast %25 : vector<16x16x4xf32> to vector<256x4xf32>
    %c1_50 = arith.constant 1 : index
    %c1_51 = arith.constant 1 : index
    %c0_52 = arith.constant 0 : index
    %27 = vector.load %arg9[%c1_50, %c1_51, %c0_52] : memref<18x18x4xf32, #tpu.memory_space<vmem>>, vector<16x16x4xf32>
    %28 = vector.shape_cast %27 : vector<16x16x4xf32> to vector<256x4xf32>
    %c1_53 = arith.constant 1 : index
    %c2_54 = arith.constant 2 : index
    %c0_55 = arith.constant 0 : index
    %29 = vector.load %arg9[%c1_53, %c2_54, %c0_55] : memref<18x18x4xf32, #tpu.memory_space<vmem>>, vector<16x16x4xf32>
    %30 = vector.shape_cast %29 : vector<16x16x4xf32> to vector<256x4xf32>
    %c2_56 = arith.constant 2 : index
    %c0_57 = arith.constant 0 : index
    %c0_58 = arith.constant 0 : index
    %31 = vector.load %arg9[%c2_56, %c0_57, %c0_58] : memref<18x18x4xf32, #tpu.memory_space<vmem>>, vector<16x16x4xf32>
    %32 = vector.shape_cast %31 : vector<16x16x4xf32> to vector<256x4xf32>
    %c2_59 = arith.constant 2 : index
    %c1_60 = arith.constant 1 : index
    %c0_61 = arith.constant 0 : index
    %33 = vector.load %arg9[%c2_59, %c1_60, %c0_61] : memref<18x18x4xf32, #tpu.memory_space<vmem>>, vector<16x16x4xf32>
    %34 = vector.shape_cast %33 : vector<16x16x4xf32> to vector<256x4xf32>
    %c2_62 = arith.constant 2 : index
    %c2_63 = arith.constant 2 : index
    %c0_64 = arith.constant 0 : index
    %35 = vector.load %arg9[%c2_62, %c2_63, %c0_64] : memref<18x18x4xf32, #tpu.memory_space<vmem>>, vector<16x16x4xf32>
    %36 = vector.shape_cast %35 : vector<16x16x4xf32> to vector<256x4xf32>
    %37 = tpu.concatenate %20, %22, %24, %26, %28, %30, %32, %34, %36 in 1 : vector<256x4xf32>, vector<256x4xf32>, vector<256x4xf32>, vector<256x4xf32>, vector<256x4xf32>, vector<256x4xf32>, vector<256x4xf32>, vector<256x4xf32>, vector<256x4xf32> -> vector<256x36xf32>
    %c0_65 = arith.constant 0 : index
    %c0_66 = arith.constant 0 : index
    %38 = vector.load %arg2[%c0_65, %c0_66] : memref<36x4xf32, #tpu.memory_space<vmem>>, vector<36x4xf32>
    %cst_67 = arith.constant dense<0.000000e+00> : vector<256x4xf32>
    %39 = tpu.matmul %37, %38, %cst_67 {dimension_numbers = #tpu.dot_dimension_numbers<[1], [0], [0], [1], [0, 0, 1, 1], [], []>} : vector<256x36xf32>, vector<36x4xf32>, vector<256x4xf32> -> vector<256x4xf32>
    %40 = vector.broadcast %15 : vector<1x4xf32> to vector<256x4xf32>
    %41 = arith.mulf %39, %40 : vector<256x4xf32>
    %42 = vector.broadcast %16 : vector<1x4xf32> to vector<256x4xf32>
    %43 = arith.addf %41, %42 : vector<256x4xf32>
    %cst_68 = arith.constant 0.000000e+00 : f32
    %44 = vector.broadcast %cst_68 : f32 to vector<256x4xf32>
    %45 = arith.maximumf %43, %44 : vector<256x4xf32>
    %46 = vector.shape_cast %45 : vector<256x4xf32> to vector<16x16x4xf32>
    %c1_69 = arith.constant 1 : index
    %c1_70 = arith.constant 1 : index
    %c0_71 = arith.constant 0 : index
    %47 = vector.load %arg10[%c1_69, %c1_70, %c0_71] : memref<18x18x4xf32, #tpu.memory_space<vmem>>, vector<16x16x4xf32>
    tpu.vector_store %arg10[%c1_69, %c1_70, %c0_71], %46 {strides = array<i32>} : memref<18x18x4xf32, #tpu.memory_space<vmem>>, vector<16x16x4xf32>,
    %c0_72 = arith.constant 0 : index
    %c0_73 = arith.constant 0 : index
    %c0_74 = arith.constant 0 : index
    %48 = vector.load %arg10[%c0_72, %c0_73, %c0_74] : memref<18x18x4xf32, #tpu.memory_space<vmem>>, vector<16x16x4xf32>
    %49 = vector.shape_cast %48 : vector<16x16x4xf32> to vector<256x4xf32>
    %c0_75 = arith.constant 0 : index
    %c1_76 = arith.constant 1 : index
    %c0_77 = arith.constant 0 : index
    %50 = vector.load %arg10[%c0_75, %c1_76, %c0_77] : memref<18x18x4xf32, #tpu.memory_space<vmem>>, vector<16x16x4xf32>
    %51 = vector.shape_cast %50 : vector<16x16x4xf32> to vector<256x4xf32>
    %c0_78 = arith.constant 0 : index
    %c2_79 = arith.constant 2 : index
    %c0_80 = arith.constant 0 : index
    %52 = vector.load %arg10[%c0_78, %c2_79, %c0_80] : memref<18x18x4xf32, #tpu.memory_space<vmem>>, vector<16x16x4xf32>
    %53 = vector.shape_cast %52 : vector<16x16x4xf32> to vector<256x4xf32>
    %c1_81 = arith.constant 1 : index
    %c0_82 = arith.constant 0 : index
    %c0_83 = arith.constant 0 : index
    %54 = vector.load %arg10[%c1_81, %c0_82, %c0_83] : memref<18x18x4xf32, #tpu.memory_space<vmem>>, vector<16x16x4xf32>
    %55 = vector.shape_cast %54 : vector<16x16x4xf32> to vector<256x4xf32>
    %c1_84 = arith.constant 1 : index
    %c1_85 = arith.constant 1 : index
    %c0_86 = arith.constant 0 : index
    %56 = vector.load %arg10[%c1_84, %c1_85, %c0_86] : memref<18x18x4xf32, #tpu.memory_space<vmem>>, vector<16x16x4xf32>
    %57 = vector.shape_cast %56 : vector<16x16x4xf32> to vector<256x4xf32>
    %c1_87 = arith.constant 1 : index
    %c2_88 = arith.constant 2 : index
    %c0_89 = arith.constant 0 : index
    %58 = vector.load %arg10[%c1_87, %c2_88, %c0_89] : memref<18x18x4xf32, #tpu.memory_space<vmem>>, vector<16x16x4xf32>
    %59 = vector.shape_cast %58 : vector<16x16x4xf32> to vector<256x4xf32>
    %c2_90 = arith.constant 2 : index
    %c0_91 = arith.constant 0 : index
    %c0_92 = arith.constant 0 : index
    %60 = vector.load %arg10[%c2_90, %c0_91, %c0_92] : memref<18x18x4xf32, #tpu.memory_space<vmem>>, vector<16x16x4xf32>
    %61 = vector.shape_cast %60 : vector<16x16x4xf32> to vector<256x4xf32>
    %c2_93 = arith.constant 2 : index
    %c1_94 = arith.constant 1 : index
    %c0_95 = arith.constant 0 : index
    %62 = vector.load %arg10[%c2_93, %c1_94, %c0_95] : memref<18x18x4xf32, #tpu.memory_space<vmem>>, vector<16x16x4xf32>
    %63 = vector.shape_cast %62 : vector<16x16x4xf32> to vector<256x4xf32>
    %c2_96 = arith.constant 2 : index
    %c2_97 = arith.constant 2 : index
    %c0_98 = arith.constant 0 : index
    %64 = vector.load %arg10[%c2_96, %c2_97, %c0_98] : memref<18x18x4xf32, #tpu.memory_space<vmem>>, vector<16x16x4xf32>
    %65 = vector.shape_cast %64 : vector<16x16x4xf32> to vector<256x4xf32>
    %66 = tpu.concatenate %49, %51, %53, %55, %57, %59, %61, %63, %65 in 1 : vector<256x4xf32>, vector<256x4xf32>, vector<256x4xf32>, vector<256x4xf32>, vector<256x4xf32>, vector<256x4xf32>, vector<256x4xf32>, vector<256x4xf32>, vector<256x4xf32> -> vector<256x36xf32>
    %c0_99 = arith.constant 0 : index
    %c0_100 = arith.constant 0 : index
    %67 = vector.load %arg5[%c0_99, %c0_100] : memref<36x4xf32, #tpu.memory_space<vmem>>, vector<36x4xf32>
    %cst_101 = arith.constant dense<0.000000e+00> : vector<256x4xf32>
    %68 = tpu.matmul %66, %67, %cst_101 {dimension_numbers = #tpu.dot_dimension_numbers<[1], [0], [0], [1], [0, 0, 1, 1], [], []>} : vector<256x36xf32>, vector<36x4xf32>, vector<256x4xf32> -> vector<256x4xf32>
    %c1_102 = arith.constant 1 : index
    %c1_103 = arith.constant 1 : index
    %c0_104 = arith.constant 0 : index
    %69 = vector.load %arg9[%c1_102, %c1_103, %c0_104] : memref<18x18x4xf32, #tpu.memory_space<vmem>>, vector<16x16x4xf32>
    %70 = vector.shape_cast %69 : vector<16x16x4xf32> to vector<256x4xf32>
    %71 = vector.broadcast %17 : vector<1x4xf32> to vector<256x4xf32>
    %72 = arith.mulf %68, %71 : vector<256x4xf32>
    %73 = vector.broadcast %18 : vector<1x4xf32> to vector<256x4xf32>
    %74 = arith.addf %72, %73 : vector<256x4xf32>
    %75 = arith.addf %74, %70 : vector<256x4xf32>
    %cst_105 = arith.constant 0.000000e+00 : f32
    %76 = vector.broadcast %cst_105 : f32 to vector<256x4xf32>
    %77 = arith.maximumf %75, %76 : vector<256x4xf32>
    %78 = vector.shape_cast %77 : vector<256x4xf32> to vector<1x16x16x4xf32>
    %c0_106 = arith.constant 0 : index
    %c0_107 = arith.constant 0 : index
    %c0_108 = arith.constant 0 : index
    %c0_109 = arith.constant 0 : index
    %79 = vector.load %arg8[%c0_106, %c0_107, %c0_108, %c0_109] : memref<1x16x16x4xf32, #tpu.memory_space<vmem>>, vector<1x16x16x4xf32>
    tpu.vector_store %arg8[%c0_106, %c0_107, %c0_108, %c0_109], %78 {strides = array<i32>} : memref<1x16x16x4xf32, #tpu.memory_space<vmem>>, vector<1x16x16x4xf32>,
    return
  }
  func.func @transform_0(%arg0: i32) -> (i32, i32, i32, i32) {
    %c0_i32 = arith.constant 0 : i32
    %c0_i32_0 = arith.constant 0 : i32
    %c0_i32_1 = arith.constant 0 : i32
    %c0_i32_2 = arith.constant 0 : i32
    return %arg0, %c0_i32, %c0_i32_0, %c0_i32_1 : i32, i32, i32, i32
  }
  func.func @transform_1(%arg0: i32) -> (i32, i32) {
    %c0_i32 = arith.constant 0 : i32
    %c0_i32_0 = arith.constant 0 : i32
    %c0_i32_1 = arith.constant 0 : i32
    return %c0_i32, %c0_i32_0 : i32, i32
  }
  func.func @transform_2(%arg0: i32) -> (i32, i32) {
    %c0_i32 = arith.constant 0 : i32
    %c0_i32_0 = arith.constant 0 : i32
    %c0_i32_1 = arith.constant 0 : i32
    return %c0_i32, %c0_i32_0 : i32, i32
  }
  func.func @transform_3(%arg0: i32) -> (i32, i32) {
    %c0_i32 = arith.constant 0 : i32
    %c0_i32_0 = arith.constant 0 : i32
    %c0_i32_1 = arith.constant 0 : i32
    return %c0_i32, %c0_i32_0 : i32, i32
  }
  func.func @transform_4(%arg0: i32) -> (i32, i32) {
    %c0_i32 = arith.constant 0 : i32
    %c0_i32_0 = arith.constant 0 : i32
    %c0_i32_1 = arith.constant 0 : i32
    return %c0_i32, %c0_i32_0 : i32, i32
  }
  func.func @transform_5(%arg0: i32) -> (i32, i32) {
    %c0_i32 = arith.constant 0 : i32
    %c0_i32_0 = arith.constant 0 : i32
    %c0_i32_1 = arith.constant 0 : i32
    return %c0_i32, %c0_i32_0 : i32, i32
  }
  func.func @transform_6(%arg0: i32) -> (i32, i32) {
    %c0_i32 = arith.constant 0 : i32
    %c0_i32_0 = arith.constant 0 : i32
    %c0_i32_1 = arith.constant 0 : i32
    return %c0_i32, %c0_i32_0 : i32, i32
  }
  func.func @transform_7(%arg0: i32) -> (i32, i32, i32, i32) {
    %c0_i32 = arith.constant 0 : i32
    %c0_i32_0 = arith.constant 0 : i32
    %c0_i32_1 = arith.constant 0 : i32
    %c0_i32_2 = arith.constant 0 : i32
    return %arg0, %c0_i32, %c0_i32_0, %c0_i32_1 : i32, i32, i32, i32
  }
}

</mosaic_0001>

<bundles_post_ra>
// kernel: tpu_custom_call.1
= control target key start
LH: loop header
LB: loop body
LE: loop exit
PB: predicated region body
PF: predicated region fallthrough
CT: control target
= control target key end

     0   :  { %s4615_s24 = smov 0   ;;  %s8084_s0 = inlined_call_operand.vmem [shape: f32[2,16,16,4], index: 0, kind: input, shape index: {}]   ;;  %s8085_s1 = inlined_call_operand.vmem [shape: f32[36,4], index: 1, kind: input, shape index: {}]   ;;  %s8086_s2 = inlined_call_operand.vmem [shape: f32[1,4], index: 2, kind: input, shape index: {}]   ;;  %s8087_s3 = inlined_call_operand.vmem [shape: f32[1,4], index: 3, kind: input, shape index: {}]   ;;  %s8088_s4 = inlined_call_operand.vmem [shape: f32[36,4], index: 4, kind: input, shape index: {}]   ;;  %s8089_s5 = inlined_call_operand.vmem [shape: f32[1,4], index: 5, kind: input, shape index: {}]   ;;  %s8090_s6 = inlined_call_operand.vmem [shape: f32[1,4], index: 6, kind: input, shape index: {}]   ;;  %s8091_s7 = inlined_call_operand.vmem [shape: f32[2,16,16,4], index: 7, kind: output, shape index: {}]  }
   0x1 LB: > { %s4406_s25 = sadd.s32 4294967295, %s4564_s24   ;;  %p4410_p0 = scmp.ge.s32.totalorder %s4564_s24, 1  ;;  %s4564_s24 = sphi %s4615_s24, %s17_s24  }
   0x2   : > { %p237_p1 = scmp.lt.s32.totalorder %s4564_s24, 3 }
   0x4   : > { %p238_p2 = pnand %p4410_p0, %p237_p1 }
   0x6   : > { %241 = sbr.rel (%p238_p2) target bundleno = 1875 (0x753), region = 48 }
   0xb   : > { %vm279_vm0 = vcmask 31744   ;;  %p269_p3 = scmp.lt.s32.totalorder %s4406_s25, 1  ;;  %v4566_v0 = vmov 0.0   ;;  %vm282_vm1 = vcmask 25600   ;;  %s4567_s30 = smov 4   ;;  %vm288_vm2 = vcmask 24576  }
   0xc   : > { %280 = vst.msk [vmem:[#allocation2] sm:$0xff] %vm279_vm0, %v4566_v0  ;;  %s4568_s8 = smov 8   ;;  %s4569_s9 = smov 12   ;;  %vm2115_vm3 = vcmask 1043456   ;;  %vm1782_vm4 = vcmask 64512   ;;  %vm1815_vm5 = vcmask 97280  }
   0xd   : > { %281 = vst.msk [vmem:[#allocation2 + $0x8] sm:$0xff] %vm279_vm0, %v4566_v0  ;;  %s8728_s25 = smov (!%p269_p3, %s4406_s25), 1  ;;  %s4570_s10 = smov 16   ;;  %vm1881_vm6 = vcmask 162816   ;;  %vm1848_vm7 = vcmask 130048   ;;  %vm1914_vm8 = vcmask 195584  }
   0xe   : > { %285 = vst.msk [vmem:[#allocation2 + $0x198] sm:$0xff] %vm279_vm0, %v4566_v0  ;;  %s4483_s26 = sshll.u32 %s8728_s25, 8  ;;  %s4571_s11 = smov 20   ;;  %vm1980_vm9 = vcmask 261120   ;;  %vm1947_vm10 = vcmask 228352   ;;  %vm2018_vm11 = vcmask 293888  }
   0xf   : > { %286 = vst.msk [vmem:[#allocation2 + $0x1a0] sm:$0xff] %vm279_vm0, %v4566_v0  ;;  %s4641_s29 = scalar_lea.vmem %s8084_s0, %s4483_s26  ;;  %s4572_s12 = smov 24  }
  0x10   : > { %325 = vst.msk [vmem:[#allocation3] sm:$0xff] %vm279_vm0, %v4566_v0  ;;  %v370_v1 = vld [vmem:[%s4641_s29 + $0x10] sm:$0xff]  ;;  %v368_v2 = vld [vmem:[%s4641_s29] sm:$0xff]  ;;  %v371_v4 = vld [vmem:[%s4641_s29 + $0x18] sm:$0xff]  ;;  %s4573_s13 = smov 28   ;;  %s4574_s14 = smov 32  }
  0x11   : > { %326 = vst.msk [vmem:[#allocation3 + $0x8] sm:$0xff] %vm279_vm0, %v4566_v0  ;;  %v369_v5 = vld [vmem:[%s4641_s29 + $0x8] sm:$0xff]  ;;  %v372_v6 = vld [vmem:[%s4641_s29 + $0x20] sm:$0xff]  ;;  %v374_v7 = vld [vmem:[%s4641_s29 + $0x30] sm:$0xff]  ;;  %s7822_s16 = scalar_lea.vmem %s8091_s7, %s4483_s26 }
  0x12   : > { %329 = vst.msk [vmem:[#allocation3 + $0x198] sm:$0xff] %vm279_vm0, %v4566_v0  ;;  %v373_v9 = vld [vmem:[%s4641_s29 + $0x28] sm:$0xff]  ;;  %v375_v11 = vld [vmem:[%s4641_s29 + $0x38] sm:$0xff]  ;;  %v376_v14 = vld [vmem:[%s4641_s29 + $0x40] sm:$0xff] }
  0x13   : > { %330 = vst.msk [vmem:[#allocation3 + $0x1a0] sm:$0xff] %vm279_vm0, %v4566_v0  ;;  %v377_v13 = vld [vmem:[%s4641_s29 + $0x48] sm:$0xff]  ;;  %v378_v15 = vld [vmem:[%s4641_s29 + $0x50] sm:$0xff]  ;;  %v380_v16 = vld [vmem:[%s4641_s29 + $0x60] sm:$0xff] }
  0x14   : > { %v469_v3 = vld [vmem:[#allocation2 + $0x1] sm:$0xff]  ;;  %403 = vst.msk [vmem:[#allocation2 + $0x31] sm:$0xff] %vm279_vm0, %v370_v1  ;;  %v379_v18 = vld [vmem:[%s4641_s29 + $0x58] sm:$0xff]  ;;  %v382_v23 = vld [vmem:[%s4641_s29 + $0x70] sm:$0xff] }
  0x15   : > { %758 = vrot.lane.b32.xlu0 %v469_v3, %s4567_s30  ;;  %401 = vst.msk [vmem:[#allocation2 + $0x19] sm:$0xff] %vm279_vm0, %v368_v2  ;;  %v381_v20 = vld [vmem:[%s4641_s29 + $0x68] sm:$0xff]  ;;  %v383_v22 = vld [vmem:[%s4641_s29 + $0x78] sm:$0xff]  ;;  %v384_v24 = vld [vmem:[%s4641_s29 + $0x80] sm:$0xff] }
  0x16   : > { %283 = vst.msk [vmem:[#allocation2 + $0x10] sm:$0x3] %vm282_vm1, %v4566_v0  ;;  %v386_v25 = vld [vmem:[%s4641_s29 + $0x90] sm:$0xff]  ;;  %v385_v26 = vld [vmem:[%s4641_s29 + $0x88] sm:$0xff]  ;;  %v387_v27 = vld [vmem:[%s4641_s29 + $0x98] sm:$0xff] }
  0x17   : > { %287 = vst.msk [vmem:[#allocation2 + $0x1a8] sm:$0x3] %vm282_vm1, %v4566_v0  ;;  %v389_v31 = vld [vmem:[%s4641_s29 + $0xa8] sm:$0xff]  ;;  %v388_v32 = vld [vmem:[%s4641_s29 + $0xa0] sm:$0xff]  ;;  %v390_v33 = vld [vmem:[%s4641_s29 + $0xb0] sm:$0xff] }
  0x18   : > { %327 = vst.msk [vmem:[#allocation3 + $0x10] sm:$0x3] %vm282_vm1, %v4566_v0  ;;  %v392_v37 = vld [vmem:[%s4641_s29 + $0xc0] sm:$0xff]  ;;  %v391_v38 = vld [vmem:[%s4641_s29 + $0xb8] sm:$0xff]  ;;  %v393_v39 = vld [vmem:[%s4641_s29 + $0xc8] sm:$0xff] }
  0x19   : > { %331 = vst.msk [vmem:[#allocation3 + $0x1a8] sm:$0x3] %vm282_vm1, %v4566_v0  ;;  %v395_v43 = vld [vmem:[%s4641_s29 + $0xd8] sm:$0xff]  ;;  %v394_v44 = vld [vmem:[%s4641_s29 + $0xd0] sm:$0xff]  ;;  %v396_v45 = vld [vmem:[%s4641_s29 + $0xe0] sm:$0xff] }
  0x1a   : > { %404 = vst.msk [vmem:[#allocation2 + $0x39] sm:$0xff] %vm279_vm0, %v371_v4  ;;  %v397_v49 = vld [vmem:[%s4641_s29 + $0xe8] sm:$0xff] }
  0x1b   : > { %v4663_v8 = vld [vmem:[#allocation2 + $0x31] sm:$0xff]  ;;  %402 = vst.msk [vmem:[#allocation2 + $0x21] sm:$0xff] %vm279_vm0, %v369_v5  ;;  %v501_v62 = vld [vmem:[#allocation2 + $0x2] sm:$0xff] }
  0x1c   : > { %766 = vrot.lane.b32.xlu2 %v4663_v8, %s4567_s30  ;;  %v4669_v10 = vld [vmem:[#allocation2 + $0x19] sm:$0xff]  ;;  %405 = vst.msk [vmem:[#allocation2 + $0x49] sm:$0xff] %vm279_vm0, %v372_v6 }
  0x1d   : > { %762 = vrot.lane.b32.xlu1 %v4669_v10, %s4567_s30  ;;  %v470_v12 = vld [vmem:[#allocation2 + $0x9] sm:$0xff]  ;;  %407 = vst.msk [vmem:[#allocation2 + $0x61] sm:$0xff] %vm279_vm0, %v374_v7 }
  0x1e   : > { %760 = vrot.lane.b32.xlu0 %v470_v12, %s4567_s30  ;;  %406 = vst.msk [vmem:[#allocation2 + $0x51] sm:$0xff] %vm279_vm0, %v373_v9 }
  0x1f   : > { %408 = vst.msk [vmem:[#allocation2 + $0x69] sm:$0xff] %vm279_vm0, %v375_v11 }
  0x20   : > { %410 = vst.msk [vmem:[#allocation2 + $0x81] sm:$0xff] %vm279_vm0, %v377_v13 }
  0x21   : > { %v4684_v17 = vld [vmem:[#allocation2 + $0x39] sm:$0xff]  ;;  %409 = vst.msk [vmem:[#allocation2 + $0x79] sm:$0xff] %vm279_vm0, %v376_v14 }
  0x22   : > { %v4688_v19 = vld [vmem:[#allocation2 + $0x21] sm:$0xff]  ;;  %411 = vst.msk [vmem:[#allocation2 + $0x91] sm:$0xff] %vm279_vm0, %v378_v15  ;;  %v4931_v4 = vld [vmem:[#allocation2 + $0x32] sm:$0xff] }
  0x23   : > { %v4692_v21 = vld [vmem:[#allocation2 + $0x49] sm:$0xff]  ;;  %413 = vst.msk [vmem:[#allocation2 + $0xa9] sm:$0xff] %vm279_vm0, %v380_v16  ;;  %v4927_v3 = vld [vmem:[#allocation2 + $0x1a] sm:$0xff] }
  0x24   : > { %768 = vrot.lane.b32.xlu2 %v4684_v17, %s4567_s30  ;;  %412 = vst.msk [vmem:[#allocation2 + $0x99] sm:$0xff] %vm279_vm0, %v379_v18  ;;  %v4712_v28 = vld [vmem:[#allocation2 + $0x61] sm:$0xff] }
  0x25   : > { %764 = vrot.lane.b32.xlu1 %v4688_v19, %s4567_s30  ;;  %414 = vst.msk [vmem:[#allocation2 + $0xb1] sm:$0xff] %vm279_vm0, %v381_v20  ;;  %v4715_v29 = vld [vmem:[#allocation2 + $0x51] sm:$0xff] }
  0x26   : > { %770 = vrot.lane.b32.xlu0 %v4692_v21, %s4567_s30  ;;  %416 = vst.msk [vmem:[#allocation2 + $0xc9] sm:$0xff] %vm279_vm0, %v383_v22  ;;  %v4718_v30 = vld [vmem:[#allocation2 + $0x69] sm:$0xff] }
  0x27   : > { %415 = vst.msk [vmem:[#allocation2 + $0xc1] sm:$0xff] %vm279_vm0, %v382_v23  ;;  %v4733_v34 = vld [vmem:[#allocation2 + $0x81] sm:$0xff]  ;;  %v4953_v6 = vld [vmem:[#allocation2 + $0x4a] sm:$0xff] }
  0x28   : > { %417 = vst.msk [vmem:[#allocation2 + $0xd9] sm:$0xff] %vm279_vm0, %v384_v24  ;;  %v4735_v35 = vld [vmem:[#allocation2 + $0x79] sm:$0xff]  ;;  %v4987_v13 = vld [vmem:[#allocation2 + $0x62] sm:$0xff] }
  0x29   : > { %419 = vst.msk [vmem:[#allocation2 + $0xf1] sm:$0xff] %vm279_vm0, %v386_v25  ;;  %v4737_v36 = vld [vmem:[#allocation2 + $0x91] sm:$0xff]  ;;  %v4991_v14 = vld [vmem:[#allocation2 + $0x7a] sm:$0xff] }
  0x2a   : > { %418 = vst.msk [vmem:[#allocation2 + $0xe1] sm:$0xff] %vm279_vm0, %v385_v26  ;;  %v4751_v40 = vld [vmem:[#allocation2 + $0xa9] sm:$0xff] }
  0x2b   : > { %420 = vst.msk [vmem:[#allocation2 + $0xf9] sm:$0xff] %vm279_vm0, %v387_v27  ;;  %v4753_v41 = vld [vmem:[#allocation2 + $0x99] sm:$0xff] }
  0x2c   : > { %774 = vrot.lane.b32.xlu2 %v4712_v28, %s4567_s30  ;;  %422 = vst.msk [vmem:[#allocation2 + $0x111] sm:$0xff] %vm279_vm0, %v389_v31  ;;  %v4755_v42 = vld [vmem:[#allocation2 + $0xb1] sm:$0xff] }
  0x2d   : > { %772 = vrot.lane.b32.xlu1 %v4715_v29, %s4567_s30  ;;  %421 = vst.msk [vmem:[#allocation2 + $0x109] sm:$0xff] %vm279_vm0, %v388_v32  ;;  %v4769_v46 = vld [vmem:[#allocation2 + $0xc9] sm:$0xff]  ;;  %v5015_v18 = vld [vmem:[#allocation2 + $0x92] sm:$0xff] }
  0x2e   : > { %776 = vrot.lane.b32.xlu0 %v4718_v30, %s4567_s30  ;;  %423 = vst.msk [vmem:[#allocation2 + $0x121] sm:$0xff] %vm279_vm0, %v390_v33  ;;  %v4771_v47 = vld [vmem:[#allocation2 + $0xc1] sm:$0xff]  ;;  %v5045_v27 = vld [vmem:[#allocation2 + $0xaa] sm:$0xff] }
  0x2f   : > { %425 = vst.msk [vmem:[#allocation2 + $0x139] sm:$0xff] %vm279_vm0, %v392_v37  ;;  %v4773_v48 = vld [vmem:[#allocation2 + $0xd9] sm:$0xff]  ;;  %v5047_v31 = vld [vmem:[#allocation2 + $0xc2] sm:$0xff] }
  0x30   : > { %424 = vst.msk [vmem:[#allocation2 + $0x129] sm:$0xff] %vm279_vm0, %v391_v38  ;;  %v4787_v50 = vld [vmem:[#allocation2 + $0xf1] sm:$0xff] }
  0x31   : > { %426 = vst.msk [vmem:[#allocation2 + $0x141] sm:$0xff] %vm279_vm0, %v393_v39  ;;  %v4791_v51 = vld [vmem:[#allocation2 + $0xe1] sm:$0xff] }
  0x32   : > { %428 = vst.msk [vmem:[#allocation2 + $0x159] sm:$0xff] %vm279_vm0, %v395_v43  ;;  %v4795_v52 = vld [vmem:[#allocation2 + $0xf9] sm:$0xff] }
  0x33   : > { %427 = vst.msk [vmem:[#allocation2 + $0x151] sm:$0xff] %vm279_vm0, %v394_v44  ;;  %v4815_v53 = vld [vmem:[#allocation2 + $0x111] sm:$0xff]  ;;  %v5061_v37 = vld [vmem:[#allocation2 + $0xda] sm:$0xff] }
  0x34   : > { %780 = vrot.lane.b32.xlu2 %v4733_v34, %s4567_s30  ;;  %429 = vst.msk [vmem:[#allocation2 + $0x169] sm:$0xff] %vm279_vm0, %v396_v45  ;;  %v4819_v54 = vld [vmem:[#allocation2 + $0x109] sm:$0xff] }
  0x35   : > { %778 = vrot.lane.b32.xlu1 %v4735_v35, %s4567_s30  ;;  %430 = vst.msk [vmem:[#allocation2 + $0x171] sm:$0xff] %vm279_vm0, %v397_v49  ;;  %v4823_v55 = vld [vmem:[#allocation2 + $0x121] sm:$0xff] }
  0x36   : > { %782 = vrot.lane.b32.xlu0 %v4737_v36, %s4567_s30  ;;  %307 = vst.msk [vmem:[#allocation2 + $0x11] sm:$0x1] %vm288_vm2, %v4566_v0  ;;  %v4843_v56 = vld [vmem:[#allocation2 + $0x139] sm:$0xff] }
  0x37   : > { %289 = vst.msk [vmem:[#allocation2] sm:$0x1] %vm288_vm2, %v4566_v0  ;;  %v4847_v57 = vld [vmem:[#allocation2 + $0x129] sm:$0xff] }
  0x38   : > { %290 = vst.msk [vmem:[#allocation2 + $0x18] sm:$0x1] %vm288_vm2, %v4566_v0  ;;  %v4851_v58 = vld [vmem:[#allocation2 + $0x141] sm:$0xff] }
  0x39   : > { %291 = vst.msk [vmem:[#allocation2 + $0x30] sm:$0x1] %vm288_vm2, %v4566_v0  ;;  %v4871_v59 = vld [vmem:[#allocation2 + $0x159] sm:$0xff] }
  0x3a   : > { %292 = vst.msk [vmem:[#allocation2 + $0x48] sm:$0x1] %vm288_vm2, %v4566_v0  ;;  %v4875_v60 = vld [vmem:[#allocation2 + $0x151] sm:$0xff] }
  0x3b   : > { %293 = vst.msk [vmem:[#allocation2 + $0x60] sm:$0x1] %vm288_vm2, %v4566_v0  ;;  %v4879_v61 = vld [vmem:[#allocation2 + $0x169] sm:$0xff] }
  0x3c   : > { %786 = vrot.lane.b32.xlu2 %v4751_v40, %s4567_s30  ;;  %294 = vst.msk [vmem:[#allocation2 + $0x78] sm:$0x1] %vm288_vm2, %v4566_v0  ;;  %v4901_v63 = vld [vmem:[#allocation2 + $0x171] sm:$0xff] }
  0x3d   : > { %784 = vrot.lane.b32.xlu1 %v4753_v41, %s4567_s30  ;;  %295 = vst.msk [vmem:[#allocation2 + $0x90] sm:$0x1] %vm288_vm2, %v4566_v0  ;;  %v502_v1 = vld [vmem:[#allocation2 + $0xa] sm:$0xff] }
  0x3e   : > { %788 = vrot.lane.b32.xlu0 %v4755_v42, %s4567_s30  ;;  %296 = vst.msk [vmem:[#allocation2 + $0xa8] sm:$0x1] %vm288_vm2, %v4566_v0 }
  0x3f   : > { %297 = vst.msk [vmem:[#allocation2 + $0xc0] sm:$0x1] %vm288_vm2, %v4566_v0 }
  0x40   : > { %298 = vst.msk [vmem:[#allocation2 + $0xd8] sm:$0x1] %vm288_vm2, %v4566_v0 }
  0x41   : > { %299 = vst.msk [vmem:[#allocation2 + $0xf0] sm:$0x1] %vm288_vm2, %v4566_v0 }
  0x42   : > { %300 = vst.msk [vmem:[#allocation2 + $0x108] sm:$0x1] %vm288_vm2, %v4566_v0 }
  0x43   : > { %301 = vst.msk [vmem:[#allocation2 + $0x120] sm:$0x1] %vm288_vm2, %v4566_v0 }
  0x44   : > { %792 = vrot.lane.b32.xlu2 %v4769_v46, %s4567_s30  ;;  %302 = vst.msk [vmem:[#allocation2 + $0x138] sm:$0x1] %vm288_vm2, %v4566_v0 }
  0x45   : > { %790 = vrot.lane.b32.xlu1 %v4771_v47, %s4567_s30  ;;  %303 = vst.msk [vmem:[#allocation2 + $0x150] sm:$0x1] %vm288_vm2, %v4566_v0 }
  0x46   : > { %794 = vrot.lane.b32.xlu0 %v4773_v48, %s4567_s30  ;;  %304 = vst.msk [vmem:[#allocation2 + $0x168] sm:$0x1] %vm288_vm2, %v4566_v0 }
  0x47   : > { %305 = vst.msk [vmem:[#allocation2 + $0x180] sm:$0x1] %vm288_vm2, %v4566_v0 }
  0x48   : > { %306 = vst.msk [vmem:[#allocation2 + $0x198] sm:$0x1] %vm288_vm2, %v4566_v0 }
  0x49   : > { %308 = vst.msk [vmem:[#allocation2 + $0x29] sm:$0x1] %vm288_vm2, %v4566_v0 }
  0x4a   : > { %309 = vst.msk [vmem:[#allocation2 + $0x41] sm:$0x1] %vm288_vm2, %v4566_v0 }
  0x4b   : > { %310 = vst.msk [vmem:[#allocation2 + $0x59] sm:$0x1] %vm288_vm2, %v4566_v0 }
  0x4c   : > { %798 = vrot.lane.b32.xlu2 %v4787_v50, %s4567_s30  ;;  %311 = vst.msk [vmem:[#allocation2 + $0x71] sm:$0x1] %vm288_vm2, %v4566_v0 }
  0x4d   : > { %796 = vrot.lane.b32.xlu1 %v4791_v51, %s4567_s30  ;;  %312 = vst.msk [vmem:[#allocation2 + $0x89] sm:$0x1] %vm288_vm2, %v4566_v0 }
  0x4e   : > { %800 = vrot.lane.b32.xlu0 %v4795_v52, %s4567_s30  ;;  %313 = vst.msk [vmem:[#allocation2 + $0xa1] sm:$0x1] %vm288_vm2, %v4566_v0 }
  0x4f   : > { %314 = vst.msk [vmem:[#allocation2 + $0xb9] sm:$0x1] %vm288_vm2, %v4566_v0 }
  0x50   : > { %315 = vst.msk [vmem:[#allocation2 + $0xd1] sm:$0x1] %vm288_vm2, %v4566_v0  ;;  %v4923_v2 = vld [vmem:[#allocation2 + $0x22] sm:$0xff] }
  0x51   : > { %316 = vst.msk [vmem:[#allocation2 + $0xe9] sm:$0x1] %vm288_vm2, %v4566_v0  ;;  %v4957_v7 = vld [vmem:[#allocation2 + $0x3a] sm:$0xff] }
  0x52   : > { %317 = vst.msk [vmem:[#allocation2 + $0x101] sm:$0x1] %vm288_vm2, %v4566_v0  ;;  %v4961_v9 = vld [vmem:[#allocation2 + $0x52] sm:$0xff] }
  0x53   : > { %318 = vst.msk [vmem:[#allocation2 + $0x119] sm:$0x1] %vm288_vm2, %v4566_v0  ;;  %v4983_v12 = vld [vmem:[#allocation2 + $0x6a] sm:$0xff] }
  0x54   : > { %804 = vrot.lane.b32.xlu2 %v4815_v53, %s4567_s30  ;;  %319 = vst.msk [vmem:[#allocation2 + $0x131] sm:$0x1] %vm288_vm2, %v4566_v0  ;;  %v5019_v20 = vld [vmem:[#allocation2 + $0x82] sm:$0xff] }
  0x55   : > { %802 = vrot.lane.b32.xlu1 %v4819_v54, %s4567_s30  ;;  %320 = vst.msk [vmem:[#allocation2 + $0x149] sm:$0x1] %vm288_vm2, %v4566_v0  ;;  %v5023_v22 = vld [vmem:[#allocation2 + $0x9a] sm:$0xff] }
  0x56   : > { %806 = vrot.lane.b32.xlu0 %v4823_v55, %s4567_s30  ;;  %321 = vst.msk [vmem:[#allocation2 + $0x161] sm:$0x1] %vm288_vm2, %v4566_v0  ;;  %v5043_v26 = vld [vmem:[#allocation2 + $0xb2] sm:$0xff] }
  0x57   : > { %322 = vst.msk [vmem:[#allocation2 + $0x179] sm:$0x1] %vm288_vm2, %v4566_v0  ;;  %v5063_v38 = vld [vmem:[#allocation2 + $0xca] sm:$0xff] }
  0x58   : > { %323 = vst.msk [vmem:[#allocation2 + $0x191] sm:$0x1] %vm288_vm2, %v4566_v0  ;;  %v5065_v39 = vld [vmem:[#allocation2 + $0xe2] sm:$0xff] }
  0x59   : > { %324 = vst.msk [vmem:[#allocation2 + $0x1a9] sm:$0x1] %vm288_vm2, %v4566_v0  ;;  %v5079_v49 = vld [vmem:[#allocation2 + $0xfa] sm:$0xff] }
  0x5a   : > { %332 = vst.msk [vmem:[#allocation3] sm:$0x1] %vm288_vm2, %v4566_v0 }
  0x5b   : > { %333 = vst.msk [vmem:[#allocation3 + $0x18] sm:$0x1] %vm288_vm2, %v4566_v0 }
  0x5c   : > { %810 = vrot.lane.b32.xlu2 %v4843_v56, %s4567_s30  ;;  %334 = vst.msk [vmem:[#allocation3 + $0x30] sm:$0x1] %vm288_vm2, %v4566_v0 }
  0x5d   : > { %808 = vrot.lane.b32.xlu1 %v4847_v57, %s4567_s30  ;;  %335 = vst.msk [vmem:[#allocation3 + $0x48] sm:$0x1] %vm288_vm2, %v4566_v0 }
  0x5e   : > { %812 = vrot.lane.b32.xlu0 %v4851_v58, %s4567_s30  ;;  %336 = vst.msk [vmem:[#allocation3 + $0x60] sm:$0x1] %vm288_vm2, %v4566_v0 }
  0x5f   : > { %337 = vst.msk [vmem:[#allocation3 + $0x78] sm:$0x1] %vm288_vm2, %v4566_v0 }
  0x60   : > { %338 = vst.msk [vmem:[#allocation3 + $0x90] sm:$0x1] %vm288_vm2, %v4566_v0 }
  0x61   : > { %339 = vst.msk [vmem:[#allocation3 + $0xa8] sm:$0x1] %vm288_vm2, %v4566_v0 }
  0x62   : > { %340 = vst.msk [vmem:[#allocation3 + $0xc0] sm:$0x1] %vm288_vm2, %v4566_v0 }
  0x63   : > { %341 = vst.msk [vmem:[#allocation3 + $0xd8] sm:$0x1] %vm288_vm2, %v4566_v0 }
  0x64   : > { %816 = vrot.lane.b32.xlu2 %v4871_v59, %s4567_s30  ;;  %342 = vst.msk [vmem:[#allocation3 + $0xf0] sm:$0x1] %vm288_vm2, %v4566_v0 }
  0x65   : > { %814 = vrot.lane.b32.xlu1 %v4875_v60, %s4567_s30  ;;  %343 = vst.msk [vmem:[#allocation3 + $0x108] sm:$0x1] %vm288_vm2, %v4566_v0 }
  0x66   : > { %818 = vrot.lane.b32.xlu0 %v4879_v61, %s4567_s30  ;;  %344 = vst.msk [vmem:[#allocation3 + $0x120] sm:$0x1] %vm288_vm2, %v4566_v0 }
  0x67   : > { %345 = vst.msk [vmem:[#allocation3 + $0x138] sm:$0x1] %vm288_vm2, %v4566_v0 }
  0x68   : > { %346 = vst.msk [vmem:[#allocation3 + $0x150] sm:$0x1] %vm288_vm2, %v4566_v0 }
  0x69   : > { %347 = vst.msk [vmem:[#allocation3 + $0x168] sm:$0x1] %vm288_vm2, %v4566_v0 }
  0x6a   : > { %348 = vst.msk [vmem:[#allocation3 + $0x180] sm:$0x1] %vm288_vm2, %v4566_v0 }
  0x6b   : > { %349 = vst.msk [vmem:[#allocation3 + $0x198] sm:$0x1] %vm288_vm2, %v4566_v0 }
  0x6c   : > { %886 = vrot.lane.b32.xlu2 %v501_v62, %s4568_s8  ;;  %350 = vst.msk [vmem:[#allocation3 + $0x11] sm:$0x1] %vm288_vm2, %v4566_v0  ;;  %v5081_v62 = vld [vmem:[#allocation2 + $0xf2] sm:$0xff] }
  0x6d   : > { %820 = vrot.lane.b32.xlu1 %v4901_v63, %s4567_s30  ;;  %351 = vst.msk [vmem:[#allocation3 + $0x29] sm:$0x1] %vm288_vm2, %v4566_v0 }
  0x6e   : > { %888 = vrot.lane.b32.xlu0 %v502_v1, %s4568_s8  ;;  %352 = vst.msk [vmem:[#allocation3 + $0x41] sm:$0x1] %vm288_vm2, %v4566_v0  ;;  %v5083_v1 = vld [vmem:[#allocation2 + $0x10a] sm:$0xff] }
  0x6f   : > { %353 = vst.msk [vmem:[#allocation3 + $0x59] sm:$0x1] %vm288_vm2, %v4566_v0 }
  0x70   : > { %354 = vst.msk [vmem:[#allocation3 + $0x71] sm:$0x1] %vm288_vm2, %v4566_v0 }
  0x71   : > { %355 = vst.msk [vmem:[#allocation3 + $0x89] sm:$0x1] %vm288_vm2, %v4566_v0 }
  0x72   : > { %356 = vst.msk [vmem:[#allocation3 + $0xa1] sm:$0x1] %vm288_vm2, %v4566_v0 }
  0x73   : > { %357 = vst.msk [vmem:[#allocation3 + $0xb9] sm:$0x1] %vm288_vm2, %v4566_v0 }
  0x74   : > { %892 = vrot.lane.b32.xlu2 %v4923_v2, %s4568_s8  ;;  %358 = vst.msk [vmem:[#allocation3 + $0xd1] sm:$0x1] %vm288_vm2, %v4566_v0 }
  0x75   : > { %890 = vrot.lane.b32.xlu1 %v4927_v3, %s4568_s8  ;;  %359 = vst.msk [vmem:[#allocation3 + $0xe9] sm:$0x1] %vm288_vm2, %v4566_v0 }
  0x76   : > { %894 = vrot.lane.b32.xlu0 %v4931_v4, %s4568_s8  ;;  %v4945_v5 = vpop.permute.xlu2 %766  ;;  %360 = vst.msk [vmem:[#allocation3 + $0x101] sm:$0x1] %vm288_vm2, %v4566_v0 }
  0x77   : > { %8143 = vst [vmem:[#allocation4_spill] sm:$0xff] %v4945_v5  ;;  %v5119_v5 = vld [vmem:[#allocation2 + $0x152] sm:$0xff] }
  0x78   : > { %361 = vst.msk [vmem:[#allocation3 + $0x119] sm:$0x1] %vm288_vm2, %v4566_v0 }
  0x79   : > { %362 = vst.msk [vmem:[#allocation3 + $0x131] sm:$0x1] %vm288_vm2, %v4566_v0 }
  0x7a   : > { %363 = vst.msk [vmem:[#allocation3 + $0x149] sm:$0x1] %vm288_vm2, %v4566_v0 }
  0x7b   : > { %364 = vst.msk [vmem:[#allocation3 + $0x161] sm:$0x1] %vm288_vm2, %v4566_v0 }
  0x7c   : > { %898 = vrot.lane.b32.xlu2 %v4953_v6, %s4568_s8  ;;  %365 = vst.msk [vmem:[#allocation3 + $0x179] sm:$0x1] %vm288_vm2, %v4566_v0 }
  0x7d   : > { %896 = vrot.lane.b32.xlu1 %v4957_v7, %s4568_s8  ;;  %366 = vst.msk [vmem:[#allocation3 + $0x191] sm:$0x1] %vm288_vm2, %v4566_v0 }
  0x7e   : > { %900 = vrot.lane.b32.xlu0 %v4961_v9, %s4568_s8  ;;  %v4975_v11 = vpop.permute.xlu2 %768  ;;  %367 = vst.msk [vmem:[#allocation3 + $0x1a9] sm:$0x1] %vm288_vm2, %v4566_v0 }
  0x7f   : > { %8144 = vst [vmem:[#allocation5_spill] sm:$0xff] %v4975_v11  ;;  %v5117_v11 = vld [vmem:[#allocation2 + $0x13a] sm:$0xff] }
  0x80   : > { %8164 = vst [vmem:[#allocation25_spill] sm:$0xff] %v5119_v5 }
  0x84   : > { %904 = vrot.lane.b32.xlu2 %v4983_v12, %s4568_s8 }
  0x85   : > { %902 = vrot.lane.b32.xlu1 %v4987_v13, %s4568_s8 }
  0x86   : > { %906 = vrot.lane.b32.xlu0 %v4991_v14, %s4568_s8  ;;  %v5005_v15 = vpop.permute.xlu2 %774 }
  0x87   : > { %8145 = vst [vmem:[#allocation6_spill] sm:$0xff] %v5005_v15  ;;  %v5009_v16 = vpop.permute.xlu0 %758  ;;  %v5097_v15 = vld [vmem:[#allocation2 + $0x122] sm:$0xff] }
  0x88   : > { %8146 = vst [vmem:[#allocation7_spill] sm:$0xff] %v5009_v16  ;;  %v440_v16 = vld [vmem:[#allocation2 + $0x20] sm:$0xff] }
  0x8c   : > { %910 = vrot.lane.b32.xlu2 %v5015_v18, %s4568_s8 }
  0x8d   : > { %908 = vrot.lane.b32.xlu1 %v5019_v20, %s4568_s8 }
  0x8e   : > { %912 = vrot.lane.b32.xlu0 %v5023_v22, %s4568_s8  ;;  %v5037_v23 = vpop.permute.xlu2 %780 }
  0x8f   : > { %8147 = vst [vmem:[#allocation8_spill] sm:$0xff] %v5037_v23  ;;  %v5039_v24 = vpop.permute.xlu1 %762 }
  0x90   : > { %8148 = vst [vmem:[#allocation9_spill] sm:$0xff] %v5039_v24  ;;  %v5041_v25 = vpop.permute.xlu0 %760  ;;  %v5135_v24 = vld [vmem:[#allocation2 + $0x15a] sm:$0xff] }
  0x91   : > { %8149 = vst [vmem:[#allocation10_spill] sm:$0xff] %v5041_v25  ;;  %v5137_v25 = vld [vmem:[#allocation2 + $0x172] sm:$0xff] }
  0x92   : > { %8169 = vst [vmem:[#allocation30_spill] sm:$0xff] %v5135_v24 }
  0x93   : > { %8170 = vst [vmem:[#allocation31_spill] sm:$0xff] %v5137_v25 }
  0x94   : > { %916 = vrot.lane.b32.xlu2 %v5043_v26, %s4568_s8 }
  0x95   : > { %914 = vrot.lane.b32.xlu1 %v5045_v27, %s4568_s8 }
  0x96   : > { %918 = vrot.lane.b32.xlu0 %v5047_v31, %s4568_s8  ;;  %v5055_v0 = vpop.permute.xlu2 %786 }
  0x97   : > { %8150 = vst [vmem:[#allocation11_spill] sm:$0xff] %v5055_v0  ;;  %v5057_v32 = vpop.permute.xlu1 %764 }
  0x98   : > { %8151 = vst [vmem:[#allocation12_spill] sm:$0xff] %v5057_v32  ;;  %v5059_v33 = vpop.permute.xlu0 %770  ;;  %v5133_v32 = vld [vmem:[#allocation2 + $0x16a] sm:$0xff] }
  0x99   : > { %8152 = vst [vmem:[#allocation13_spill] sm:$0xff] %v5059_v33  ;;  %v5115_v33 = vld [vmem:[#allocation2 + $0x142] sm:$0xff] }
  0x9a   : > { %8163 = vst [vmem:[#allocation24_spill] sm:$0xff] %v5115_v33 }
  0x9b   : > { %8168 = vst [vmem:[#allocation29_spill] sm:$0xff] %v5133_v32 }
  0x9c   : > { %922 = vrot.lane.b32.xlu2 %v5061_v37, %s4568_s8 }
  0x9d   : > { %920 = vrot.lane.b32.xlu1 %v5063_v38, %s4568_s8 }
  0x9e   : > { %924 = vrot.lane.b32.xlu0 %v5065_v39, %s4568_s8  ;;  %v5073_v43 = vpop.permute.xlu2 %792 }
  0x9f   : > { %8153 = vst [vmem:[#allocation14_spill] sm:$0xff] %v5073_v43  ;;  %v5075_v44 = vpop.permute.xlu1 %772  ;;  %v5101_v43 = vld [vmem:[#allocation2 + $0x12a] sm:$0xff] }
  0xa0   : > { %8154 = vst [vmem:[#allocation15_spill] sm:$0xff] %v5075_v44  ;;  %v5077_v45 = vpop.permute.xlu0 %776  ;;  %v5099_v44 = vld [vmem:[#allocation2 + $0x112] sm:$0xff] }
  0xa1   : > { %8155 = vst [vmem:[#allocation16_spill] sm:$0xff] %v5077_v45 }
  0xa2   : > { %8159 = vst [vmem:[#allocation20_spill] sm:$0xff] %v5101_v43 }
  0xa4   : > { %928 = vrot.lane.b32.xlu2 %v5079_v49, %s4568_s8 }
  0xa5   : > { %926 = vrot.lane.b32.xlu1 %v5081_v62, %s4568_s8 }
  0xa6   : > { %930 = vrot.lane.b32.xlu0 %v5083_v1, %s4568_s8  ;;  %v5091_v0 = vpop.permute.xlu2 %798 }
  0xa7   : > { %8156 = vst [vmem:[#allocation17_spill] sm:$0xff] %v5091_v0  ;;  %v5093_v23 = vpop.permute.xlu1 %778 }
  0xa8   : > { %8157 = vst [vmem:[#allocation18_spill] sm:$0xff] %v5093_v23  ;;  %v5095_v45 = vpop.permute.xlu0 %782 }
  0xa9   : > { %8158 = vst [vmem:[#allocation19_spill] sm:$0xff] %v5095_v45 }
  0xac   : > { %934 = vrot.lane.b32.xlu2 %v5097_v15, %s4568_s8 }
  0xad   : > { %932 = vrot.lane.b32.xlu1 %v5099_v44, %s4568_s8 }
  0xae   : > { %936 = vrot.lane.b32.xlu0 %v5101_v43, %s4568_s8  ;;  %v5109_v0 = vpop.permute.xlu2 %804  ;;  %v5226_v43 = vld [vmem:[#allocation2 + $0xe0] sm:$0xff] }
  0xaf   : > { %8160 = vst [vmem:[#allocation21_spill] sm:$0xff] %v5109_v0  ;;  %v5111_v23 = vpop.permute.xlu1 %784 }
  0xb0   : > { %8161 = vst [vmem:[#allocation22_spill] sm:$0xff] %v5111_v23  ;;  %v5113_v45 = vpop.permute.xlu0 %788 }
  0xb1   : > { %8162 = vst [vmem:[#allocation23_spill] sm:$0xff] %v5113_v45 }
  0xb4   : > { %940 = vrot.lane.b32.xlu2 %v5115_v33, %s4568_s8  ;;  %v441_v33 = vld [vmem:[#allocation2 + $0x30] sm:$0xff] }
  0xb5   : > { %938 = vrot.lane.b32.xlu1 %v5117_v11, %s4568_s8 }
  0xb6   : > { %942 = vrot.lane.b32.xlu0 %v5119_v5, %s4568_s8  ;;  %v5127_v0 = vpop.permute.xlu2 %810  ;;  %v439_v5 = vld [vmem:[#allocation2 + $0x18] sm:$0xff] }
  0xb7   : > { %8165 = vst [vmem:[#allocation26_spill] sm:$0xff] %v5127_v0  ;;  %v5129_v23 = vpop.permute.xlu1 %790 }
  0xb8   : > { %8166 = vst [vmem:[#allocation27_spill] sm:$0xff] %v5129_v23  ;;  %v5131_v45 = vpop.permute.xlu0 %794 }
  0xb9   : > { %8167 = vst [vmem:[#allocation28_spill] sm:$0xff] %v5131_v45 }
  0xbc   : > { %946 = vrot.lane.b32.xlu2 %v5133_v32, %s4568_s8 }
  0xbd   : > { %944 = vrot.lane.b32.xlu1 %v5135_v24, %s4568_s8 }
  0xbe   : > { %948 = vrot.lane.b32.xlu0 %v5137_v25, %s4568_s8  ;;  %v5145_v0 = vpop.permute.xlu2 %816 }
  0xbf   : > { %8171 = vst [vmem:[#allocation32_spill] sm:$0xff] %v5145_v0  ;;  %v5147_v23 = vpop.permute.xlu1 %796  ;;  %v5160_v0 = vld [vmem:[#allocation2 + $0x48] sm:$0xff] }
  0xc0   : > { %8172 = vst [vmem:[#allocation33_spill] sm:$0xff] %v5147_v23  ;;  %v5149_v45 = vpop.permute.xlu0 %800  ;;  %v442_v23 = vld [vmem:[#allocation2 + $0x38] sm:$0xff] }
  0xc1   : > { %8173 = vst [vmem:[#allocation34_spill] sm:$0xff] %v5149_v45  ;;  %v5164_v45 = vld [vmem:[#allocation2 + $0x50] sm:$0xff] }
  0xc2   : > { %8177 = vst [vmem:[#allocation38_spill] sm:$0xff] %v5160_v0 }
  0xc3   : > { %8178 = vst [vmem:[#allocation39_spill] sm:$0xff] %v5164_v45 }
  0xc4   : > { %1016 = vrot.lane.b32.xlu2 %v440_v16, %s4569_s9 }
  0xc5   : > { %1014 = vrot.lane.b32.xlu1 %v439_v5, %s4569_s9 }
  0xc6   : > { %1018 = vrot.lane.b32.xlu0 %v441_v33, %s4569_s9  ;;  %v5154_v32 = vpop.permute.xlu2 %886 }
  0xc7   : > { %8174 = vst [vmem:[#allocation35_spill] sm:$0xff] %v5154_v32  ;;  %v5156_v24 = vpop.permute.xlu1 %802  ;;  %v5179_v32 = vld [vmem:[#allocation2 + $0x78] sm:$0xff] }
  0xc8   : > { %8175 = vst [vmem:[#allocation36_spill] sm:$0xff] %v5156_v24  ;;  %v5158_v25 = vpop.permute.xlu0 %806  ;;  %v445_v24 = vld [vmem:[#allocation2 + $0x60] sm:$0xff] }
  0xc9   : > { %8176 = vst [vmem:[#allocation37_spill] sm:$0xff] %v5158_v25  ;;  %v5175_v25 = vld [vmem:[#allocation2 + $0x68] sm:$0xff] }
  0xca   : > { %8182 = vst [vmem:[#allocation43_spill] sm:$0xff] %v5175_v25 }
  0xcb   : > { %8183 = vst [vmem:[#allocation44_spill] sm:$0xff] %v5179_v32 }
  0xcc   : > { %1022 = vrot.lane.b32.xlu2 %v5160_v0, %s4569_s9  ;;  %v399_v0 = vld [vmem:[%s4641_s29 + $0xf8] sm:$0xff] }
  0xcd   : > { %1020 = vrot.lane.b32.xlu1 %v442_v23, %s4569_s9  ;;  %432 = vst.msk [vmem:[#allocation2 + $0x189] sm:$0xff] %vm279_vm0, %v399_v0 }
  0xce   : > { %1024 = vrot.lane.b32.xlu0 %v5164_v45, %s4569_s9  ;;  %v5169_v5 = vpop.permute.xlu2 %892  ;;  %v448_v45 = vld [vmem:[#allocation2 + $0x80] sm:$0xff] }
  0xcf   : > { %8179 = vst [vmem:[#allocation40_spill] sm:$0xff] %v5169_v5  ;;  %v5171_v16 = vpop.permute.xlu1 %808 }
  0xd0   : > { %8180 = vst [vmem:[#allocation41_spill] sm:$0xff] %v5171_v16  ;;  %v5173_v33 = vpop.permute.xlu0 %812 }
  0xd1   : > { %8181 = vst [vmem:[#allocation42_spill] sm:$0xff] %v5173_v33  ;;  %v5190_v33 = vld [vmem:[#allocation2 + $0x90] sm:$0xff] }
  0xd2   : > { %8187 = vst [vmem:[#allocation48_spill] sm:$0xff] %v5190_v33 }
  0xd4   : > { %1028 = vrot.lane.b32.xlu2 %v5175_v25, %s4569_s9  ;;  %v5194_v25 = vld [vmem:[#allocation2 + $0x98] sm:$0xff] }
  0xd5   : > { %1026 = vrot.lane.b32.xlu1 %v445_v24, %s4569_s9  ;;  %8188 = vst [vmem:[#allocation49_spill] sm:$0xff] %v5194_v25 }
  0xd6   : > { %1030 = vrot.lane.b32.xlu0 %v5179_v32, %s4569_s9  ;;  %v5184_v23 = vpop.permute.xlu2 %898  ;;  %v451_v32 = vld [vmem:[#allocation2 + $0xa8] sm:$0xff] }
  0xd7   : > { %8184 = vst [vmem:[#allocation45_spill] sm:$0xff] %v5184_v23  ;;  %v5186_v5 = vpop.permute.xlu1 %814  ;;  %v5205_v23 = vld [vmem:[#allocation2 + $0xb0] sm:$0xff] }
  0xd8   : > { %8185 = vst [vmem:[#allocation46_spill] sm:$0xff] %v5186_v5  ;;  %v5188_v16 = vpop.permute.xlu0 %818 }
  0xd9   : > { %8186 = vst [vmem:[#allocation47_spill] sm:$0xff] %v5188_v16 }
  0xda   : > { %8192 = vst [vmem:[#allocation53_spill] sm:$0xff] %v5205_v23 }
  0xdc   : > { %1034 = vrot.lane.b32.xlu2 %v5190_v33, %s4569_s9  ;;  %v5209_v33 = vld [vmem:[#allocation2 + $0xc0] sm:$0xff] }
  0xdd   : > { %1032 = vrot.lane.b32.xlu1 %v448_v45, %s4569_s9 }
  0xde   : > { %1036 = vrot.lane.b32.xlu0 %v5194_v25, %s4569_s9  ;;  %v5199_v24 = vpop.permute.xlu2 %904  ;;  %v454_v25 = vld [vmem:[#allocation2 + $0xc8] sm:$0xff] }
  0xdf   : > { %8189 = vst [vmem:[#allocation50_spill] sm:$0xff] %v5199_v24  ;;  %v5201_v5 = vpop.permute.xlu1 %820 }
  0xe0   : > { %8190 = vst [vmem:[#allocation51_spill] sm:$0xff] %v5201_v5  ;;  %v5203_v16 = vpop.permute.xlu0 %888 }
  0xe1   : > { %8191 = vst [vmem:[#allocation52_spill] sm:$0xff] %v5203_v16  ;;  %v5220_v16 = vld [vmem:[#allocation2 + $0xd8] sm:$0xff] }
  0xe2   : > { %8196 = vst [vmem:[#allocation57_spill] sm:$0xff] %v5220_v16 }
  0xe4   : > { %1040 = vrot.lane.b32.xlu2 %v5205_v23, %s4569_s9  ;;  %v398_v23 = vld [vmem:[%s4641_s29 + $0xf0] sm:$0xff] }
  0xe5   : > { %1038 = vrot.lane.b32.xlu1 %v451_v32, %s4569_s9  ;;  %431 = vst.msk [vmem:[#allocation2 + $0x181] sm:$0xff] %vm279_vm0, %v398_v23 }
  0xe6   : > { %1042 = vrot.lane.b32.xlu0 %v5209_v33, %s4569_s9  ;;  %v5214_v45 = vpop.permute.xlu2 %910 }
  0xe7   : > { %8193 = vst [vmem:[#allocation54_spill] sm:$0xff] %v5214_v45  ;;  %v5216_v24 = vpop.permute.xlu1 %890 }
  0xe8   : > { %8194 = vst [vmem:[#allocation55_spill] sm:$0xff] %v5216_v24  ;;  %v5218_v5 = vpop.permute.xlu0 %894  ;;  %v5239_v24 = vld [vmem:[#allocation2 + $0xf8] sm:$0xff] }
  0xe9   : > { %8195 = vst [vmem:[#allocation56_spill] sm:$0xff] %v5218_v5 }
  0xea   : > { %8200 = vst [vmem:[#allocation61_spill] sm:$0xff] %v5239_v24 }
  0xec   : > { %1046 = vrot.lane.b32.xlu2 %v5220_v16, %s4569_s9  ;;  %v457_v16 = vld [vmem:[#allocation2 + $0xf0] sm:$0xff] }
  0xed   : > { %1044 = vrot.lane.b32.xlu1 %v454_v25, %s4569_s9  ;;  %v5243_v25 = vld [vmem:[#allocation2 + $0x108] sm:$0xff] }
  0xee   : > { %1048 = vrot.lane.b32.xlu0 %v5226_v43, %s4569_s9  ;;  %v5232_v32 = vpop.permute.xlu2 %916  ;;  %8201 = vst [vmem:[#allocation62_spill] sm:$0xff] %v5243_v25 }
  0xef   : > { %8197 = vst [vmem:[#allocation58_spill] sm:$0xff] %v5232_v32  ;;  %v5235_v45 = vpop.permute.xlu1 %896 }
  0xf0   : > { %8198 = vst [vmem:[#allocation59_spill] sm:$0xff] %v5235_v45  ;;  %v5237_v5 = vpop.permute.xlu0 %900  ;;  %v460_v45 = vld [vmem:[#allocation2 + $0x110] sm:$0xff] }
  0xf1   : > { %8199 = vst [vmem:[#allocation60_spill] sm:$0xff] %v5237_v5  ;;  %v5254_v5 = vld [vmem:[#allocation2 + $0x120] sm:$0xff] }
  0xf2   : > { %8205 = vst [vmem:[#allocation66_spill] sm:$0xff] %v5254_v5 }
  0xf4   : > { %1052 = vrot.lane.b32.xlu2 %v5239_v24, %s4569_s9  ;;  %v5258_v24 = vld [vmem:[#allocation2 + $0x128] sm:$0xff] }
  0xf5   : > { %1050 = vrot.lane.b32.xlu1 %v457_v16, %s4569_s9  ;;  %8206 = vst [vmem:[#allocation67_spill] sm:$0xff] %v5258_v24 }
  0xf6   : > { %1054 = vrot.lane.b32.xlu0 %v5243_v25, %s4569_s9  ;;  %v5248_v23 = vpop.permute.xlu2 %922  ;;  %v5271_v25 = vld [vmem:[#allocation2 + $0x138] sm:$0xff] }
  0xf7   : > { %8202 = vst [vmem:[#allocation63_spill] sm:$0xff] %v5248_v23  ;;  %v5250_v0 = vpop.permute.xlu1 %902 }
  0xf8   : > { %8203 = vst [vmem:[#allocation64_spill] sm:$0xff] %v5250_v0  ;;  %v5252_v32 = vpop.permute.xlu0 %906 }
  0xf9   : > { %8204 = vst [vmem:[#allocation65_spill] sm:$0xff] %v5252_v32  ;;  %v5269_v32 = vld [vmem:[#allocation2 + $0x140] sm:$0xff] }
  0xfa   : > { %8210 = vst [vmem:[#allocation71_spill] sm:$0xff] %v5269_v32 }
  0xfb   : > { %8211 = vst [vmem:[#allocation72_spill] sm:$0xff] %v5271_v25 }
  0xfc   : > { %1058 = vrot.lane.b32.xlu2 %v5254_v5, %s4569_s9  ;;  %v5275_v5 = vld [vmem:[#allocation2 + $0x150] sm:$0xff] }
  0xfd   : > { %1056 = vrot.lane.b32.xlu1 %v460_v45, %s4569_s9  ;;  %8212 = vst [vmem:[#allocation73_spill] sm:$0xff] %v5275_v5 }
  0xfe   : > { %1060 = vrot.lane.b32.xlu0 %v5258_v24, %s4569_s9  ;;  %v5263_v16 = vpop.permute.xlu2 %928  ;;  %v5289_v24 = vld [vmem:[#allocation2 + $0x158] sm:$0xff] }
  0xff   : > { %8207 = vst [vmem:[#allocation68_spill] sm:$0xff] %v5263_v16  ;;  %v5265_v23 = vpop.permute.xlu1 %908  ;;  %v5287_v16 = vld [vmem:[#allocation2 + $0x168] sm:$0xff] }
 0x100   : > { %8208 = vst [vmem:[#allocation69_spill] sm:$0xff] %v5265_v23  ;;  %v5267_v0 = vpop.permute.xlu0 %912 }
 0x101   : > { %8209 = vst [vmem:[#allocation70_spill] sm:$0xff] %v5267_v0 }
 0x102   : > { %8216 = vst [vmem:[#allocation77_spill] sm:$0xff] %v5287_v16 }
 0x104   : > { %1064 = vrot.lane.b32.xlu2 %v5269_v32, %s4569_s9  ;;  %v5293_v32 = vld [vmem:[#allocation2 + $0x170] sm:$0xff] }
 0x105   : > { %1062 = vrot.lane.b32.xlu1 %v5271_v25, %s4569_s9  ;;  %v5307_v25 = vld [vmem:[#allocation2 + $0x180] sm:$0xff] }
 0x106   : > { %1066 = vrot.lane.b32.xlu0 %v5275_v5, %s4569_s9  ;;  %v5281_v45 = vpop.permute.xlu2 %934  ;;  %v5305_v5 = vld [vmem:[#allocation2 + $0x188] sm:$0xff] }
 0x107   : > { %8213 = vst [vmem:[#allocation74_spill] sm:$0xff] %v5281_v45  ;;  %v5283_v23 = vpop.permute.xlu1 %914 }
 0x108   : > { %8214 = vst [vmem:[#allocation75_spill] sm:$0xff] %v5283_v23  ;;  %v5285_v0 = vpop.permute.xlu0 %918 }
 0x109   : > { %8215 = vst [vmem:[#allocation76_spill] sm:$0xff] %v5285_v0 }
 0x10a   : > { %8220 = vst [vmem:[#allocation81_spill] sm:$0xff] %v5305_v5 }
 0x10c   : > { %1070 = vrot.lane.b32.xlu2 %v5287_v16, %s4569_s9 }
 0x10d   : > { %1068 = vrot.lane.b32.xlu1 %v5289_v24, %s4569_s9 }
 0x10e   : > { %1072 = vrot.lane.b32.xlu0 %v5293_v32, %s4569_s9  ;;  %v5299_v45 = vpop.permute.xlu2 %940 }
 0x10f   : > { %8217 = vst [vmem:[#allocation78_spill] sm:$0xff] %v5299_v45  ;;  %v5301_v23 = vpop.permute.xlu1 %920 }
 0x110   : > { %8218 = vst [vmem:[#allocation79_spill] sm:$0xff] %v5301_v23  ;;  %v5303_v0 = vpop.permute.xlu0 %924 }
 0x111   : > { %8219 = vst [vmem:[#allocation80_spill] sm:$0xff] %v5303_v0 }
 0x114   : > { %1076 = vrot.lane.b32.xlu2 %v5305_v5, %s4569_s9 }
 0x115   : > { %1074 = vrot.lane.b32.xlu1 %v5307_v25, %s4569_s9 }
 0x116   : > { %v5313_v16 = vpop.permute.xlu2 %946  ;;  %1142 = vrot.lane.b32.xlu0 %v4669_v10, %s4570_s10 }
 0x117   : > { %8221 = vst [vmem:[#allocation82_spill] sm:$0xff] %v5313_v16  ;;  %v5317_v45 = vpop.permute.xlu1 %926 }
 0x118   : > { %8222 = vst [vmem:[#allocation83_spill] sm:$0xff] %v5317_v45  ;;  %v5319_v23 = vpop.permute.xlu0 %930  ;;  %v684_v45 = vld [vmem:[#allocation2 + $0x139] sm:$0xff] }
 0x119   : > { %8223 = vst [vmem:[#allocation84_spill] sm:$0xff] %v5319_v23 }
 0x11c   : > { %1146 = vrot.lane.b32.xlu2 %v4663_v8, %s4570_s10 }
 0x11d   : > { %1144 = vrot.lane.b32.xlu1 %v4688_v19, %s4570_s10 }
 0x11e   : > { %1148 = vrot.lane.b32.xlu0 %v4684_v17, %s4570_s10  ;;  %v5327_v0 = vpop.permute.xlu2 %1016 }
 0x11f   : > { %v5329_v16 = vpop.permute.xlu1 %932 }
 0x120   : > { %8224 = vst [vmem:[#allocation85_spill] sm:$0xff] %v5329_v16  ;;  %v5331_v5 = vpop.permute.xlu0 %936  ;;  %v649_v16 = vld [vmem:[#allocation2 + $0x110] sm:$0xff] }
 0x121   : > { %8225 = vst [vmem:[#allocation86_spill] sm:$0xff] %v5331_v5 }
 0x124   : > { %1152 = vrot.lane.b32.xlu2 %v4715_v29, %s4570_s10 }
 0x125   : > { %1150 = vrot.lane.b32.xlu1 %v4692_v21, %s4570_s10 }
 0x126   : > { %1154 = vrot.lane.b32.xlu0 %v4712_v28, %s4570_s10  ;;  %v5339_v8 = vpop.permute.xlu2 %1022 }
 0x127   : > { %v5341_v10 = vpop.permute.xlu1 %938 }
 0x128   : > { %8226 = vst [vmem:[#allocation87_spill] sm:$0xff] %v5341_v10  ;;  %v5343_v17 = vpop.permute.xlu0 %942  ;;  %v5567_v10 = vld [vmem:[#allocation2 + $0x18a] sm:$0xff] }
 0x129   : > { %8227 = vst [vmem:[#allocation88_spill] sm:$0xff] %v5343_v17  ;;  %v8262_v17 = vld [vmem:[#allocation25_spill] sm:$0xff] }
 0x12c   : > { %1158 = vrot.lane.b32.xlu2 %v4735_v35, %s4570_s10 }
 0x12d   : > { %1156 = vrot.lane.b32.xlu1 %v4718_v30, %s4570_s10 }
 0x12e   : > { %1160 = vrot.lane.b32.xlu0 %v4733_v34, %s4570_s10  ;;  %v5351_v19 = vpop.permute.xlu2 %1028 }
 0x12f   : > { %v5353_v21 = vpop.permute.xlu1 %944 }
 0x130   : > { %8228 = vst [vmem:[#allocation89_spill] sm:$0xff] %v5353_v21  ;;  %v5355_v28 = vpop.permute.xlu0 %948 }
 0x131   : > { %8229 = vst [vmem:[#allocation90_spill] sm:$0xff] %v5355_v28  ;;  %v5443_v28 = vld [vmem:[#allocation2 + $0x189] sm:$0xff] }
 0x134   : > { %1164 = vrot.lane.b32.xlu2 %v4753_v41, %s4570_s10 }
 0x135   : > { %1162 = vrot.lane.b32.xlu1 %v4737_v36, %s4570_s10 }
 0x136   : > { %1166 = vrot.lane.b32.xlu0 %v4751_v40, %s4570_s10  ;;  %v5363_v29 = vpop.permute.xlu2 %1034 }
 0x137   : > { %8230 = vst [vmem:[#allocation91_spill] sm:$0xff] %v5363_v29  ;;  %v5365_v30 = vpop.permute.xlu1 %1014  ;;  %v685_v29 = vld [vmem:[#allocation2 + $0x141] sm:$0xff] }
 0x138   : > { %v5367_v34 = vpop.permute.xlu0 %1018 }
 0x13c   : > { %1170 = vrot.lane.b32.xlu2 %v4771_v47, %s4570_s10 }
 0x13d   : > { %1168 = vrot.lane.b32.xlu1 %v4755_v42, %s4570_s10 }
 0x13e   : > { %1172 = vrot.lane.b32.xlu0 %v4769_v46, %s4570_s10  ;;  %v5375_v35 = vpop.permute.xlu2 %1040 }
 0x13f   : > { %8231 = vst [vmem:[#allocation92_spill] sm:$0xff] %v5375_v35  ;;  %v5377_v36 = vpop.permute.xlu1 %1020  ;;  %v643_v35 = vld [vmem:[#allocation2 + $0xc8] sm:$0xff] }
 0x140   : > { %v5379_v40 = vpop.permute.xlu0 %1024 }
 0x144   : > { %1176 = vrot.lane.b32.xlu2 %v4791_v51, %s4570_s10 }
 0x145   : > { %1174 = vrot.lane.b32.xlu1 %v4773_v48, %s4570_s10 }
 0x146   : > { %1178 = vrot.lane.b32.xlu0 %v4787_v50, %s4570_s10  ;;  %v5387_v41 = vpop.permute.xlu2 %1046 }
 0x147   : > { %v5389_v42 = vpop.permute.xlu1 %1026 }
 0x148   : > { %v5391_v46 = vpop.permute.xlu0 %1030 }
 0x14c   : > { %1182 = vrot.lane.b32.xlu2 %v4819_v54, %s4570_s10 }
 0x14d   : > { %1180 = vrot.lane.b32.xlu1 %v4795_v52, %s4570_s10 }
 0x14e   : > { %1184 = vrot.lane.b32.xlu0 %v4815_v53, %s4570_s10  ;;  %v5399_v47 = vpop.permute.xlu2 %1052 }
 0x14f   : > { %8232 = vst [vmem:[#allocation93_spill] sm:$0xff] %v5399_v47  ;;  %v5401_v48 = vpop.permute.xlu1 %1032  ;;  %v711_v47 = vld [vmem:[#allocation2 + $0xfa] sm:$0xff] }
 0x150   : > { %8233 = vst [vmem:[#allocation94_spill] sm:$0xff] %v5401_v48  ;;  %v5403_v50 = vpop.permute.xlu0 %1036  ;;  %v708_v48 = vld [vmem:[#allocation2 + $0xda] sm:$0xff] }
 0x151   : > { %8234 = vst [vmem:[#allocation95_spill] sm:$0xff] %v5403_v50  ;;  %v669_v50 = vld [vmem:[#allocation2 + $0x81] sm:$0xff] }
 0x154   : > { %1188 = vrot.lane.b32.xlu2 %v4847_v57, %s4570_s10  ;;  %v5429_v57 = vld [vmem:[#allocation2 + $0x181] sm:$0xff] }
 0x155   : > { %1186 = vrot.lane.b32.xlu1 %v4823_v55, %s4570_s10 }
 0x156   : > { %1190 = vrot.lane.b32.xlu0 %v4843_v56, %s4570_s10  ;;  %v5411_v51 = vpop.permute.xlu2 %1058 }
 0x157   : > { %8235 = vst [vmem:[#allocation96_spill] sm:$0xff] %v5411_v51  ;;  %v5413_v52 = vpop.permute.xlu1 %1038  ;;  %v8300_v51 = vld [vmem:[#allocation73_spill] sm:$0xff] }
 0x158   : > { %8236 = vst [vmem:[#allocation97_spill] sm:$0xff] %v5413_v52  ;;  %v5415_v53 = vpop.permute.xlu0 %1042 }
 0x159   : > { %8237 = vst [vmem:[#allocation98_spill] sm:$0xff] %v5415_v53  ;;  %v8274_v53 = vld [vmem:[#allocation43_spill] sm:$0xff] }
 0x15c   : > { %1194 = vrot.lane.b32.xlu2 %v4875_v60, %s4570_s10 }
 0x15d   : > { %1192 = vrot.lane.b32.xlu1 %v4851_v58, %s4570_s10 }
 0x15e   : > { %1196 = vrot.lane.b32.xlu0 %v4871_v59, %s4570_s10  ;;  %v5423_v54 = vpop.permute.xlu2 %1064 }
 0x15f   : > { %8238 = vst [vmem:[#allocation99_spill] sm:$0xff] %v5423_v54  ;;  %v5425_v55 = vpop.permute.xlu1 %1044  ;;  %v8270_v54 = vld [vmem:[#allocation38_spill] sm:$0xff] }
 0x160   : > { %8239 = vst [vmem:[#allocation100_spill] sm:$0xff] %v5425_v55  ;;  %v5427_v56 = vpop.permute.xlu0 %1048  ;;  %v630_v55 = vld [vmem:[#allocation2 + $0x30] sm:$0xff] }
 0x164   : > { %1200 = vrot.lane.b32.xlu2 %v4901_v63, %s4570_s10 }
 0x165   : > { %1198 = vrot.lane.b32.xlu1 %v4879_v61, %s4570_s10 }
 0x166   : > { %1202 = vrot.lane.b32.xlu0 %v5429_v57, %s4570_s10  ;;  %v5437_v58 = vpop.permute.xlu2 %1070 }
 0x167   : > { %8240 = vst [vmem:[#allocation101_spill] sm:$0xff] %v5437_v58  ;;  %v5439_v59 = vpop.permute.xlu1 %1050 }
 0x168   : > { %v5441_v60 = vpop.permute.xlu0 %1054 }
 0x169   : > { %8241 = vst [vmem:[#allocation102_spill] sm:$0xff] %v5441_v60  ;;  %v683_v60 = vld [vmem:[#allocation2 + $0x129] sm:$0xff] }
 0x16c   : > { %1270 = vrot.lane.b32.xlu2 %v4927_v3, %s4571_s11 }
 0x16d   : > { %1204 = vrot.lane.b32.xlu1 %v5443_v28, %s4570_s10 }
 0x16e   : > { %1272 = vrot.lane.b32.xlu0 %v4923_v2, %s4571_s11  ;;  %v5451_v61 = vpop.permute.xlu2 %1076 }
 0x16f   : > { %8242 = vst [vmem:[#allocation103_spill] sm:$0xff] %v5451_v61  ;;  %v5453_v63 = vpop.permute.xlu1 %1056  ;;  %v8256_v61 = vld [vmem:[#allocation20_spill] sm:$0xff] }
 0x170   : > { %8243 = vst [vmem:[#allocation104_spill] sm:$0xff] %v5453_v63  ;;  %v5455_v21 = vpop.permute.xlu0 %1060  ;;  %v668_v63 = vld [vmem:[#allocation2 + $0x79] sm:$0xff] }
 0x171   : > { %8244 = vst [vmem:[#allocation105_spill] sm:$0xff] %v5455_v21  ;;  %v640_v21 = vld [vmem:[#allocation2 + $0xa8] sm:$0xff] }
 0x174   : > { %1276 = vrot.lane.b32.xlu2 %v4957_v7, %s4571_s11 }
 0x175   : > { %1274 = vrot.lane.b32.xlu1 %v4931_v4, %s4571_s11 }
 0x176   : > { %1278 = vrot.lane.b32.xlu0 %v4953_v6, %s4571_s11  ;;  %v5463_v3 = vpop.permute.xlu2 %1146 }
 0x177   : > { %v5465_v58 = vpop.permute.xlu1 %1062 }
 0x178   : > { %8245 = vst [vmem:[#allocation106_spill] sm:$0xff] %v5465_v58  ;;  %v5467_v2 = vpop.permute.xlu0 %1066  ;;  %v8273_v58 = vld [vmem:[#allocation39_spill] sm:$0xff] }
 0x179   : > { %8246 = vst [vmem:[#allocation107_spill] sm:$0xff] %v5467_v2  ;;  %v5565_v2 = vld [vmem:[#allocation2 + $0x182] sm:$0xff] }
 0x17c   : > { %1282 = vrot.lane.b32.xlu2 %v4987_v13, %s4571_s11 }
 0x17d   : > { %1280 = vrot.lane.b32.xlu1 %v4961_v9, %s4571_s11 }
 0x17e   : > { %1284 = vrot.lane.b32.xlu0 %v4983_v12, %s4571_s11  ;;  %v5475_v7 = vpop.permute.xlu2 %1152 }
 0x17f   : > { %v5477_v4 = vpop.permute.xlu1 %1068 }
 0x180   : > { %8247 = vst [vmem:[#allocation108_spill] sm:$0xff] %v5477_v4  ;;  %v5479_v6 = vpop.permute.xlu0 %1072 }
 0x181   : > { %8248 = vst [vmem:[#allocation109_spill] sm:$0xff] %v5479_v6  ;;  %v8261_v6 = vld [vmem:[#allocation30_spill] sm:$0xff] }
 0x184   : > { %1288 = vrot.lane.b32.xlu2 %v5019_v20, %s4571_s11 }
 0x185   : > { %1286 = vrot.lane.b32.xlu1 %v4991_v14, %s4571_s11 }
 0x186   : > { %1290 = vrot.lane.b32.xlu0 %v5015_v18, %s4571_s11  ;;  %v5487_v13 = vpop.permute.xlu2 %1158 }
 0x187   : > { %v5489_v9 = vpop.permute.xlu1 %1074 }
 0x188   : > { %8249 = vst [vmem:[#allocation110_spill] sm:$0xff] %v5489_v9  ;;  %v5491_v12 = vpop.permute.xlu0 %1142 }
 0x18c   : > { %1294 = vrot.lane.b32.xlu2 %v5045_v27, %s4571_s11 }
 0x18d   : > { %1292 = vrot.lane.b32.xlu1 %v5023_v22, %s4571_s11 }
 0x18e   : > { %1296 = vrot.lane.b32.xlu0 %v5043_v26, %s4571_s11  ;;  %v5499_v20 = vpop.permute.xlu2 %1164 }
 0x18f   : > { %8250 = vst [vmem:[#allocation111_spill] sm:$0xff] %v5499_v20  ;;  %v5501_v14 = vpop.permute.xlu1 %1144  ;;  %v666_v20 = vld [vmem:[#allocation2 + $0x61] sm:$0xff] }
 0x190   : > { %v5503_v18 = vpop.permute.xlu0 %1148 }
 0x194   : > { %1300 = vrot.lane.b32.xlu2 %v5063_v38, %s4571_s11 }
 0x195   : > { %1298 = vrot.lane.b32.xlu1 %v5047_v31, %s4571_s11 }
 0x196   : > { %1302 = vrot.lane.b32.xlu0 %v5061_v37, %s4571_s11  ;;  %v5511_v27 = vpop.permute.xlu2 %1170 }
 0x197   : > { %8251 = vst [vmem:[#allocation112_spill] sm:$0xff] %v5511_v27  ;;  %v5513_v22 = vpop.permute.xlu1 %1150 }
 0x198   : > { %v5515_v26 = vpop.permute.xlu0 %1154 }
 0x19c   : > { %1306 = vrot.lane.b32.xlu2 %v5081_v62, %s4571_s11 }
 0x19d   : > { %1304 = vrot.lane.b32.xlu1 %v5065_v39, %s4571_s11 }
 0x19e   : > { %1308 = vrot.lane.b32.xlu0 %v5079_v49, %s4571_s11  ;;  %v5523_v38 = vpop.permute.xlu2 %1176 }
 0x19f   : > { %v5525_v31 = vpop.permute.xlu1 %1156 }
 0x1a0   : > { %v5527_v37 = vpop.permute.xlu0 %1160 }
 0x1a1   : > { %8252 = vst [vmem:[#allocation113_spill] sm:$0xff] %v5527_v37  ;;  %v705_v37 = vld [vmem:[#allocation2 + $0xb2] sm:$0xff] }
 0x1a4   : > { %1312 = vrot.lane.b32.xlu2 %v5099_v44, %s4571_s11  ;;  %v8257_v44 = vld [vmem:[#allocation24_spill] sm:$0xff] }
 0x1a5   : > { %1310 = vrot.lane.b32.xlu1 %v5083_v1, %s4571_s11 }
 0x1a6   : > { %1314 = vrot.lane.b32.xlu0 %v5097_v15, %s4571_s11  ;;  %v5535_v62 = vpop.permute.xlu2 %1182 }
 0x1a7   : > { %8253 = vst [vmem:[#allocation114_spill] sm:$0xff] %v5535_v62  ;;  %v5537_v39 = vpop.permute.xlu1 %1162  ;;  %v681_v62 = vld [vmem:[#allocation2 + $0x111] sm:$0xff] }
 0x1a8   : > { %8254 = vst [vmem:[#allocation115_spill] sm:$0xff] %v5537_v39  ;;  %v5539_v49 = vpop.permute.xlu0 %1166  ;;  %v680_v39 = vld [vmem:[#allocation2 + $0x109] sm:$0xff] }
 0x1a9   : > { %8255 = vst [vmem:[#allocation116_spill] sm:$0xff] %v5539_v49  ;;  %v8295_v49 = vld [vmem:[#allocation67_spill] sm:$0xff] }
 0x1ac   : > { %1318 = vrot.lane.b32.xlu2 %v5117_v11, %s4571_s11  ;;  %v8263_v11 = vld [vmem:[#allocation29_spill] sm:$0xff] }
 0x1ad   : > { %1316 = vrot.lane.b32.xlu1 %v8256_v61, %s4571_s11 }
 0x1ae   : > { %1320 = vrot.lane.b32.xlu0 %v8257_v44, %s4571_s11  ;;  %v5547_v9 = vpop.permute.xlu2 %1188 }
 0x1af   : > { %8258 = vst [vmem:[#allocation20_spill] sm:$0xff] %v5547_v9  ;;  %v5549_v1 = vpop.permute.xlu1 %1168 }
 0x1b0   : > { %8259 = vst [vmem:[#allocation24_spill] sm:$0xff] %v5549_v1  ;;  %v5551_v15 = vpop.permute.xlu0 %1172  ;;  %v637_v1 = vld [vmem:[#allocation2 + $0x80] sm:$0xff] }
 0x1b1   : > { %8260 = vst [vmem:[#allocation117_spill] sm:$0xff] %v5551_v15  ;;  %v631_v15 = vld [vmem:[#allocation2 + $0x38] sm:$0xff] }
 0x1b4   : > { %1324 = vrot.lane.b32.xlu2 %v8261_v6, %s4571_s11  ;;  %v8266_v6 = vld [vmem:[#allocation31_spill] sm:$0xff] }
 0x1b5   : > { %1322 = vrot.lane.b32.xlu1 %v8262_v17, %s4571_s11 }
 0x1b6   : > { %1326 = vrot.lane.b32.xlu0 %v8263_v11, %s4571_s11  ;;  %v5559_v4 = vpop.permute.xlu2 %1194 }
 0x1b7   : > { %8264 = vst [vmem:[#allocation30_spill] sm:$0xff] %v5559_v4  ;;  %v5561_v61 = vpop.permute.xlu1 %1174 }
 0x1b8   : > { %v5563_v44 = vpop.permute.xlu0 %1178 }
 0x1b9   : > { %8265 = vst [vmem:[#allocation25_spill] sm:$0xff] %v5563_v44  ;;  %v717_v44 = vld [vmem:[#allocation2 + $0x142] sm:$0xff] }
 0x1bc   : > { %1330 = vrot.lane.b32.xlu2 %v5565_v2, %s4571_s11 }
 0x1bd   : > { %1328 = vrot.lane.b32.xlu1 %v8266_v6, %s4571_s11 }
 0x1be   : > { %1332 = vrot.lane.b32.xlu0 %v5567_v10, %s4571_s11  ;;  %v5575_v17 = vpop.permute.xlu2 %1200 }
 0x1bf   : > { %8267 = vst [vmem:[#allocation29_spill] sm:$0xff] %v5575_v17  ;;  %v5577_v11 = vpop.permute.xlu1 %1180  ;;  %v634_v17 = vld [vmem:[#allocation2 + $0x60] sm:$0xff] }
 0x1c0   : > { %8268 = vst [vmem:[#allocation31_spill] sm:$0xff] %v5577_v11  ;;  %v5579_v4 = vpop.permute.xlu0 %1184  ;;  %v702_v11 = vld [vmem:[#allocation2 + $0x92] sm:$0xff] }
 0x1c1   : > { %8269 = vst [vmem:[#allocation118_spill] sm:$0xff] %v5579_v4  ;;  %v665_v4 = vld [vmem:[#allocation2 + $0x51] sm:$0xff] }
 0x1c4   : > { %1400 = vrot.lane.b32.xlu2 %v631_v15, %s4572_s12 }
 0x1c5   : > { %1398 = vrot.lane.b32.xlu1 %v630_v55, %s4572_s12 }
 0x1c6   : > { %1402 = vrot.lane.b32.xlu0 %v8270_v54, %s4572_s12  ;;  %v5585_v6 = vpop.permute.xlu2 %1270 }
 0x1c7   : > { %v5587_v5 = vpop.permute.xlu1 %1186 }
 0x1c8   : > { %8271 = vst [vmem:[#allocation38_spill] sm:$0xff] %v5587_v5  ;;  %v5589_v27 = vpop.permute.xlu0 %1190 }
 0x1c9   : > { %8272 = vst [vmem:[#allocation119_spill] sm:$0xff] %v5589_v27  ;;  %v8277_v27 = vld [vmem:[#allocation44_spill] sm:$0xff] }
 0x1cc   : > { %1406 = vrot.lane.b32.xlu2 %v634_v17, %s4572_s12  ;;  %v8278_v17 = vld [vmem:[#allocation48_spill] sm:$0xff] }
 0x1cd   : > { %1404 = vrot.lane.b32.xlu1 %v8273_v58, %s4572_s12 }
 0x1ce   : > { %1408 = vrot.lane.b32.xlu0 %v8274_v53, %s4572_s12  ;;  %v5596_v15 = vpop.permute.xlu2 %1276 }
 0x1cf   : > { %v5598_v55 = vpop.permute.xlu1 %1192 }
 0x1d0   : > { %8275 = vst [vmem:[#allocation39_spill] sm:$0xff] %v5598_v55  ;;  %v5600_v54 = vpop.permute.xlu0 %1196 }
 0x1d1   : > { %8276 = vst [vmem:[#allocation43_spill] sm:$0xff] %v5600_v54  ;;  %v8281_v54 = vld [vmem:[#allocation49_spill] sm:$0xff] }
 0x1d4   : > { %1412 = vrot.lane.b32.xlu2 %v637_v1, %s4572_s12  ;;  %v8282_v1 = vld [vmem:[#allocation53_spill] sm:$0xff] }
 0x1d5   : > { %1410 = vrot.lane.b32.xlu1 %v8277_v27, %s4572_s12 }
 0x1d6   : > { %1414 = vrot.lane.b32.xlu0 %v8278_v17, %s4572_s12  ;;  %v5607_v9 = vpop.permute.xlu2 %1282 }
 0x1d7   : > { %v5609_v58 = vpop.permute.xlu1 %1198 }
 0x1d8   : > { %8279 = vst [vmem:[#allocation44_spill] sm:$0xff] %v5609_v58  ;;  %v5611_v53 = vpop.permute.xlu0 %1202  ;;  %v646_v58 = vld [vmem:[#allocation2 + $0xf0] sm:$0xff] }
 0x1d9   : > { %8280 = vst [vmem:[#allocation48_spill] sm:$0xff] %v5611_v53 }
 0x1dc   : > { %1418 = vrot.lane.b32.xlu2 %v640_v21, %s4572_s12  ;;  %v8285_v21 = vld [vmem:[#allocation57_spill] sm:$0xff] }
 0x1dd   : > { %1416 = vrot.lane.b32.xlu1 %v8281_v54, %s4572_s12 }
 0x1de   : > { %1420 = vrot.lane.b32.xlu0 %v8282_v1, %s4572_s12  ;;  %v5618_v55 = vpop.permute.xlu2 %1288 }
 0x1df   : > { %8283 = vst [vmem:[#allocation49_spill] sm:$0xff] %v5618_v55  ;;  %v5620_v27 = vpop.permute.xlu1 %1204  ;;  %v687_v55 = vld [vmem:[#allocation2 + $0x159] sm:$0xff] }
 0x1e0   : > { %8284 = vst [vmem:[#allocation53_spill] sm:$0xff] %v5620_v27  ;;  %v5622_v17 = vpop.permute.xlu0 %1272 }
 0x1e4   : > { %1424 = vrot.lane.b32.xlu2 %v643_v35, %s4572_s12  ;;  %v8287_v35 = vld [vmem:[#allocation61_spill] sm:$0xff] }
 0x1e5   : > { %1422 = vrot.lane.b32.xlu1 %v5209_v33, %s4572_s12 }
 0x1e6   : > { %1426 = vrot.lane.b32.xlu0 %v8285_v21, %s4572_s12  ;;  %v5629_v53 = vpop.permute.xlu2 %1294 }
 0x1e7   : > { %8286 = vst [vmem:[#allocation57_spill] sm:$0xff] %v5629_v53  ;;  %v5631_v54 = vpop.permute.xlu1 %1274  ;;  %v8289_v53 = vld [vmem:[#allocation62_spill] sm:$0xff] }
 0x1e8   : > { %v5633_v1 = vpop.permute.xlu0 %1278 }
 0x1ec   : > { %1430 = vrot.lane.b32.xlu2 %v646_v58, %s4572_s12  ;;  %v8290_v58 = vld [vmem:[#allocation66_spill] sm:$0xff] }
 0x1ed   : > { %1428 = vrot.lane.b32.xlu1 %v5226_v43, %s4572_s12 }
 0x1ee   : > { %1432 = vrot.lane.b32.xlu0 %v8287_v35, %s4572_s12  ;;  %v5640_v27 = vpop.permute.xlu2 %1300 }
 0x1ef   : > { %8288 = vst [vmem:[#allocation61_spill] sm:$0xff] %v5640_v27  ;;  %v5642_v33 = vpop.permute.xlu1 %1280  ;;  %v8294_v27 = vld [vmem:[#allocation72_spill] sm:$0xff] }
 0x1f0   : > { %v5644_v21 = vpop.permute.xlu0 %1284 }
 0x1f4   : > { %1436 = vrot.lane.b32.xlu2 %v649_v16, %s4572_s12  ;;  %v8296_v16 = vld [vmem:[#allocation71_spill] sm:$0xff] }
 0x1f5   : > { %1434 = vrot.lane.b32.xlu1 %v8289_v53, %s4572_s12 }
 0x1f6   : > { %1438 = vrot.lane.b32.xlu0 %v8290_v58, %s4572_s12  ;;  %v5651_v5 = vpop.permute.xlu2 %1306 }
 0x1f7   : > { %8291 = vst [vmem:[#allocation62_spill] sm:$0xff] %v5651_v5  ;;  %v5653_v43 = vpop.permute.xlu1 %1286 }
 0x1f8   : > { %8292 = vst [vmem:[#allocation66_spill] sm:$0xff] %v5653_v43  ;;  %v5655_v35 = vpop.permute.xlu0 %1290 }
 0x1f9   : > { %8293 = vst [vmem:[#allocation120_spill] sm:$0xff] %v5655_v35  ;;  %v675_v35 = vld [vmem:[#allocation2 + $0xc9] sm:$0xff] }
 0x1fc   : > { %1442 = vrot.lane.b32.xlu2 %v8294_v27, %s4572_s12  ;;  %v8301_v27 = vld [vmem:[#allocation77_spill] sm:$0xff] }
 0x1fd   : > { %1440 = vrot.lane.b32.xlu1 %v8295_v49, %s4572_s12 }
 0x1fe   : > { %1444 = vrot.lane.b32.xlu0 %v8296_v16, %s4572_s12  ;;  %v5663_v52 = vpop.permute.xlu2 %1312 }
 0x1ff   : > { %8297 = vst [vmem:[#allocation72_spill] sm:$0xff] %v5663_v52  ;;  %v5665_v53 = vpop.permute.xlu1 %1292  ;;  %v663_v52 = vld [vmem:[#allocation2 + $0x39] sm:$0xff] }
 0x200   : > { %8298 = vst [vmem:[#allocation67_spill] sm:$0xff] %v5665_v53  ;;  %v5667_v58 = vpop.permute.xlu0 %1296  ;;  %v660_v53 = vld [vmem:[#allocation2 + $0x198] sm:$0xff] }
 0x201   : > { %8299 = vst [vmem:[#allocation71_spill] sm:$0xff] %v5667_v58 }
 0x204   : > { %1448 = vrot.lane.b32.xlu2 %v5289_v24, %s4572_s12  ;;  %v8304_v24 = vld [vmem:[#allocation81_spill] sm:$0xff] }
 0x205   : > { %1446 = vrot.lane.b32.xlu1 %v8300_v51, %s4572_s12 }
 0x206   : > { %1450 = vrot.lane.b32.xlu0 %v8301_v27, %s4572_s12  ;;  %v5675_v23 = vpop.permute.xlu2 %1318 }
 0x207   : > { %8302 = vst [vmem:[#allocation73_spill] sm:$0xff] %v5675_v23  ;;  %v5677_v49 = vpop.permute.xlu1 %1298  ;;  %v661_v23 = vld [vmem:[#allocation2 + $0x1a0] sm:$0xff] }
 0x208   : > { %8303 = vst [vmem:[#allocation77_spill] sm:$0xff] %v5677_v49  ;;  %v5679_v16 = vpop.permute.xlu0 %1302  ;;  %v662_v49 = vld [vmem:[#allocation2 + $0x31] sm:$0xff] }
 0x20c   : > { %1454 = vrot.lane.b32.xlu2 %v5307_v25, %s4572_s12 }
 0x20d   : > { %1452 = vrot.lane.b32.xlu1 %v5293_v32, %s4572_s12 }
 0x20e   : > { %1456 = vrot.lane.b32.xlu0 %v8304_v24, %s4572_s12  ;;  %v5687_v58 = vpop.permute.xlu2 %1324 }
 0x20f   : > { %8305 = vst [vmem:[#allocation81_spill] sm:$0xff] %v5687_v58  ;;  %v5689_v51 = vpop.permute.xlu1 %1304  ;;  %v664_v58 = vld [vmem:[#allocation2 + $0x49] sm:$0xff] }
 0x210   : > { %v5691_v27 = vpop.permute.xlu0 %1308 }
 0x211   : > { %8306 = vst [vmem:[#allocation121_spill] sm:$0xff] %v5691_v27  ;;  %v686_v27 = vld [vmem:[#allocation2 + $0x151] sm:$0xff] }
 0x214   : > { %1460 = vrot.lane.b32.xlu2 %v661_v23, %s4572_s12 }
 0x215   : > { %1458 = vrot.lane.b32.xlu1 %v660_v53, %s4572_s12 }
 0x216   : > { %1526 = vrot.lane.b32.xlu0 %v662_v49, %s4573_s13  ;;  %v5696_v32 = vpop.permute.xlu2 %1330 }
 0x217   : > { %8307 = vst [vmem:[#allocation122_spill] sm:$0xff] %v5696_v32  ;;  %v5698_v25 = vpop.permute.xlu1 %1310  ;;  %v667_v32 = vld [vmem:[#allocation2 + $0x69] sm:$0xff] }
 0x218   : > { %8308 = vst [vmem:[#allocation123_spill] sm:$0xff] %v5698_v25  ;;  %v5700_v24 = vpop.permute.xlu0 %1314  ;;  %v672_v25 = vld [vmem:[#allocation2 + $0xa9] sm:$0xff] }
 0x219   : > { %8309 = vst [vmem:[#allocation124_spill] sm:$0xff] %v5700_v24  ;;  %v670_v24 = vld [vmem:[#allocation2 + $0x91] sm:$0xff] }
 0x21c   : > { %1530 = vrot.lane.b32.xlu2 %v664_v58, %s4573_s13 }
 0x21d   : > { %1528 = vrot.lane.b32.xlu1 %v663_v52, %s4573_s13 }
 0x21e   : > { %1532 = vrot.lane.b32.xlu0 %v665_v4, %s4573_s13  ;;  %v5705_v23 = vpop.permute.xlu2 %1400 }
 0x21f   : > { %v5707_v53 = vpop.permute.xlu1 %1316 }
 0x220   : > { %8310 = vst [vmem:[#allocation125_spill] sm:$0xff] %v5707_v53  ;;  %v5709_v49 = vpop.permute.xlu0 %1320  ;;  %v671_v53 = vld [vmem:[#allocation2 + $0x99] sm:$0xff] }
 0x221   : > { %8311 = vst [vmem:[#allocation126_spill] sm:$0xff] %v5709_v49  ;;  %v673_v49 = vld [vmem:[#allocation2 + $0xb1] sm:$0xff] }
 0x224   : > { %1536 = vrot.lane.b32.xlu2 %v667_v32, %s4573_s13 }
 0x225   : > { %1534 = vrot.lane.b32.xlu1 %v666_v20, %s4573_s13 }
 0x226   : > { %1538 = vrot.lane.b32.xlu0 %v668_v63, %s4573_s13  ;;  %v5714_v58 = vpop.permute.xlu2 %1406 }
 0x227   : > { %v5716_v52 = vpop.permute.xlu1 %1322 }
 0x228   : > { %8312 = vst [vmem:[#allocation127_spill] sm:$0xff] %v5716_v52  ;;  %v5718_v4 = vpop.permute.xlu0 %1326  ;;  %v674_v52 = vld [vmem:[#allocation2 + $0xc1] sm:$0xff] }
 0x229   : > { %8313 = vst [vmem:[#allocation128_spill] sm:$0xff] %v5718_v4  ;;  %v676_v4 = vld [vmem:[#allocation2 + $0xd9] sm:$0xff] }
 0x22c   : > { %1542 = vrot.lane.b32.xlu2 %v670_v24, %s4573_s13 }
 0x22d   : > { %1540 = vrot.lane.b32.xlu1 %v669_v50, %s4573_s13 }
 0x22e   : > { %1544 = vrot.lane.b32.xlu0 %v671_v53, %s4573_s13  ;;  %v5723_v32 = vpop.permute.xlu2 %1412 }
 0x22f   : > { %v5725_v20 = vpop.permute.xlu1 %1328 }
 0x230   : > { %8314 = vst [vmem:[#allocation129_spill] sm:$0xff] %v5725_v20  ;;  %v5727_v63 = vpop.permute.xlu0 %1332  ;;  %v677_v20 = vld [vmem:[#allocation2 + $0xe1] sm:$0xff] }
 0x231   : > { %8315 = vst [vmem:[#allocation130_spill] sm:$0xff] %v5727_v63  ;;  %v679_v63 = vld [vmem:[#allocation2 + $0xf9] sm:$0xff] }
 0x234   : > { %1548 = vrot.lane.b32.xlu2 %v673_v49, %s4573_s13 }
 0x235   : > { %1546 = vrot.lane.b32.xlu1 %v672_v25, %s4573_s13 }
 0x236   : > { %1550 = vrot.lane.b32.xlu0 %v674_v52, %s4573_s13  ;;  %v5732_v24 = vpop.permute.xlu2 %1418 }
 0x237   : > { %8316 = vst [vmem:[#allocation131_spill] sm:$0xff] %v5732_v24  ;;  %v5734_v50 = vpop.permute.xlu1 %1398  ;;  %v678_v24 = vld [vmem:[#allocation2 + $0xf1] sm:$0xff] }
 0x238   : > { %v5736_v53 = vpop.permute.xlu0 %1402 }
 0x23c   : > { %1554 = vrot.lane.b32.xlu2 %v676_v4, %s4573_s13 }
 0x23d   : > { %1552 = vrot.lane.b32.xlu1 %v675_v35, %s4573_s13 }
 0x23e   : > { %1556 = vrot.lane.b32.xlu0 %v677_v20, %s4573_s13  ;;  %v5741_v49 = vpop.permute.xlu2 %1424 }
 0x23f   : > { %8317 = vst [vmem:[#allocation132_spill] sm:$0xff] %v5741_v49  ;;  %v5743_v25 = vpop.permute.xlu1 %1404  ;;  %v682_v49 = vld [vmem:[#allocation2 + $0x121] sm:$0xff] }
 0x240   : > { %v5745_v52 = vpop.permute.xlu0 %1408 }
 0x244   : > { %1560 = vrot.lane.b32.xlu2 %v679_v63, %s4573_s13 }
 0x245   : > { %1558 = vrot.lane.b32.xlu1 %v678_v24, %s4573_s13 }
 0x246   : > { %1562 = vrot.lane.b32.xlu0 %v680_v39, %s4573_s13  ;;  %v5750_v4 = vpop.permute.xlu2 %1430 }
 0x247   : > { %v5752_v35 = vpop.permute.xlu1 %1410 }
 0x248   : > { %v5754_v20 = vpop.permute.xlu0 %1414 }
 0x249   : > { %8318 = vst [vmem:[#allocation133_spill] sm:$0xff] %v5754_v20  ;;  %v716_v20 = vld [vmem:[#allocation2 + $0x13a] sm:$0xff] }
 0x24c   : > { %1566 = vrot.lane.b32.xlu2 %v682_v49, %s4573_s13 }
 0x24d   : > { %1564 = vrot.lane.b32.xlu1 %v681_v62, %s4573_s13 }
 0x24e   : > { %1568 = vrot.lane.b32.xlu0 %v683_v60, %s4573_s13  ;;  %v5759_v63 = vpop.permute.xlu2 %1436 }
 0x24f   : > { %8319 = vst [vmem:[#allocation134_spill] sm:$0xff] %v5759_v63  ;;  %v5761_v24 = vpop.permute.xlu1 %1416  ;;  %v688_v63 = vld [vmem:[#allocation2 + $0x169] sm:$0xff] }
 0x250   : > { %8320 = vst [vmem:[#allocation135_spill] sm:$0xff] %v5761_v24  ;;  %v5763_v39 = vpop.permute.xlu0 %1420  ;;  %v689_v24 = vld [vmem:[#allocation2 + $0x171] sm:$0xff] }
 0x251   : > { %8321 = vst [vmem:[#allocation136_spill] sm:$0xff] %v5763_v39  ;;  %v698_v39 = vld [vmem:[#allocation2 + $0x62] sm:$0xff] }
 0x254   : > { %1572 = vrot.lane.b32.xlu2 %v685_v29, %s4573_s13 }
 0x255   : > { %1570 = vrot.lane.b32.xlu1 %v684_v45, %s4573_s13 }
 0x256   : > { %1574 = vrot.lane.b32.xlu0 %v686_v27, %s4573_s13  ;;  %v5768_v49 = vpop.permute.xlu2 %1442 }
 0x257   : > { %8322 = vst [vmem:[#allocation137_spill] sm:$0xff] %v5768_v49  ;;  %v5770_v62 = vpop.permute.xlu1 %1422  ;;  %v692_v49 = vld [vmem:[#allocation2 + $0x199] sm:$0xff] }
 0x258   : > { %8323 = vst [vmem:[#allocation138_spill] sm:$0xff] %v5770_v62  ;;  %v5772_v60 = vpop.permute.xlu0 %1426  ;;  %v696_v62 = vld [vmem:[#allocation2 + $0x4a] sm:$0xff] }
 0x259   : > { %8324 = vst [vmem:[#allocation139_spill] sm:$0xff] %v5772_v60  ;;  %v693_v60 = vld [vmem:[#allocation2 + $0x1a1] sm:$0xff] }
 0x25c   : > { %1578 = vrot.lane.b32.xlu2 %v688_v63, %s4573_s13 }
 0x25d   : > { %1576 = vrot.lane.b32.xlu1 %v687_v55, %s4573_s13 }
 0x25e   : > { %1580 = vrot.lane.b32.xlu0 %v689_v24, %s4573_s13  ;;  %v5777_v29 = vpop.permute.xlu2 %1448 }
 0x25f   : > { %8325 = vst [vmem:[#allocation140_spill] sm:$0xff] %v5777_v29  ;;  %v5779_v45 = vpop.permute.xlu1 %1428  ;;  %v694_v29 = vld [vmem:[#allocation2 + $0x32] sm:$0xff] }
 0x260   : > { %8326 = vst [vmem:[#allocation141_spill] sm:$0xff] %v5779_v45  ;;  %v5781_v27 = vpop.permute.xlu0 %1432  ;;  %v695_v45 = vld [vmem:[#allocation2 + $0x3a] sm:$0xff] }
 0x264   : > { %1584 = vrot.lane.b32.xlu2 %v5443_v28, %s4573_s13 }
 0x265   : > { %1582 = vrot.lane.b32.xlu1 %v5429_v57, %s4573_s13 }
 0x266   : > { %1586 = vrot.lane.b32.xlu0 %v692_v49, %s4573_s13  ;;  %v5788_v63 = vpop.permute.xlu2 %1454 }
 0x267   : > { %8327 = vst [vmem:[#allocation142_spill] sm:$0xff] %v5788_v63  ;;  %v5790_v55 = vpop.permute.xlu1 %1434  ;;  %v697_v63 = vld [vmem:[#allocation2 + $0x52] sm:$0xff] }
 0x268   : > { %8328 = vst [vmem:[#allocation143_spill] sm:$0xff] %v5790_v55  ;;  %v5792_v24 = vpop.permute.xlu0 %1438  ;;  %v714_v55 = vld [vmem:[#allocation2 + $0x122] sm:$0xff] }
 0x269   : > { %8329 = vst [vmem:[#allocation144_spill] sm:$0xff] %v5792_v24  ;;  %v699_v24 = vld [vmem:[#allocation2 + $0x6a] sm:$0xff] }
 0x26c   : > { %1654 = vrot.lane.b32.xlu2 %v694_v29, %s4574_s14 }
 0x26d   : > { %1588 = vrot.lane.b32.xlu1 %v693_v60, %s4573_s13 }
 0x26e   : > { %1656 = vrot.lane.b32.xlu0 %v695_v45, %s4574_s14  ;;  %v5797_v28 = vpop.permute.xlu2 %1460 }
 0x26f   : > { %8330 = vst [vmem:[#allocation145_spill] sm:$0xff] %v5797_v28  ;;  %v5799_v57 = vpop.permute.xlu1 %1440  ;;  %v700_v28 = vld [vmem:[#allocation2 + $0x7a] sm:$0xff] }
 0x270   : > { %8331 = vst [vmem:[#allocation146_spill] sm:$0xff] %v5799_v57  ;;  %v5801_v49 = vpop.permute.xlu0 %1444  ;;  %v701_v57 = vld [vmem:[#allocation2 + $0x82] sm:$0xff] }
 0x271   : > { %8332 = vst [vmem:[#allocation147_spill] sm:$0xff] %v5801_v49  ;;  %v703_v49 = vld [vmem:[#allocation2 + $0x9a] sm:$0xff] }
 0x274   : > { %1660 = vrot.lane.b32.xlu2 %v697_v63, %s4574_s14 }
 0x275   : > { %1658 = vrot.lane.b32.xlu1 %v696_v62, %s4574_s14 }
 0x276   : > { %1662 = vrot.lane.b32.xlu0 %v698_v39, %s4574_s14  ;;  %v5806_v29 = vpop.permute.xlu2 %1530 }
 0x277   : > { %v5808_v60 = vpop.permute.xlu1 %1446 }
 0x278   : > { %8333 = vst [vmem:[#allocation148_spill] sm:$0xff] %v5808_v60  ;;  %v5810_v45 = vpop.permute.xlu0 %1450  ;;  %v704_v60 = vld [vmem:[#allocation2 + $0xaa] sm:$0xff] }
 0x279   : > { %8334 = vst [vmem:[#allocation149_spill] sm:$0xff] %v5810_v45  ;;  %v706_v45 = vld [vmem:[#allocation2 + $0xc2] sm:$0xff] }
 0x27c   : > { %1666 = vrot.lane.b32.xlu2 %v700_v28, %s4574_s14 }
 0x27d   : > { %1664 = vrot.lane.b32.xlu1 %v699_v24, %s4574_s14 }
 0x27e   : > { %1668 = vrot.lane.b32.xlu0 %v701_v57, %s4574_s14  ;;  %v5815_v63 = vpop.permute.xlu2 %1536 }
 0x27f   : > { %v5817_v62 = vpop.permute.xlu1 %1452 }
 0x280   : > { %8335 = vst [vmem:[#allocation150_spill] sm:$0xff] %v5817_v62  ;;  %v5819_v39 = vpop.permute.xlu0 %1456  ;;  %v707_v62 = vld [vmem:[#allocation2 + $0xca] sm:$0xff] }
 0x281   : > { %8336 = vst [vmem:[#allocation151_spill] sm:$0xff] %v5819_v39  ;;  %v709_v39 = vld [vmem:[#allocation2 + $0xe2] sm:$0xff] }
 0x284   : > { %1672 = vrot.lane.b32.xlu2 %v703_v49, %s4574_s14 }
 0x285   : > { %1670 = vrot.lane.b32.xlu1 %v702_v11, %s4574_s14 }
 0x286   : > { %1674 = vrot.lane.b32.xlu0 %v704_v60, %s4574_s14  ;;  %v5824_v28 = vpop.permute.xlu2 %1542 }
 0x287   : > { %8337 = vst [vmem:[#allocation152_spill] sm:$0xff] %v5824_v28  ;;  %v5826_v24 = vpop.permute.xlu1 %1458  ;;  %v713_v28 = vld [vmem:[#allocation2 + $0x112] sm:$0xff] }
 0x288   : > { %8338 = vst [vmem:[#allocation153_spill] sm:$0xff] %v5826_v24  ;;  %v5828_v57 = vpop.permute.xlu0 %1526  ;;  %v710_v24 = vld [vmem:[#allocation2 + $0xf2] sm:$0xff] }
 0x28c   : > { %1678 = vrot.lane.b32.xlu2 %v706_v45, %s4574_s14 }
 0x28d   : > { %1676 = vrot.lane.b32.xlu1 %v705_v37, %s4574_s14 }
 0x28e   : > { %1680 = vrot.lane.b32.xlu0 %v707_v62, %s4574_s14  ;;  %v5833_v49 = vpop.permute.xlu2 %1548 }
 0x28f   : > { %8339 = vst [vmem:[#allocation154_spill] sm:$0xff] %v5833_v49  ;;  %v5835_v11 = vpop.permute.xlu1 %1528  ;;  %v712_v49 = vld [vmem:[#allocation2 + $0x10a] sm:$0xff] }
 0x290   : > { %v5837_v60 = vpop.permute.xlu0 %1532 }
 0x294   : > { %1684 = vrot.lane.b32.xlu2 %v709_v39, %s4574_s14 }
 0x295   : > { %1682 = vrot.lane.b32.xlu1 %v708_v48, %s4574_s14 }
 0x296   : > { %1686 = vrot.lane.b32.xlu0 %v710_v24, %s4574_s14  ;;  %v5842_v45 = vpop.permute.xlu2 %1554  ;;  %v2017_v24 = vld [vmem:[%s8085_s1 + $0x20] sm:$0xf] }
 0x297   : > { %8340 = vst [vmem:[#allocation155_spill] sm:$0xff] %v5842_v45  ;;  %v5844_v37 = vpop.permute.xlu1 %1534  ;;  %4415 = vmatpush.msk.msra.mxu0 %vm2115_vm3, %v2017_v24  ;;  %4485 = vmatpush.msk.msra.mxu2 %vm2115_vm3, %v2017_v24 }
 0x298   : > { %v5846_v62 = vpop.permute.xlu0 %1538 }
 0x29c   : > { %1690 = vrot.lane.b32.xlu2 %v712_v49, %s4574_s14  ;;  %v715_v49 = vld [vmem:[#allocation2 + $0x12a] sm:$0xff] }
 0x29d   : > { %1688 = vrot.lane.b32.xlu1 %v711_v47, %s4574_s14  ;;  %v2016_v47 = vld [vmem:[%s8085_s1 + $0x18] sm:$0xff] }
 0x29e   : > { %1692 = vrot.lane.b32.xlu0 %v713_v28, %s4574_s14  ;;  %v5851_v39 = vpop.permute.xlu2 %1560  ;;  %v2015_v28 = vld [vmem:[%s8085_s1 + $0x10] sm:$0xff]  ;;  %2131 = vmatpush.msra.mxu0 %v2016_v47 }
 0x29f   : > { %v5853_v48 = vpop.permute.xlu1 %1540  ;;  %4486 = vmatpush.msra.mxu2 %v2016_v47  ;;  %v2013_v47 = vld [vmem:[%s8085_s1] sm:$0xff] }
 0x2a0   : > { %v5858_v45 = vpop.permute.xlu0 %1544  ;;  %2132 = vmatpush.msra.mxu0 %v2015_v28 }
 0x2a1   : > { %8341 = vst [vmem:[#allocation156_spill] sm:$0xff] %v5858_v45  ;;  %v2014_v45 = vld [vmem:[%s8085_s1 + $0x8] sm:$0xff]  ;;  %4487 = vmatpush.msra.mxu2 %v2015_v28 }
 0x2a2   : > { %2133 = vmatpush.msra.mxu0 %v2014_v45 }
 0x2a3   : > { %4488 = vmatpush.msra.mxu2 %v2014_v45  ;;  %v721_v45 = vld [vmem:[#allocation2 + $0x172] sm:$0xff] }
 0x2a4   : > { %1696 = vrot.lane.b32.xlu2 %v715_v49, %s4574_s14  ;;  %2134 = vmatpush.msra.mxu0 %v2013_v47  ;;  %v718_v49 = vld [vmem:[#allocation2 + $0x152] sm:$0xff] }
 0x2a5   : > { %1694 = vrot.lane.b32.xlu1 %v714_v55, %s4574_s14  ;;  %4489 = vmatpush.msra.mxu2 %v2013_v47  ;;  %v719_v55 = vld [vmem:[#allocation2 + $0x15a] sm:$0xff] }
 0x2a6   : > { %1698 = vrot.lane.b32.xlu0 %v716_v20, %s4574_s14  ;;  %v5874_v24 = vpop.permute.xlu2 %1566 }
 0x2a7   : > { %8342 = vst [vmem:[#allocation157_spill] sm:$0xff] %v5874_v24  ;;  %v5876_v43 = vpop.permute.xlu1 %1546  ;;  %v720_v24 = vld [vmem:[#allocation2 + $0x16a] sm:$0xff] }
 0x2a8   : > { %8343 = vst [vmem:[#allocation158_spill] sm:$0xff] %v5876_v43  ;;  %v5881_v5 = vpop.permute.xlu0 %1550 }
 0x2a9   : > { %8344 = vst [vmem:[#allocation159_spill] sm:$0xff] %v5881_v5  ;;  %v8352_v5 = vld [vmem:[#allocation35_spill] sm:$0xff] }
 0x2ac   : > { %1702 = vrot.lane.b32.xlu2 %v718_v49, %s4574_s14 }
 0x2ad   : > { %1700 = vrot.lane.b32.xlu1 %v717_v44, %s4574_s14 }
 0x2ae   : > { %1704 = vrot.lane.b32.xlu0 %v719_v55, %s4574_s14  ;;  %v5886_v20 = vpop.permute.xlu2 %1572  ;;  %v724_v55 = vld [vmem:[#allocation2 + $0x19a] sm:$0xff] }
 0x2af   : > { %8345 = vst [vmem:[#allocation160_spill] sm:$0xff] %v5886_v20  ;;  %v5888_v28 = vpop.permute.xlu1 %1552  ;;  %v725_v20 = vld [vmem:[#allocation2 + $0x1a2] sm:$0xff] }
 0x2b0   : > { %8346 = vst [vmem:[#allocation161_spill] sm:$0xff] %v5888_v28  ;;  %v5890_v43 = vpop.permute.xlu0 %1556 }
 0x2b1   : > { %8347 = vst [vmem:[#allocation162_spill] sm:$0xff] %v5890_v43  ;;  %v437_v43 = vld [vmem:[#allocation2] sm:$0xff] }
 0x2b4   : > { %1708 = vrot.lane.b32.xlu2 %v721_v45, %s4574_s14  ;;  %v8351_v45 = vld [vmem:[#allocation7_spill] sm:$0xff] }
 0x2b5   : > { %1706 = vrot.lane.b32.xlu1 %v720_v24, %s4574_s14 }
 0x2b6   : > { %1710 = vrot.lane.b32.xlu0 %v5565_v2, %s4574_s14  ;;  %v5896_v47 = vpop.permute.xlu2 %1578 }
 0x2b7   : > { %8348 = vst [vmem:[#allocation163_spill] sm:$0xff] %v5896_v47  ;;  %v5898_v44 = vpop.permute.xlu1 %1558  ;;  %v1750_v47 = vsel %vm279_vm0, %v437_v43, %v8351_v45 }
 0x2b8   : > { %v5900_v49 = vpop.permute.xlu0 %1562 }
 0x2b9   : > { %8349 = vst [vmem:[#allocation164_spill] sm:$0xff] %v5900_v49  ;;  %v1783_v49 = vsel %vm1782_vm4, %v1750_v47, %v8352_v5 }
 0x2bc   : > { %1714 = vrot.lane.b32.xlu2 %v724_v55, %s4574_s14 }
 0x2bd   : > { %1712 = vrot.lane.b32.xlu1 %v5567_v10, %s4574_s14  ;;  %v1816_v10 = vsel %vm1815_vm5, %v1783_v49, %v5365_v30 }
 0x2be   : > { %1716 = vrot.lane.b32.xlu0 %v725_v20, %s4574_s14  ;;  %v5906_v24 = vpop.permute.xlu2 %1584  ;;  %v1849_v20 = vsel %vm1848_vm7, %v1816_v10, %v5491_v12  ;;  %v438_v10 = vld [vmem:[#allocation2 + $0x8] sm:$0xff] }
 0x2bf   : > { %8350 = vst [vmem:[#allocation165_spill] sm:$0xff] %v5906_v24  ;;  %v5908_v2 = vpop.permute.xlu1 %1564  ;;  %v1882_v55 = vsel %vm1881_vm6, %v1849_v20, %v5585_v6 }
 0x2c0   : > { %v5912_v28 = vpop.permute.xlu0 %1568  ;;  %v1915_v43 = vsel %vm1914_vm8, %v1882_v55, %v5734_v50  ;;  %v8356_v55 = vld [vmem:[#allocation10_spill] sm:$0xff] }
 0x2c1   : > { %v1948_v5 = vsel %vm1947_vm10, %v1915_v43, %v5828_v57  ;;  %v1751_v57 = vsel %vm279_vm0, %v438_v10, %v8356_v55  ;;  %v8357_v43 = vld [vmem:[#allocation52_spill] sm:$0xff] }
 0x2c2   : > { %v1784_v24 = vsel %vm1782_vm4, %v1751_v57, %v8357_v43  ;;  %v4516_v43 = vld [vmem:[#allocation2 + $0x18] sm:$0xff] }
 0x2c6   : > { %v1655_v47 = vpop.permute.xlu2 %1654 }
 0x2c7   : > { %v5926_v45 = vpop.permute.xlu1 %1570  ;;  %v1981_v30 = vsel %vm1980_vm9, %v1948_v5, %v1655_v47  ;;  %v1817_v5 = vsel %vm1815_vm5, %v1784_v24, %v5327_v0 }
 0x2c8   : > { %v5929_v49 = vpop.permute.xlu0 %1574  ;;  %4416 = vmatmul.msk.f32.vlgmr.msra.gmra.mxu0 %vm2018_vm11, %v1981_v30  ;;  %v1850_v47 = vsel %vm1848_vm7, %v1817_v5, %v5501_v14  ;;  %v8359_v14 = vld [vmem:[#allocation55_spill] sm:$0xff] }
 0x2c9   : > { %v1883_v30 = vsel %vm1881_vm6, %v1850_v47, %v5622_v17 }
 0x2ce   : > { %v1661_v24 = vpop.permute.xlu2 %1660 }
 0x2cf   : > { %v5932_v12 = vpop.permute.xlu1 %1576 }
 0x2d0   : > { %v5934_v6 = vpop.permute.xlu0 %1580 }
 0x2d1   : > { %8353 = vst [vmem:[#allocation7_spill] sm:$0xff] %v5934_v6 }
 0x2d7   : > { %v5936_v50 = vpop.permute.xlu1 %1582 }
 0x2d8   : > { %8354 = vst [vmem:[#allocation35_spill] sm:$0xff] %v5936_v50  ;;  %v5938_v20 = vpop.permute.xlu0 %1586  ;;  %v1916_v50 = vsel %vm1914_vm8, %v1883_v30, %v5705_v23 }
 0x2d9   : > { %8355 = vst [vmem:[#allocation166_spill] sm:$0xff] %v5938_v20  ;;  %v1949_v10 = vsel %vm1947_vm10, %v1916_v50, %v5835_v11  ;;  %v8358_v20 = vld [vmem:[#allocation9_spill] sm:$0xff] }
 0x2da   : > { %v1752_v0 = vsel %vm279_vm0, %v4516_v43, %v8358_v20 }
 0x2db   : > { %v1785_v17 = vsel %vm1782_vm4, %v1752_v0, %v8359_v14  ;;  %v1667_v0 = vpop.permute.xlu2 %1666 }
 0x2dc   : > { %v1818_v23 = vsel %vm1815_vm5, %v1785_v17, %v5367_v34 }
 0x2dd   : > { %v1851_v5 = vsel %vm1848_vm7, %v1818_v23, %v5463_v3  ;;  %v8361_v3 = vld [vmem:[#allocation40_spill] sm:$0xff] }
 0x2de   : > { %v1884_v11 = vsel %vm1881_vm6, %v1851_v5, %v5631_v54 }
 0x2df   : > { %v5952_v6 = vpop.permute.xlu1 %1588  ;;  %v1917_v50 = vsel %vm1914_vm8, %v1884_v11, %v5736_v53 }
 0x2e0   : > { %v1657_v55 = vpop.permute.xlu0 %1656  ;;  %v1950_v20 = vsel %vm1947_vm10, %v1917_v50, %v5806_v29  ;;  %v4518_v50 = vld [vmem:[#allocation2 + $0x30] sm:$0xff] }
 0x2e1   : > { %v1982_v57 = vsel %vm1980_vm9, %v1949_v10, %v1657_v55  ;;  %v4517_v55 = vld [vmem:[#allocation2 + $0x20] sm:$0xff] }
 0x2e2   : > { %4417 = vmatmul.msk.f32.gmra.mxu0 %vm2018_vm11, %v1982_v57  ;;  %v8360_v57 = vld [vmem:[#allocation12_spill] sm:$0xff] }
 0x2e3   : > { %v1753_v34 = vsel %vm279_vm0, %v4517_v55, %v8360_v57  ;;  %v6008_v57 = vpop.permute.xlu2 %1672 }
 0x2e4   : > { %v1786_v43 = vsel %vm1782_vm4, %v1753_v34, %v8361_v3  ;;  %v4519_v3 = vld [vmem:[#allocation2 + $0x38] sm:$0xff] }
 0x2e5   : > { %v1819_v54 = vsel %vm1815_vm5, %v1786_v43, %v5377_v36  ;;  %v8362_v36 = vld [vmem:[#allocation4_spill] sm:$0xff]  ;;  %v8364_v43 = vld [vmem:[#allocation5_spill] sm:$0xff] }
 0x2e6   : > { %v1852_v53 = vsel %vm1848_vm7, %v1819_v54, %v5503_v18  ;;  %v8363_v18 = vld [vmem:[#allocation56_spill] sm:$0xff] }
 0x2e7   : > { %v1659_v47 = vpop.permute.xlu1 %1658  ;;  %v1885_v29 = vsel %vm1881_vm6, %v1852_v53, %v5596_v15 }
 0x2e8   : > { %v1663_v30 = vpop.permute.xlu0 %1662  ;;  %v1983_v10 = vsel %vm1980_vm9, %v1950_v20, %v1659_v47  ;;  %v1918_v14 = vsel %vm1914_vm8, %v1885_v29, %v5743_v25  ;;  %v1754_v47 = vsel %vm279_vm0, %v4518_v50, %v8362_v36  ;;  %v4520_v50 = vld [vmem:[#allocation2 + $0x48] sm:$0xff] }
 0x2e9   : > { %v1951_v23 = vsel %vm1947_vm10, %v1918_v14, %v5837_v60  ;;  %v1787_v15 = vsel %vm1782_vm4, %v1754_v47, %v8363_v18  ;;  %v8367_v47 = vld [vmem:[#allocation27_spill] sm:$0xff] }
 0x2ea   : > { %4418 = vmatmul.msk.f32.gmra.mxu0 %vm2018_vm11, %v1983_v10  ;;  %v1984_v11 = vsel %vm1980_vm9, %v1951_v23, %v1661_v24  ;;  %v1820_v25 = vsel %vm1815_vm5, %v1787_v15, %v5339_v8 }
 0x2eb   : > { %v1853_v20 = vsel %vm1848_vm7, %v1820_v25, %v5513_v22  ;;  %v1755_v22 = vsel %vm279_vm0, %v4519_v3, %v8364_v43  ;;  %v6037_v18 = vpop.permute.xlu2 %1678 }
 0x2ec   : > { %v1886_v60 = vsel %vm1881_vm6, %v1853_v20, %v5633_v1  ;;  %v8365_v1 = vld [vmem:[#allocation59_spill] sm:$0xff] }
 0x2ed   : > { %v1919_v24 = vsel %vm1914_vm8, %v1886_v60, %v5714_v58  ;;  %v1788_v58 = vsel %vm1782_vm4, %v1755_v22, %v8365_v1  ;;  %v8370_v1 = vld [vmem:[#allocation14_spill] sm:$0xff] }
 0x2ee   : > { %v1952_v55 = vsel %vm1947_vm10, %v1919_v24, %v5844_v37  ;;  %v1821_v54 = vsel %vm1815_vm5, %v1788_v58, %v5379_v40  ;;  %v8366_v40 = vld [vmem:[#allocation13_spill] sm:$0xff]  ;;  %v4523_v58 = vld [vmem:[#allocation2 + $0x50] sm:$0xff] }
 0x2ef   : > { %v1665_v17 = vpop.permute.xlu1 %1664  ;;  %v1985_v8 = vsel %vm1980_vm9, %v1952_v55, %v1663_v30  ;;  %v1854_v37 = vsel %vm1848_vm7, %v1821_v54, %v5475_v7  ;;  %v1756_v36 = vsel %vm279_vm0, %v4520_v50, %v8366_v40  ;;  %v4521_v7 = vld [vmem:[#allocation2 + $0xc0] sm:$0xff]  ;;  %v8371_v54 = vld [vmem:[#allocation15_spill] sm:$0xff] }
 0x2f0   : > { %v5988_v5 = vpop.permute.xlu0 %1668  ;;  %v1887_v53 = vsel %vm1881_vm6, %v1854_v37, %v5642_v33  ;;  %v1766_v33 = vsel %vm279_vm0, %v4521_v7, %v8367_v47  ;;  %v8373_v37 = vld [vmem:[#allocation79_spill] sm:$0xff] }
 0x2f1   : > { %v1920_v30 = vsel %vm1914_vm8, %v1887_v53, %v5745_v52  ;;  %v8368_v52 = vld [vmem:[#allocation45_spill] sm:$0xff] }
 0x2f2   : > { %4419 = vmatmul.msk.f32.gmra.mxu0 %vm2018_vm11, %v1984_v11  ;;  %v1953_v14 = vsel %vm1947_vm10, %v1920_v30, %v5815_v63  ;;  %v1789_v15 = vsel %vm1782_vm4, %v1756_v36, %v8368_v52  ;;  %v8369_v63 = vld [vmem:[#allocation76_spill] sm:$0xff] }
 0x2f3   : > { %v1986_v11 = vsel %vm1980_vm9, %v1953_v14, %v1665_v17  ;;  %v1799_v25 = vsel %vm1782_vm4, %v1766_v33, %v8369_v63  ;;  %v1822_v20 = vsel %vm1815_vm5, %v1789_v15, %v5389_v42  ;;  %v6082_v14 = vpop.permute.xlu2 %1684  ;;  %v4524_v33 = vld [vmem:[#allocation2 + $0x60] sm:$0xff] }
 0x2f4   : > { %v1832_v17 = vsel %vm1815_vm5, %v1799_v25, %v5387_v41  ;;  %v1855_v60 = vsel %vm1848_vm7, %v1822_v20, %v5515_v26  ;;  %v8375_v15 = vld [vmem:[#allocation28_spill] sm:$0xff] }
 0x2f5   : > { %v1865_v24 = vsel %vm1848_vm7, %v1832_v17, %v5561_v61  ;;  %v1888_v55 = vsel %vm1881_vm6, %v1855_v60, %v5607_v9  ;;  %v8377_v63 = vld [vmem:[#allocation64_spill] sm:$0xff]  ;;  %v8378_v60 = vld [vmem:[#allocation25_spill] sm:$0xff] }
 0x2f6   : > { %v1921_v41 = vsel %vm1914_vm8, %v1888_v55, %v5752_v35  ;;  %v1757_v35 = vsel %vm279_vm0, %v4523_v58, %v8371_v54  ;;  %v8379_v55 = vld [vmem:[#allocation62_spill] sm:$0xff]  ;;  %v4526_v58 = vld [vmem:[#allocation2 + $0x68] sm:$0xff]  ;;  %v8385_v54 = vld [vmem:[#allocation16_spill] sm:$0xff] }
 0x2f7   : > { %v6004_v10 = vpop.permute.xlu1 %1670  ;;  %v1954_v42 = vsel %vm1947_vm10, %v1921_v41, %v5846_v62  ;;  %v8372_v62 = vld [vmem:[#allocation60_spill] sm:$0xff] }
 0x2f8   : > { %v6010_v34 = vpop.permute.xlu0 %1674  ;;  %v1987_v9 = vsel %vm1980_vm9, %v1954_v42, %v1667_v0 }
 0x2fa   : > { %4420 = vmatmul.msk.f32.gmra.mxu0 %vm2018_vm11, %v1985_v8  ;;  %v1898_v8 = vsel %vm1881_vm6, %v1865_v24, %v5679_v16  ;;  %v4522_v16 = vld [vmem:[#allocation2 + $0xc8] sm:$0xff] }
 0x2fb   : > { %v1931_v3 = vsel %vm1914_vm8, %v1898_v8, %v5750_v4  ;;  %v1767_v4 = vsel %vm279_vm0, %v4522_v16, %v8370_v1  ;;  %v1691_v42 = vpop.permute.xlu2 %1690 }
 0x2fc   : > { %v1964_v26 = vsel %vm1947_vm10, %v1931_v3, %v5898_v44  ;;  %v1790_v44 = vsel %vm1782_vm4, %v1757_v35, %v8372_v62  ;;  %v1800_v0 = vsel %vm1782_vm4, %v1767_v4, %v8373_v37  ;;  %v8380_v3 = vld [vmem:[#allocation66_spill] sm:$0xff]  ;;  %v1759_v35 = vsel %vm279_vm0, %v4526_v58, %v8385_v54  ;;  %v4527_v62 = vld [vmem:[#allocation2 + $0xe0] sm:$0xff] }
 0x2fd   : > { %v1823_v53 = vsel %vm1815_vm5, %v1790_v44, %v5351_v19  ;;  %v1833_v30 = vsel %vm1815_vm5, %v1800_v0, %v5427_v56  ;;  %v8386_v44 = vld [vmem:[#allocation33_spill] sm:$0xff]  ;;  %v8387_v0 = vld [vmem:[#allocation50_spill] sm:$0xff] }
 0x2fe   : > { %v1856_v50 = vsel %vm1848_vm7, %v1823_v53, %v5525_v31  ;;  %v1769_v37 = vsel %vm279_vm0, %v4527_v62, %v8386_v44  ;;  %v1792_v53 = vsel %vm1782_vm4, %v1759_v35, %v8387_v0  ;;  %v8408_v35 = vld [vmem:[#allocation131_spill] sm:$0xff]  ;;  %v8409_v44 = vld [vmem:[#allocation144_spill] sm:$0xff]  ;;  %v8410_v0 = vld [vmem:[#allocation157_spill] sm:$0xff] }
 0x2ff   : > { %v6026_v29 = vpop.permute.xlu1 %1676  ;;  %v1889_v40 = vsel %vm1881_vm6, %v1856_v50, %v5644_v21 }
 0x300   : > { %v6030_v23 = vpop.permute.xlu0 %1680  ;;  %v1922_v19 = vsel %vm1914_vm8, %v1889_v40, %v5723_v32  ;;  %v4525_v32 = vld [vmem:[#allocation2 + $0xd8] sm:$0xff]  ;;  %v8390_v40 = vld [vmem:[#allocation94_spill] sm:$0xff] }
 0x302   : > { %4421 = vmatmul.msk.f32.gmra.mxu0 %vm2018_vm11, %v1986_v11  ;;  %v1866_v11 = vsel %vm1848_vm7, %v1833_v30, %v5523_v38  ;;  %v1955_v38 = vsel %vm1947_vm10, %v1922_v19, %v5853_v48  ;;  %v8388_v30 = vld [vmem:[#allocation80_spill] sm:$0xff]  ;;  %v8391_v19 = vld [vmem:[#allocation113_spill] sm:$0xff] }
 0x303   : > { %v1899_v36 = vsel %vm1881_vm6, %v1866_v11, %v5689_v51  ;;  %v1988_v31 = vsel %vm1980_vm9, %v1955_v38, %v5988_v5  ;;  %v8374_v51 = vld [vmem:[#allocation6_spill] sm:$0xff]  ;;  %v8389_v11 = vld [vmem:[#allocation93_spill] sm:$0xff] }
 0x304   : > { %v1932_v56 = vsel %vm1914_vm8, %v1899_v36, %v5781_v27  ;;  %v1758_v52 = vsel %vm279_vm0, %v4524_v33, %v8374_v51  ;;  %v1768_v27 = vsel %vm279_vm0, %v4525_v32, %v8375_v15  ;;  %v1825_v36 = vsel %vm1815_vm5, %v1792_v53, %v8390_v40  ;;  %v8393_v38 = vld [vmem:[#allocation49_spill] sm:$0xff]  ;;  %v8396_v15 = vld [vmem:[#allocation135_spill] sm:$0xff]  ;;  %v4530_v40 = vld [vmem:[#allocation2 + $0x80] sm:$0xff] }
 0x305   : > { %v1965_v47 = vsel %vm1947_vm10, %v1932_v56, %v5851_v39  ;;  %v8376_v39 = vld [vmem:[#allocation63_spill] sm:$0xff]  ;;  %v1791_v5 = vsel %vm1782_vm4, %v1758_v52, %v8377_v63  ;;  %v1858_v56 = vsel %vm1848_vm7, %v1825_v36, %v8391_v19  ;;  %v8395_v52 = vld [vmem:[#allocation134_spill] sm:$0xff]  ;;  %v8412_v36 = vld [vmem:[#allocation8_spill] sm:$0xff] }
 0x306   : > { %v1801_v48 = vsel %vm1782_vm4, %v1768_v27, %v8376_v39  ;;  %v1824_v25 = vsel %vm1815_vm5, %v1791_v5, %v5391_v46  ;;  %v8382_v46 = vld [vmem:[#allocation143_spill] sm:$0xff]  ;;  %v8397_v39 = vld [vmem:[#allocation156_spill] sm:$0xff]  ;;  %v1761_v19 = vsel %vm279_vm0, %v4530_v40, %v8412_v36  ;;  %v8436_v36 = vld [vmem:[#allocation138_spill] sm:$0xff] }
 0x307   : > { %v6060_v43 = vpop.permute.xlu1 %1682  ;;  %v1834_v17 = vsel %vm1815_vm5, %v1801_v48, %v5439_v59  ;;  %v1857_v20 = vsel %vm1848_vm7, %v1824_v25, %v5487_v13  ;;  %v8383_v59 = vld [vmem:[#allocation152_spill] sm:$0xff] }
 0x308   : > { %v1687_v61 = vpop.permute.xlu0 %1686  ;;  %v1867_v24 = vsel %vm1848_vm7, %v1834_v17, %v8378_v60  ;;  %v1890_v41 = vsel %vm1881_vm6, %v1857_v20, %v8380_v3  ;;  %v8384_v13 = vld [vmem:[#allocation164_spill] sm:$0xff]  ;;  %v4528_v17 = vld [vmem:[#allocation2 + $0xf0] sm:$0xff]  ;;  %v8398_v20 = vld [vmem:[#allocation17_spill] sm:$0xff] }
 0x309   : > { %v1997_v22 = vsel %vm1980_vm9, %v1964_v26, %v1687_v61  ;;  %v1900_v8 = vsel %vm1881_vm6, %v1867_v24, %v8379_v55  ;;  %v8381_v26 = vld [vmem:[#allocation133_spill] sm:$0xff]  ;;  %v1770_v60 = vsel %vm279_vm0, %v4528_v17, %v8398_v20  ;;  %v4529_v24 = vld [vmem:[#allocation2 + $0x78] sm:$0xff]  ;;  %v8399_v55 = vld [vmem:[#allocation18_spill] sm:$0xff]  ;;  %v1697_v20 = vpop.permute.xlu2 %1696 }
 0x30a   : > { %4422 = vmatmul.msk.f32.gmra.mxu0 %vm2018_vm11, %v1987_v9  ;;  %4432 = vmatmul.msk.f32.vlgmr.msra.gmra.mxu2 %vm2018_vm11, %v1997_v22  ;;  %v1923_v61 = vsel %vm1914_vm8, %v1890_v41, %v8381_v26  ;;  %v1933_v9 = vsel %vm1914_vm8, %v1900_v8, %v8382_v46  ;;  %v1760_v8 = vsel %vm279_vm0, %v4529_v24, %v8399_v55  ;;  %v8400_v3 = vld [vmem:[#allocation65_spill] sm:$0xff]  ;;  %v8401_v41 = vld [vmem:[#allocation83_spill] sm:$0xff]  ;;  %v8423_v55 = vld [vmem:[#allocation146_spill] sm:$0xff] }
 0x30b   : > { %v1956_v22 = vsel %vm1947_vm10, %v1923_v61, %v8383_v59  ;;  %v1966_v16 = vsel %vm1947_vm10, %v1933_v9, %v8384_v13  ;;  %v8403_v61 = vld [vmem:[#allocation102_spill] sm:$0xff] }
 0x30c   : > { %v1989_v1 = vsel %vm1980_vm9, %v1956_v22, %v6004_v10  ;;  %v1999_v4 = vsel %vm1980_vm9, %v1966_v16, %v1691_v42  ;;  %v1802_v10 = vsel %vm1782_vm4, %v1769_v37, %v8388_v30  ;;  %v8402_v42 = vld [vmem:[#allocation91_spill] sm:$0xff]  ;;  %v8404_v9 = vld [vmem:[#allocation114_spill] sm:$0xff]  ;;  %v8406_v16 = vld [vmem:[#allocation120_spill] sm:$0xff] }
 0x30d   : > { %v1835_v50 = vsel %vm1815_vm5, %v1802_v10, %v8389_v11  ;;  %v8405_v22 = vld [vmem:[#allocation115_spill] sm:$0xff]  ;;  %v8411_v30 = vld [vmem:[#allocation158_spill] sm:$0xff] }
 0x30f   : > { %v1689_v7 = vpop.permute.xlu1 %1688 }
 0x310   : > { %v1998_v21 = vsel %vm1980_vm9, %v1965_v47, %v1689_v7  ;;  %v8392_v7 = vld [vmem:[#allocation31_spill] sm:$0xff]  ;;  %v1693_v51 = vpop.permute.xlu0 %1692 }
 0x311   : > { %v1868_v47 = vsel %vm1848_vm7, %v1835_v50, %v8392_v7  ;;  %v8413_v7 = vld [vmem:[#allocation34_spill] sm:$0xff] }
 0x312   : > { %4423 = vmatmul.msk.f32.gmra.mxu0 %vm2018_vm11, %v1988_v31  ;;  %4433 = vmatmul.msk.f32.gmra.mxu2 %vm2018_vm11, %v1998_v21  ;;  %v1891_v31 = vsel %vm1881_vm6, %v1858_v56, %v8393_v38  ;;  %v8394_v21 = vld [vmem:[#allocation121_spill] sm:$0xff]  ;;  %v4531_v56 = vld [vmem:[#allocation2 + $0xf8] sm:$0xff]  ;;  %v8414_v38 = vld [vmem:[#allocation68_spill] sm:$0xff] }
 0x313   : > { %v1901_v33 = vsel %vm1881_vm6, %v1868_v47, %v8394_v21  ;;  %v1924_v27 = vsel %vm1914_vm8, %v1891_v31, %v8396_v15  ;;  %v1771_v47 = vsel %vm279_vm0, %v4531_v56, %v8413_v7  ;;  %v8415_v21 = vld [vmem:[#allocation69_spill] sm:$0xff]  ;;  %v8418_v15 = vld [vmem:[#allocation111_spill] sm:$0xff] }
 0x314   : > { %v1934_v32 = vsel %vm1914_vm8, %v1901_v33, %v8395_v52  ;;  %v1957_v48 = vsel %vm1947_vm10, %v1924_v27, %v8397_v39  ;;  %v1804_v31 = vsel %vm1782_vm4, %v1771_v47, %v8414_v38  ;;  %v8416_v33 = vld [vmem:[#allocation95_spill] sm:$0xff]  ;;  %v8417_v52 = vld [vmem:[#allocation104_spill] sm:$0xff]  ;;  %v8419_v39 = vld [vmem:[#allocation118_spill] sm:$0xff] }
 0x315   : > { %v1967_v63 = vsel %vm1947_vm10, %v1934_v32, %v5908_v2  ;;  %v1990_v5 = vsel %vm1980_vm9, %v1957_v48, %v6008_v57  ;;  %v1793_v2 = vsel %vm1782_vm4, %v1760_v8, %v8400_v3  ;;  %v1803_v57 = vsel %vm1782_vm4, %v1770_v60, %v8401_v41  ;;  %v8422_v60 = vld [vmem:[#allocation136_spill] sm:$0xff]  ;;  %v8424_v3 = vld [vmem:[#allocation154_spill] sm:$0xff]  ;;  %v8437_v56 = vld [vmem:[#allocation159_spill] sm:$0xff] }
 0x316   : > { %v2000_v25 = vsel %vm1980_vm9, %v1967_v63, %v1693_v51  ;;  %v1826_v26 = vsel %vm1815_vm5, %v1793_v2, %v8402_v42  ;;  %v1836_v46 = vsel %vm1815_vm5, %v1803_v57, %v8403_v61  ;;  %v1837_v32 = vsel %vm1815_vm5, %v1804_v31, %v8417_v52  ;;  %v8420_v63 = vld [vmem:[#allocation72_spill] sm:$0xff]  ;;  %v8425_v61 = vld [vmem:[#allocation19_spill] sm:$0xff]  ;;  %v8439_v52 = vld [vmem:[#allocation22_spill] sm:$0xff] }
 0x317   : > { %v1869_v59 = vsel %vm1848_vm7, %v1836_v46, %v8404_v9  ;;  %v1859_v13 = vsel %vm1848_vm7, %v1826_v26, %v8405_v22  ;;  %v1695_v54 = vpop.permute.xlu1 %1694  ;;  %v1870_v48 = vsel %vm1848_vm7, %v1837_v32, %v8419_v39  ;;  %v4532_v26 = vld [vmem:[#allocation2 + $0x90] sm:$0xff]  ;;  %v4533_v9 = vld [vmem:[#allocation2 + $0x108] sm:$0xff]  ;;  %v8442_v39 = vld [vmem:[#allocation92_spill] sm:$0xff] }
 0x318   : > { %v1762_v46 = vsel %vm279_vm0, %v4532_v26, %v8425_v61  ;;  %v8450_v61 = vld [vmem:[#allocation160_spill] sm:$0xff] }
 0x31a   : > { %4424 = vmatmul.msk.f32.gmra.mxu0 %vm2018_vm11, %v1989_v1  ;;  %4434 = vmatmul.msk.f32.gmra.mxu2 %vm2018_vm11, %v1999_v4  ;;  %v1892_v1 = vsel %vm1881_vm6, %v1859_v13, %v8406_v16  ;;  %v8407_v4 = vld [vmem:[#allocation123_spill] sm:$0xff]  ;;  %v8427_v13 = vld [vmem:[#allocation54_spill] sm:$0xff]  ;;  %v8428_v16 = vld [vmem:[#allocation84_spill] sm:$0xff] }
 0x31b   : > { %v1902_v58 = vsel %vm1881_vm6, %v1869_v59, %v8407_v4  ;;  %v1925_v62 = vsel %vm1914_vm8, %v1892_v1, %v8408_v35  ;;  %v8426_v59 = vld [vmem:[#allocation36_spill] sm:$0xff] }
 0x31c   : > { %v1935_v37 = vsel %vm1914_vm8, %v1902_v58, %v8409_v44  ;;  %v1958_v10 = vsel %vm1947_vm10, %v1925_v62, %v8411_v30  ;;  %v1772_v22 = vsel %vm279_vm0, %v4533_v9, %v8426_v59  ;;  %v8429_v1 = vld [vmem:[#allocation96_spill] sm:$0xff]  ;;  %v8430_v58 = vld [vmem:[#allocation97_spill] sm:$0xff]  ;;  %v8432_v44 = vld [vmem:[#allocation38_spill] sm:$0xff] }
 0x31d   : > { %v1968_v53 = vsel %vm1947_vm10, %v1935_v37, %v8410_v0  ;;  %v1991_v11 = vsel %vm1980_vm9, %v1958_v10, %v6010_v34  ;;  %v1794_v34 = vsel %vm1782_vm4, %v1761_v19, %v8415_v21  ;;  %v8431_v35 = vld [vmem:[#allocation116_spill] sm:$0xff]  ;;  %v8433_v0 = vld [vmem:[#allocation57_spill] sm:$0xff]  ;;  %v4534_v21 = vld [vmem:[#allocation2 + $0x110] sm:$0xff] }
 0x31e   : > { %v2001_v50 = vsel %vm1980_vm9, %v1968_v53, %v1695_v54  ;;  %v1827_v51 = vsel %vm1815_vm5, %v1794_v34, %v8416_v33  ;;  %v8434_v30 = vld [vmem:[#allocation124_spill] sm:$0xff]  ;;  %v8438_v34 = vld [vmem:[#allocation21_spill] sm:$0xff] }
 0x31f   : > { %v1860_v27 = vsel %vm1848_vm7, %v1827_v51, %v8418_v15  ;;  %v1773_v33 = vsel %vm279_vm0, %v4534_v21, %v8438_v34  ;;  %v4535_v51 = vld [vmem:[#allocation2 + $0x98] sm:$0xff]  ;;  %v8440_v15 = vld [vmem:[#allocation70_spill] sm:$0xff]  ;;  %v8451_v9 = vld [vmem:[#allocation161_spill] sm:$0xff] }
 0x320   : > { %v1763_v32 = vsel %vm279_vm0, %v4535_v51, %v8439_v52  ;;  %v2399_v34 = vld [vmem:[#allocation3 + $0x1] sm:$0xff]  ;;  %v8463_v52 = vld [vmem:[#allocation148_spill] sm:$0xff] }
 0x321   : > { %2688 = vrot.lane.b32.xlu1 %v2399_v34, %s4567_s30 }
 0x322   : > { %4425 = vmatmul.msk.f32.gmra.mxu0 %vm2018_vm11, %v1990_v5  ;;  %4435 = vmatmul.msk.f32.gmra.mxu2 %vm2018_vm11, %v2000_v25  ;;  %v1903_v5 = vsel %vm1881_vm6, %v1870_v48, %v8420_v63  ;;  %v8421_v25 = vld [vmem:[#allocation67_spill] sm:$0xff]  ;;  %v8443_v63 = vld [vmem:[#allocation105_spill] sm:$0xff] }
 0x323   : > { %v1893_v17 = vsel %vm1881_vm6, %v1860_v27, %v8421_v25  ;;  %v1936_v8 = vsel %vm1914_vm8, %v1903_v5, %v8423_v55  ;;  %v8441_v27 = vld [vmem:[#allocation85_spill] sm:$0xff]  ;;  %v8444_v25 = vld [vmem:[#allocation20_spill] sm:$0xff] }
 0x324   : > { %v1926_v24 = vsel %vm1914_vm8, %v1893_v17, %v8422_v60  ;;  %v1969_v41 = vsel %vm1947_vm10, %v1936_v8, %v5912_v28  ;;  %v1795_v28 = vsel %vm1782_vm4, %v1762_v46, %v8427_v13  ;;  %v8447_v8 = vld [vmem:[#allocation125_spill] sm:$0xff] }
 0x325   : > { %v1959_v2 = vsel %vm1947_vm10, %v1926_v24, %v8424_v3  ;;  %v2002_v42 = vsel %vm1980_vm9, %v1969_v41, %v1697_v20  ;;  %v1828_v54 = vsel %vm1815_vm5, %v1795_v28, %v8430_v58  ;;  %v8445_v20 = vld [vmem:[#allocation24_spill] sm:$0xff]  ;;  %v8446_v24 = vld [vmem:[#allocation71_spill] sm:$0xff]  ;;  %v4536_v28 = vld [vmem:[#allocation2 + $0xa8] sm:$0xff] }
 0x326   : > { %v1992_v57 = vsel %vm1980_vm9, %v1959_v2, %v6026_v29  ;;  %v1805_v29 = vsel %vm1782_vm4, %v1772_v22, %v8428_v16  ;;  %v1861_v62 = vsel %vm1848_vm7, %v1828_v54, %v8431_v35  ;;  %v1701_v2 = vpop.permute.xlu1 %1700  ;;  %v8448_v41 = vld [vmem:[#allocation132_spill] sm:$0xff]  ;;  %v8452_v16 = vld [vmem:[#allocation11_spill] sm:$0xff] }
 0x327   : > { %v1838_v4 = vsel %vm1815_vm5, %v1805_v29, %v8429_v1  ;;  %v1894_v53 = vsel %vm1881_vm6, %v1861_v62, %v8433_v0  ;;  %v1764_v29 = vsel %vm279_vm0, %v4536_v28, %v8452_v16  ;;  %v4537_v1 = vld [vmem:[#allocation2 + $0x120] sm:$0xff]  ;;  %v8455_v62 = vld [vmem:[#allocation75_spill] sm:$0xff] }
 0x328   : > { %v1871_v37 = vsel %vm1848_vm7, %v1838_v4, %v8432_v44  ;;  %v1927_v19 = vsel %vm1914_vm8, %v1894_v53, %v8436_v36  ;;  %v8453_v4 = vld [vmem:[#allocation37_spill] sm:$0xff]  ;;  %v6310_v54 = vld [vmem:[%s8086_s2] ss:$0 sm:$0xff]  ;;  %v1797_v44 = vsel %vm1782_vm4, %v1764_v29, %v8455_v62  ;;  %v8457_v53 = vld [vmem:[#allocation106_spill] sm:$0xff] }
 0x329   : > { %v1904_v10 = vsel %vm1881_vm6, %v1871_v37, %v8434_v30  ;;  %v1960_v7 = vsel %vm1947_vm10, %v1927_v19, %v8437_v56  ;;  %v1774_v58 = vsel %vm279_vm0, %v4537_v1, %v8453_v4  ;;  %v8456_v37 = vld [vmem:[#allocation98_spill] sm:$0xff]  ;;  %v8460_v56 = vld [vmem:[#allocation73_spill] sm:$0xff]  ;;  %v2400_v16 = vld [vmem:[#allocation3 + $0x9] sm:$0xff] }
 0x32a   : > { %4426 = vmatmul.msk.f32.gmra.mxu0 %vm2018_vm11, %v1991_v11  ;;  %4436 = vmatmul.msk.f32.gmra.mxu2 %vm2018_vm11, %v2001_v50  ;;  %v1699_v11 = vpop.permute.xlu0 %1698  ;;  %v8435_v50 = vld [vmem:[#allocation137_spill] sm:$0xff]  ;;  %v1993_v38 = vsel %vm1980_vm9, %v1960_v7, %v6037_v18  ;;  %v1806_v18 = vsel %vm1782_vm4, %v1773_v33, %v8441_v27  ;;  %v1830_v0 = vsel %vm1815_vm5, %v1797_v44, %v8456_v37  ;;  %v8462_v33 = vld [vmem:[#allocation139_spill] sm:$0xff]  ;;  %v8475_v29 = vld [vmem:[#allocation140_spill] sm:$0xff] }
 0x32b   : > { %v1937_v40 = vsel %vm1914_vm8, %v1904_v10, %v8435_v50  ;;  %v1839_v5 = vsel %vm1815_vm5, %v1806_v18, %v8443_v63  ;;  %v6323_v10 = vld [vmem:[%s8087_s3] ss:$0 sm:$0xff]  ;;  %v4538_v63 = vld [vmem:[#allocation2 + $0xb0] sm:$0xff]  ;;  %v8476_v4 = vld [vmem:[#allocation141_spill] sm:$0xff]  ;;  %2690 = vrot.lane.b32.xlu2 %v2400_v16, %s4567_s30 }
 0x32c   : > { %v1970_v47 = vsel %vm1947_vm10, %v1937_v40, %v5926_v45  ;;  %v1796_v45 = vsel %vm1782_vm4, %v1763_v32, %v8440_v15  ;;  %v1872_v17 = vsel %vm1848_vm7, %v1839_v5, %v8444_v25  ;;  %v8459_v40 = vld [vmem:[#allocation119_spill] sm:$0xff]  ;;  %v8497_v16 = vld [vmem:[#allocation142_spill] sm:$0xff] }
 0x32d   : > { %v2003_v31 = vsel %vm1980_vm9, %v1970_v47, %v1699_v11  ;;  %v1829_v48 = vsel %vm1815_vm5, %v1796_v45, %v8442_v39  ;;  %v1905_v3 = vsel %vm1881_vm6, %v1872_v17, %v8447_v8  ;;  %v8458_v11 = vld [vmem:[#allocation112_spill] sm:$0xff]  ;;  %v8461_v47 = vld [vmem:[#allocation77_spill] sm:$0xff]  ;;  %v8464_v15 = vld [vmem:[#allocation155_spill] sm:$0xff] }
 0x32e   : > { %v1862_v60 = vsel %vm1848_vm7, %v1829_v48, %v8445_v20  ;;  %v1863_v50 = vsel %vm1848_vm7, %v1830_v0, %v8458_v11  ;;  %v8465_v5 = vld [vmem:[#allocation23_spill] sm:$0xff]  ;;  %v4539_v17 = vld [vmem:[#allocation2 + $0x128] sm:$0xff]  ;;  %v8468_v8 = vld [vmem:[#allocation86_spill] sm:$0xff] }
 0x32f   : > { %v1895_v55 = vsel %vm1881_vm6, %v1862_v60, %v8446_v24  ;;  %v1765_v25 = vsel %vm279_vm0, %v4538_v63, %v8465_v5  ;;  %v8466_v20 = vld [vmem:[#allocation41_spill] sm:$0xff]  ;;  %v4540_v0 = vld [vmem:[#allocation2 + $0x138] sm:$0xff] }
 0x330   : > { %v1775_v60 = vsel %vm279_vm0, %v4539_v17, %v8466_v20  ;;  %v8479_v11 = vld [vmem:[#allocation87_spill] sm:$0xff]  ;;  %v8489_v63 = vld [vmem:[#allocation81_spill] sm:$0xff]  ;;  %v8490_v17 = vld [vmem:[#allocation150_spill] sm:$0xff] }
 0x332   : > { %4427 = vmatmul.msk.f32.gmra.mxu0 %vm2018_vm11, %v1992_v57  ;;  %4437 = vmatmul.msk.f32.gmra.mxu2 %vm2018_vm11, %v2002_v42  ;;  %v1928_v57 = vsel %vm1914_vm8, %v1895_v55, %v8448_v41  ;;  %v8449_v42 = vld [vmem:[#allocation147_spill] sm:$0xff]  ;;  %v8470_v41 = vld [vmem:[#allocation100_spill] sm:$0xff]  ;;  %v1705_v28 = vpop.permute.xlu0 %1704 }
 0x333   : > { %v1938_v26 = vsel %vm1914_vm8, %v1905_v3, %v8449_v42  ;;  %v1961_v59 = vsel %vm1947_vm10, %v1928_v57, %v8451_v9  ;;  %v8469_v3 = vld [vmem:[#allocation99_spill] sm:$0xff]  ;;  %v8471_v42 = vld [vmem:[#allocation117_spill] sm:$0xff] }
 0x334   : > { %v1971_v46 = vsel %vm1947_vm10, %v1938_v26, %v8450_v61  ;;  %v1994_v22 = vsel %vm1980_vm9, %v1961_v59, %v6030_v23  ;;  %v8454_v23 = vld [vmem:[#allocation74_spill] sm:$0xff]  ;;  %v8472_v61 = vld [vmem:[#allocation39_spill] sm:$0xff]  ;;  %v8473_v9 = vld [vmem:[#allocation61_spill] sm:$0xff] }
 0x335   : > { %v2004_v13 = vsel %vm1980_vm9, %v1971_v46, %v1701_v2  ;;  %v1807_v35 = vsel %vm1782_vm4, %v1774_v58, %v8454_v23  ;;  %v8477_v23 = vld [vmem:[#allocation162_spill] sm:$0xff] }
 0x336   : > { %v1840_v30 = vsel %vm1815_vm5, %v1807_v35, %v8457_v53  ;;  %v8478_v53 = vld [vmem:[#allocation26_spill] sm:$0xff] }
 0x337   : > { %v1873_v36 = vsel %vm1848_vm7, %v1840_v30, %v8459_v40  ;;  %v1776_v30 = vsel %vm279_vm0, %v4540_v0, %v8478_v53  ;;  %v8500_v53 = vld [vmem:[#allocation89_spill] sm:$0xff] }
 0x338   : > { %v1906_v7 = vsel %vm1881_vm6, %v1873_v36, %v8460_v56  ;;  %v8480_v36 = vld [vmem:[#allocation107_spill] sm:$0xff] }
 0x339   : > { %v1939_v32 = vsel %vm1914_vm8, %v1906_v7, %v8463_v52  ;;  %v8482_v56 = vld [vmem:[#allocation127_spill] sm:$0xff]  ;;  %v8485_v52 = vld [vmem:[#allocation42_spill] sm:$0xff] }
 0x33a   : > { %4428 = vmatmul.msk.f32.gmra.mxu0 %vm2018_vm11, %v1993_v38  ;;  %4438 = vmatmul.msk.f32.gmra.mxu2 %vm2018_vm11, %v2003_v31  ;;  %v1896_v38 = vsel %vm1881_vm6, %v1863_v50, %v8461_v47  ;;  %v1703_v31 = vpop.permute.xlu2 %1702  ;;  %v1972_v27 = vsel %vm1947_vm10, %v1939_v32, %v5929_v49  ;;  %v8467_v49 = vld [vmem:[#allocation58_spill] sm:$0xff]  ;;  %v1809_v50 = vsel %vm1782_vm4, %v1776_v30, %v8479_v11  ;;  %v1707_v47 = vpop.permute.xlu1 %1706  ;;  %v8501_v11 = vld [vmem:[#allocation109_spill] sm:$0xff] }
 0x33b   : > { %v1929_v51 = vsel %vm1914_vm8, %v1896_v38, %v8462_v33  ;;  %v2005_v48 = vsel %vm1980_vm9, %v1972_v27, %v1703_v31  ;;  %v1798_v55 = vsel %vm1782_vm4, %v1765_v25, %v8467_v49  ;;  %v8483_v38 = vld [vmem:[#allocation149_spill] sm:$0xff]  ;;  %v8487_v27 = vld [vmem:[#allocation108_spill] sm:$0xff] }
 0x33c   : > { %v1962_v45 = vsel %vm1947_vm10, %v1929_v51, %v8464_v15  ;;  %v1831_v57 = vsel %vm1815_vm5, %v1798_v55, %v8470_v41  ;;  %v4541_v51 = vld [vmem:[#allocation2 + $0x140] sm:$0xff]  ;;  %v8486_v15 = vld [vmem:[#allocation78_spill] sm:$0xff] }
 0x33d   : > { %v1995_v39 = vsel %vm1980_vm9, %v1962_v45, %v6060_v43  ;;  %v1808_v43 = vsel %vm1782_vm4, %v1775_v60, %v8468_v8  ;;  %v1864_v26 = vsel %vm1848_vm7, %v1831_v57, %v8471_v42  ;;  %v1777_v32 = vsel %vm279_vm0, %v4541_v51, %v8485_v52  ;;  %v8493_v57 = vld [vmem:[#allocation88_spill] sm:$0xff] }
 0x33e   : > { %v1841_v2 = vsel %vm1815_vm5, %v1808_v43, %v8469_v3  ;;  %v1897_v59 = vsel %vm1881_vm6, %v1864_v26, %v8473_v9  ;;  %v1810_v45 = vsel %vm1782_vm4, %v1777_v32, %v8486_v15  ;;  %v4542_v43 = vld [vmem:[#allocation2 + $0x150] sm:$0xff]  ;;  %v8494_v26 = vld [vmem:[#allocation101_spill] sm:$0xff]  ;;  %v8495_v9 = vld [vmem:[#allocation44_spill] sm:$0xff] }
 0x33f   : > { %v1874_v46 = vsel %vm1848_vm7, %v1841_v2, %v8472_v61  ;;  %v1930_v58 = vsel %vm1914_vm8, %v1897_v59, %v8476_v4  ;;  %v8492_v3 = vld [vmem:[#allocation46_spill] sm:$0xff]  ;;  %v8498_v4 = vld [vmem:[#allocation35_spill] sm:$0xff]  ;;  %v4544_v32 = vld [vmem:[#allocation2 + $0x168] sm:$0xff] }
 0x340   : > { %v1963_v35 = vsel %vm1947_vm10, %v1930_v58, %v8477_v23  ;;  %v1778_v2 = vsel %vm279_vm0, %v4542_v43, %v8492_v3  ;;  %v8506_v15 = vld [vmem:[#allocation47_spill] sm:$0xff]  ;;  %v8512_v3 = vld [vmem:[#allocation166_spill] sm:$0xff] }
 0x341   : > { %v1996_v44 = vsel %vm1980_vm9, %v1963_v35, %v6082_v14  ;;  %v8481_v14 = vld [vmem:[#allocation30_spill] sm:$0xff]  ;;  %v1811_v42 = vsel %vm1782_vm4, %v1778_v2, %v8493_v57 }
 0x342   : > { %4429 = vmatmul.msk.f32.gmra.mxu0 %vm2018_vm11, %v1994_v22  ;;  %4439 = vmatmul.msk.f32.gmra.mxu2 %vm2018_vm11, %v2004_v13  ;;  %v8474_v22 = vld [vmem:[#allocation126_spill] sm:$0xff]  ;;  %v1709_v25 = vpop.permute.xlu2 %1708  ;;  %v1844_v61 = vsel %vm1815_vm5, %v1811_v42, %v8494_v26  ;;  %v8513_v26 = vld [vmem:[#allocation51_spill] sm:$0xff] }
 0x343   : > { %v1907_v13 = vsel %vm1881_vm6, %v1874_v46, %v8474_v22  ;;  %v1877_v59 = vsel %vm1848_vm7, %v1844_v61, %v8495_v9  ;;  %v8496_v22 = vld [vmem:[#allocation128_spill] sm:$0xff]  ;;  %v4545_v42 = vld [vmem:[#allocation2 + $0x170] sm:$0xff] }
 0x344   : > { %v1940_v1 = vsel %vm1914_vm8, %v1907_v13, %v8475_v29  ;;  %v1910_v13 = vsel %vm1881_vm6, %v1877_v59, %v8496_v22  ;;  %v1781_v61 = vsel %vm279_vm0, %v4545_v42, %v8513_v26  ;;  %v8514_v9 = vld [vmem:[#allocation90_spill] sm:$0xff]  ;;  %v8515_v22 = vld [vmem:[#allocation103_spill] sm:$0xff] }
 0x345   : > { %v2136_v19 = vpop.f32.mrf.mxu0  ;;  %v1973_v62 = vsel %vm1947_vm10, %v1940_v1, %v5932_v12  ;;  %v1842_v12 = vsel %vm1815_vm5, %v1809_v50, %v8480_v36  ;;  %v1943_v29 = vsel %vm1914_vm8, %v1910_v13, %v8497_v16  ;;  %v1814_v59 = vsel %vm1782_vm4, %v1781_v61, %v8514_v9  ;;  %v8516_v16 = vld [vmem:[#allocation53_spill] sm:$0xff] }
 0x346   : > { %v2235_v21 = vmul.f32 %v6310_v54, %v2136_v19  ;;  %v2006_v37 = vsel %vm1980_vm9, %v1973_v62, %v1705_v28  ;;  %v1875_v19 = vsel %vm1848_vm7, %v1842_v12, %v8481_v14  ;;  %v1711_v28 = vpop.permute.xlu0 %1710  ;;  %v1976_v58 = vsel %vm1947_vm10, %v1943_v29, %v8498_v4  ;;  %v4543_v62 = vld [vmem:[#allocation2 + $0x158] sm:$0xff]  ;;  %v8502_v12 = vld [vmem:[#allocation29_spill] sm:$0xff]  ;;  %v8517_v4 = vld [vmem:[#allocation130_spill] sm:$0xff] }
 0x347   : > { %v1908_v7 = vsel %vm1881_vm6, %v1875_v19, %v8482_v56  ;;  %v2009_v35 = vsel %vm1980_vm9, %v1976_v58, %v1711_v28  ;;  %v8503_v56 = vld [vmem:[#allocation129_spill] sm:$0xff]  ;;  %v1847_v13 = vsel %vm1815_vm5, %v1814_v59, %v8515_v22 }
 0x348   : > { %v2270_v18 = vadd.f32 %v6323_v10, %v2235_v21  ;;  %v1941_v31 = vsel %vm1914_vm8, %v1908_v7, %v8483_v38  ;;  %v8484_v21 = vld [vmem:[#allocation163_spill] sm:$0xff]  ;;  %v1880_v29 = vsel %vm1848_vm7, %v1847_v13, %v8516_v16 }
 0x349   : > { %v1974_v34 = vsel %vm1947_vm10, %v1941_v31, %v8484_v21  ;;  %v8504_v38 = vld [vmem:[#allocation151_spill] sm:$0xff]  ;;  %v1913_v58 = vsel %vm1881_vm6, %v1880_v29, %v8517_v4 }
 0x34a   : > { %v2302_v24 = vmax.f32 %v2270_v18, 0.0  ;;  %4430 = vmatmul.msk.f32.gmra.mxu0 %vm2018_vm11, %v1995_v39  ;;  %4440 = vmatmul.msk.f32.gmra.mxu2 %vm2018_vm11, %v2005_v48  ;;  %v2007_v33 = vsel %vm1980_vm9, %v1974_v34, %v1707_v47  ;;  %v1843_v18 = vsel %vm1815_vm5, %v1810_v45, %v8487_v27  ;;  %v8488_v39 = vld [vmem:[#allocation43_spill] sm:$0xff]  ;;  %v1713_v47 = vpop.permute.xlu1 %1712  ;;  %v8505_v34 = vld [vmem:[#allocation165_spill] sm:$0xff]  ;;  %v1780_v45 = vsel %vm279_vm0, %v4544_v32, %v8506_v15 }
 0x34b   : > { %v1876_v48 = vsel %vm1848_vm7, %v1843_v18, %v8488_v39  ;;  %v8507_v18 = vld [vmem:[#allocation82_spill] sm:$0xff] }
 0x34c   : > { %2335 = vst.msk [vmem:[#allocation3 + $0x19] sm:$0xff] %vm279_vm0, %v2302_v24  ;;  %v1909_v5 = vsel %vm1881_vm6, %v1876_v48, %v8489_v63  ;;  %v8491_v24 = vld [vmem:[#allocation7_spill] sm:$0xff]  ;;  %v1813_v39 = vsel %vm1782_vm4, %v1780_v45, %v8507_v18  ;;  %v8508_v48 = vld [vmem:[#allocation110_spill] sm:$0xff] }
 0x34d   : > { %v1942_v20 = vsel %vm1914_vm8, %v1909_v5, %v8490_v17  ;;  %v1846_v63 = vsel %vm1815_vm5, %v1813_v39, %v8508_v48 }
 0x34e   : > { %v1975_v49 = vsel %vm1947_vm10, %v1942_v20, %v8491_v24 }
 0x34f   : > { %v2008_v8 = vsel %vm1980_vm9, %v1975_v49, %v1709_v25  ;;  %v8509_v25 = vld [vmem:[#allocation48_spill] sm:$0xff]  ;;  %v1715_v49 = vpop.permute.xlu2 %1714 }
 0x350   : > { %v1879_v17 = vsel %vm1848_vm7, %v1846_v63, %v8509_v25 }
 0x352   : > { %4431 = vmatmul.msk.f32.gmra.mxu0 %vm2018_vm11, %v1996_v44  ;;  %4441 = vmatmul.msk.f32.gmra.mxu2 %vm2018_vm11, %v2006_v37  ;;  %v8499_v44 = vld [vmem:[#allocation32_spill] sm:$0xff] }
 0x353   : > { %v6388_v40 = vld [vmem:[#allocation3 + $0x19] sm:$0xff]  ;;  %v1779_v37 = vsel %vm279_vm0, %v4543_v62, %v8499_v44 }
 0x354   : > { %2692 = vrot.lane.b32.xlu0 %v6388_v40, %s4567_s30  ;;  %v1812_v30 = vsel %vm1782_vm4, %v1779_v37, %v8500_v53 }
 0x355   : > { %v1845_v50 = vsel %vm1815_vm5, %v1812_v30, %v8501_v11 }
 0x356   : > { %v1878_v14 = vsel %vm1848_vm7, %v1845_v50, %v8502_v12 }
 0x357   : > { %v1911_v7 = vsel %vm1881_vm6, %v1878_v14, %v8503_v56 }
 0x358   : > { %v1944_v31 = vsel %vm1914_vm8, %v1911_v7, %v8504_v38 }
 0x35a   : > { %4442 = vmatmul.msk.f32.gmra.mxu2 %vm2018_vm11, %v2007_v33  ;;  %v1977_v33 = vsel %vm1947_vm10, %v1944_v31, %v8505_v34 }
 0x35b   : > { %v2010_v52 = vsel %vm1980_vm9, %v1977_v33, %v1713_v47 }
 0x35f   : > { %v2139_v60 = vpop.f32.mrf.mxu0 }
 0x360   : > { %v2236_v55 = vmul.f32 %v6310_v54, %v2139_v60  ;;  %v8510_v60 = vld [vmem:[#allocation122_spill] sm:$0xff] }
 0x361   : > { %v1912_v24 = vsel %vm1881_vm6, %v1879_v17, %v8510_v60 }
 0x362   : > { %v2271_v41 = vadd.f32 %v6323_v10, %v2236_v55  ;;  %4443 = vmatmul.msk.f32.gmra.mxu2 %vm2018_vm11, %v2008_v8  ;;  %v8511_v55 = vld [vmem:[#allocation153_spill] sm:$0xff] }
 0x363   : > { %v1945_v8 = vsel %vm1914_vm8, %v1912_v24, %v8511_v55 }
 0x364   : > { %v2303_v46 = vmax.f32 %v2271_v41, 0.0  ;;  %v1978_v2 = vsel %vm1947_vm10, %v1945_v8, %v8512_v3 }
 0x365   : > { %v2011_v57 = vsel %vm1980_vm9, %v1978_v2, %v1715_v49 }
 0x366   : > { %2336 = vst.msk [vmem:[#allocation3 + $0x21] sm:$0xff] %vm279_vm0, %v2303_v46 }
 0x367   : > { %v2142_v1 = vpop.f32.mrf.mxu0 }
 0x368   : > { %v2237_v23 = vmul.f32 %v6310_v54, %v2142_v1 }
 0x36a   : > { %v2272_v0 = vadd.f32 %v6323_v10, %v2237_v23  ;;  %4444 = vmatmul.msk.f32.gmra.mxu2 %vm2018_vm11, %v2009_v35  ;;  %v1717_v23 = vpop.permute.xlu0 %1716  ;;  %v8518_v35 = vld [vmem:[#allocation145_spill] sm:$0xff] }
 0x36b   : > { %v1946_v62 = vsel %vm1914_vm8, %v1913_v58, %v8518_v35 }
 0x36c   : > { %v2304_v36 = vmax.f32 %v2272_v0, 0.0  ;;  %v1979_v37 = vsel %vm1947_vm10, %v1946_v62, %v5952_v6 }
 0x36d   : > { %v6449_v19 = vld [vmem:[#allocation3 + $0x21] sm:$0xff]  ;;  %v2012_v53 = vsel %vm1980_vm9, %v1979_v37, %v1717_v23 }
 0x36e   : > { %2337 = vst.msk [vmem:[#allocation3 + $0x31] sm:$0xff] %vm279_vm0, %v2304_v36  ;;  %2694 = vrot.lane.b32.xlu1 %v6449_v19, %s4567_s30 }
 0x36f   : > { %v2145_v21 = vpop.f32.mrf.mxu0 }
 0x370   : > { %v2238_v51 = vmul.f32 %v6310_v54, %v2145_v21 }
 0x372   : > { %v2273_v27 = vadd.f32 %v6323_v10, %v2238_v51  ;;  %4445 = vmatmul.msk.f32.gmra.mxu2 %vm2018_vm11, %v2010_v52 }
 0x374   : > { %v2305_v5 = vmax.f32 %v2273_v27, 0.0 }
 0x375   : > { %v6472_v20 = vld [vmem:[#allocation3 + $0x31] sm:$0xff] }
 0x376   : > { %2338 = vst.msk [vmem:[#allocation3 + $0x39] sm:$0xff] %vm279_vm0, %v2305_v5  ;;  %2696 = vrot.lane.b32.xlu2 %v6472_v20, %s4567_s30 }
 0x377   : > { %v2148_v43 = vpop.f32.mrf.mxu0 }
 0x378   : > { %v2239_v41 = vmul.f32 %v6310_v54, %v2148_v43 }
 0x37a   : > { %v2274_v46 = vadd.f32 %v6323_v10, %v2239_v41  ;;  %4446 = vmatmul.msk.f32.gmra.mxu2 %vm2018_vm11, %v2011_v57 }
 0x37c   : > { %v2306_v28 = vmax.f32 %v2274_v46, 0.0 }
 0x37d   : > { %v6495_v1 = vld [vmem:[#allocation3 + $0x39] sm:$0xff] }
 0x37e   : > { %2339 = vst.msk [vmem:[#allocation3 + $0x49] sm:$0xff] %vm279_vm0, %v2306_v28  ;;  %2698 = vrot.lane.b32.xlu0 %v6495_v1, %s4567_s30 }
 0x37f   : > { %v2151_v44 = vpop.f32.mrf.mxu0 }
 0x380   : > { %v2240_v0 = vmul.f32 %v6310_v54, %v2151_v44 }
 0x382   : > { %v2275_v30 = vadd.f32 %v6323_v10, %v2240_v0  ;;  %4447 = vmatmul.msk.f32.gmra.mxu2 %vm2018_vm11, %v2012_v53 }
 0x384   : > { %v2307_v11 = vmax.f32 %v2275_v30, 0.0 }
 0x385   : > { %v6510_v50 = vld [vmem:[#allocation3 + $0x49] sm:$0xff] }
 0x386   : > { %2340 = vst.msk [vmem:[#allocation3 + $0x51] sm:$0xff] %vm279_vm0, %v2307_v11  ;;  %2700 = vrot.lane.b32.xlu1 %v6510_v50, %s4567_s30 }
 0x387   : > { %v2154_v36 = vpop.f32.mrf.mxu0 }
 0x388   : > { %v2241_v12 = vmul.f32 %v6310_v54, %v2154_v36 }
 0x38a   : > { %v2276_v6 = vadd.f32 %v6323_v10, %v2241_v12 }
 0x38c   : > { %v2308_v14 = vmax.f32 %v2276_v6, 0.0 }
 0x38d   : > { %v2184_v56 = vpop.f32.mrf.mxu2  ;;  %v6517_v7 = vld [vmem:[#allocation3 + $0x51] sm:$0xff] }
 0x38e   : > { %2341 = vst.msk [vmem:[#allocation3 + $0x61] sm:$0xff] %vm279_vm0, %v2308_v14  ;;  %v2251_v47 = vmul.f32 %v6310_v54, %v2184_v56  ;;  %2702 = vrot.lane.b32.xlu2 %v6517_v7, %s4567_s30 }
 0x38f   : > { %v2157_v38 = vpop.f32.mrf.mxu0 }
 0x390   : > { %v2286_v31 = vadd.f32 %v6323_v10, %v2251_v47  ;;  %v2242_v21 = vmul.f32 %v6310_v54, %v2157_v38 }
 0x392   : > { %v2318_v34 = vmax.f32 %v2286_v31, 0.0  ;;  %v2277_v33 = vadd.f32 %v6323_v10, %v2242_v21 }
 0x394   : > { %2351 = vst.msk [vmem:[#allocation3 + $0xd9] sm:$0xff] %vm279_vm0, %v2318_v34  ;;  %v2309_v51 = vmax.f32 %v2277_v33, 0.0 }
 0x395   : > { %v2187_v52 = vpop.f32.mrf.mxu2  ;;  %v6527_v32 = vld [vmem:[#allocation3 + $0x61] sm:$0xff] }
 0x396   : > { %2342 = vst.msk [vmem:[#allocation3 + $0x69] sm:$0xff] %vm279_vm0, %v2309_v51  ;;  %v2252_v15 = vmul.f32 %v6310_v54, %v2187_v52  ;;  %2704 = vrot.lane.b32.xlu0 %v6527_v32, %s4567_s30 }
 0x397   : > { %v2160_v45 = vpop.f32.mrf.mxu0 }
 0x398   : > { %v2287_v27 = vadd.f32 %v6323_v10, %v2252_v15  ;;  %v2243_v18 = vmul.f32 %v6310_v54, %v2160_v45 }
 0x39a   : > { %v2319_v39 = vmax.f32 %v2287_v27, 0.0  ;;  %v2278_v48 = vadd.f32 %v6323_v10, %v2243_v18 }
 0x39c   : > { %2352 = vst.msk [vmem:[#allocation3 + $0xe1] sm:$0xff] %vm279_vm0, %v2319_v39  ;;  %v2310_v63 = vmax.f32 %v2278_v48, 0.0 }
 0x39d   : > { %v2190_v5 = vpop.f32.mrf.mxu2  ;;  %v6537_v25 = vld [vmem:[#allocation3 + $0x69] sm:$0xff] }
 0x39e   : > { %2343 = vst.msk [vmem:[#allocation3 + $0x79] sm:$0xff] %vm279_vm0, %v2310_v63  ;;  %v2253_v17 = vmul.f32 %v6310_v54, %v2190_v5  ;;  %2706 = vrot.lane.b32.xlu1 %v6537_v25, %s4567_s30 }
 0x39f   : > { %v2163_v60 = vpop.f32.mrf.mxu0 }
 0x3a0   : > { %v2288_v24 = vadd.f32 %v6323_v10, %v2253_v17  ;;  %v2244_v49 = vmul.f32 %v6310_v54, %v2163_v60 }
 0x3a2   : > { %v2320_v55 = vmax.f32 %v2288_v24, 0.0  ;;  %v2279_v8 = vadd.f32 %v6323_v10, %v2244_v49 }
 0x3a4   : > { %2353 = vst.msk [vmem:[#allocation3 + $0xf1] sm:$0xff] %vm279_vm0, %v2320_v55  ;;  %v2311_v43 = vmax.f32 %v2279_v8, 0.0 }
 0x3a5   : > { %v2193_v3 = vpop.f32.mrf.mxu2  ;;  %v6547_v2 = vld [vmem:[#allocation3 + $0x79] sm:$0xff] }
 0x3a6   : > { %2344 = vst.msk [vmem:[#allocation3 + $0x81] sm:$0xff] %vm279_vm0, %v2311_v43  ;;  %v2254_v41 = vmul.f32 %v6310_v54, %v2193_v3  ;;  %2708 = vrot.lane.b32.xlu2 %v6547_v2, %s4567_s30 }
 0x3a7   : > { %v2166_v57 = vpop.f32.mrf.mxu0 }
 0x3a8   : > { %v2289_v42 = vadd.f32 %v6323_v10, %v2254_v41  ;;  %v2245_v26 = vmul.f32 %v6310_v54, %v2166_v57  ;;  %v6607_v41 = vld [vmem:[#allocation3 + $0xd9] sm:$0xff] }
 0x3aa   : > { %v2321_v61 = vmax.f32 %v2289_v42, 0.0  ;;  %v2280_v46 = vadd.f32 %v6323_v10, %v2245_v26 }
 0x3ac   : > { %2354 = vst.msk [vmem:[#allocation3 + $0xf9] sm:$0xff] %vm279_vm0, %v2321_v61  ;;  %v2312_v9 = vmax.f32 %v2280_v46, 0.0 }
 0x3ad   : > { %v2196_v59 = vpop.f32.mrf.mxu2  ;;  %v6557_v22 = vld [vmem:[#allocation3 + $0x81] sm:$0xff] }
 0x3ae   : > { %2345 = vst.msk [vmem:[#allocation3 + $0x91] sm:$0xff] %vm279_vm0, %v2312_v9  ;;  %v2255_v13 = vmul.f32 %v6310_v54, %v2196_v59  ;;  %2710 = vrot.lane.b32.xlu0 %v6557_v22, %s4567_s30  ;;  %v6621_v59 = vld [vmem:[#allocation3 + $0xe1] sm:$0xff] }
 0x3af   : > { %v2169_v28 = vpop.f32.mrf.mxu0 }
 0x3b0   : > { %v2290_v16 = vadd.f32 %v6323_v10, %v2255_v13  ;;  %v2246_v29 = vmul.f32 %v6310_v54, %v2169_v28 }
 0x3b2   : > { %v2322_v4 = vmax.f32 %v2290_v16, 0.0  ;;  %v2281_v58 = vadd.f32 %v6323_v10, %v2246_v29 }
 0x3b3   : > { %v6619_v9 = vld [vmem:[#allocation3 + $0xf9] sm:$0xff] }
 0x3b4   : > { %2355 = vst.msk [vmem:[#allocation3 + $0x109] sm:$0xff] %vm279_vm0, %v2322_v4  ;;  %v2313_v23 = vmax.f32 %v2281_v58, 0.0 }
 0x3b5   : > { %v2199_v35 = vpop.f32.mrf.mxu2  ;;  %v6567_v62 = vld [vmem:[#allocation3 + $0x91] sm:$0xff] }
 0x3b6   : > { %2346 = vst.msk [vmem:[#allocation3 + $0x99] sm:$0xff] %vm279_vm0, %v2313_v23  ;;  %v2256_v44 = vmul.f32 %v6310_v54, %v2199_v35  ;;  %2712 = vrot.lane.b32.xlu1 %v6567_v62, %s4567_s30 }
 0x3b7   : > { %v2172_v37 = vpop.f32.mrf.mxu0 }
 0x3b8   : > { %v2291_v0 = vadd.f32 %v6323_v10, %v2256_v44  ;;  %v2247_v53 = vmul.f32 %v6310_v54, %v2172_v37  ;;  %v6643_v44 = vld [vmem:[#allocation3 + $0xf1] sm:$0xff] }
 0x3ba   : > { %v2323_v30 = vmax.f32 %v2291_v0, 0.0  ;;  %v2282_v11 = vadd.f32 %v6323_v10, %v2247_v53 }
 0x3bb   : > { %v6636_v23 = vld [vmem:[#allocation3 + $0x109] sm:$0xff] }
 0x3bc   : > { %2356 = vst.msk [vmem:[#allocation3 + $0x111] sm:$0xff] %vm279_vm0, %v2323_v30  ;;  %v2314_v36 = vmax.f32 %v2282_v11, 0.0 }
 0x3bd   : > { %v2202_v12 = vpop.f32.mrf.mxu2  ;;  %v6577_v6 = vld [vmem:[#allocation3 + $0x99] sm:$0xff] }
 0x3be   : > { %2347 = vst.msk [vmem:[#allocation3 + $0xa9] sm:$0xff] %vm279_vm0, %v2314_v36  ;;  %v2257_v14 = vmul.f32 %v6310_v54, %v2202_v12  ;;  %2714 = vrot.lane.b32.xlu2 %v6577_v6, %s4567_s30 }
 0x3bf   : > { %v2175_v56 = vpop.f32.mrf.mxu0 }
 0x3c0   : > { %v2292_v47 = vadd.f32 %v6323_v10, %v2257_v14  ;;  %v2248_v38 = vmul.f32 %v6310_v54, %v2175_v56 }
 0x3c2   : > { %v2324_v31 = vmax.f32 %v2292_v47, 0.0  ;;  %v2283_v21 = vadd.f32 %v6323_v10, %v2248_v38 }
 0x3c3   : > { %v6658_v12 = vld [vmem:[#allocation3 + $0x111] sm:$0xff] }
 0x3c4   : > { %2357 = vst.msk [vmem:[#allocation3 + $0x121] sm:$0xff] %vm279_vm0, %v2324_v31  ;;  %v2315_v34 = vmax.f32 %v2283_v21, 0.0 }
 0x3c5   : > { %v2205_v33 = vpop.f32.mrf.mxu2  ;;  %v6587_v51 = vld [vmem:[#allocation3 + $0xa9] sm:$0xff] }
 0x3c6   : > { %2348 = vst.msk [vmem:[#allocation3 + $0xb1] sm:$0xff] %vm279_vm0, %v2315_v34  ;;  %v2258_v52 = vmul.f32 %v6310_v54, %v2205_v33  ;;  %2716 = vrot.lane.b32.xlu0 %v6587_v51, %s4567_s30 }
 0x3c7   : > { %v2178_v15 = vpop.f32.mrf.mxu0 }
 0x3c8   : > { %v2293_v45 = vadd.f32 %v6323_v10, %v2258_v52  ;;  %v2249_v27 = vmul.f32 %v6310_v54, %v2178_v15 }
 0x3ca   : > { %v2325_v18 = vmax.f32 %v2293_v45, 0.0  ;;  %v2284_v39 = vadd.f32 %v6323_v10, %v2249_v27 }
 0x3cb   : > { %v6634_v58 = vld [vmem:[#allocation3 + $0x121] sm:$0xff] }
 0x3cc   : > { %2358 = vst.msk [vmem:[#allocation3 + $0x129] sm:$0xff] %vm279_vm0, %v2325_v18  ;;  %v2316_v48 = vmax.f32 %v2284_v39, 0.0  ;;  %v2432_v39 = vld [vmem:[#allocation3 + $0xa] sm:$0xff] }
 0x3cd   : > { %v2208_v63 = vpop.f32.mrf.mxu2  ;;  %v6597_v5 = vld [vmem:[#allocation3 + $0xb1] sm:$0xff] }
 0x3ce   : > { %2349 = vst.msk [vmem:[#allocation3 + $0xc1] sm:$0xff] %vm279_vm0, %v2316_v48  ;;  %v2259_v17 = vmul.f32 %v6310_v54, %v2208_v63  ;;  %2718 = vrot.lane.b32.xlu1 %v6597_v5, %s4567_s30 }
 0x3cf   : > { %v2181_v60 = vpop.f32.mrf.mxu0 }
 0x3d0   : > { %v2294_v24 = vadd.f32 %v6323_v10, %v2259_v17  ;;  %v2250_v49 = vmul.f32 %v6310_v54, %v2181_v60  ;;  %v2431_v17 = vld [vmem:[#allocation3 + $0x2] sm:$0xff] }
 0x3d2   : > { %v2326_v55 = vmax.f32 %v2294_v24, 0.0  ;;  %v2285_v8 = vadd.f32 %v6323_v10, %v2250_v49  ;;  %v6691_v24 = vpop.permute.xlu2 %2690 }
 0x3d3   : > { %v6651_v11 = vld [vmem:[#allocation3 + $0x129] sm:$0xff]  ;;  %8519 = vst [vmem:[#allocation10_spill] sm:$0xff] %v6691_v24 }
 0x3d4   : > { %2359 = vst.msk [vmem:[#allocation3 + $0x139] sm:$0xff] %vm279_vm0, %v2326_v55  ;;  %v2317_v43 = vmax.f32 %v2285_v8, 0.0 }
 0x3d5   : > { %v2211_v3 = vpop.f32.mrf.mxu2  ;;  %v6609_v57 = vld [vmem:[#allocation3 + $0xc1] sm:$0xff] }
 0x3d6   : > { %2350 = vst.msk [vmem:[#allocation3 + $0xc9] sm:$0xff] %vm279_vm0, %v2317_v43  ;;  %v2260_v42 = vmul.f32 %v6310_v54, %v2211_v3  ;;  %2724 = vrot.lane.b32.xlu1 %v6607_v41, %s4567_s30  ;;  %2720 = vrot.lane.b32.xlu2 %v6609_v57, %s4567_s30  ;;  %v6696_v43 = vld [vmem:[#allocation3 + $0x32] sm:$0xff]  ;;  %v6698_v3 = vld [vmem:[#allocation3 + $0x1a] sm:$0xff] }
 0x3d8   : > { %v2295_v26 = vadd.f32 %v6323_v10, %v2260_v42  ;;  %v6705_v42 = vld [vmem:[#allocation3 + $0x22] sm:$0xff] }
 0x3da   : > { %v2327_v61 = vmax.f32 %v2295_v26, 0.0  ;;  %v6713_v26 = vld [vmem:[#allocation3 + $0x3a] sm:$0xff] }
 0x3db   : > { %v6669_v21 = vld [vmem:[#allocation3 + $0x139] sm:$0xff] }
 0x3dc   : > { %2360 = vst.msk [vmem:[#allocation3 + $0x141] sm:$0xff] %vm279_vm0, %v2327_v61  ;;  %v6719_v61 = vpop.permute.xlu1 %2688 }
 0x3dd   : > { %v2214_v46 = vpop.f32.mrf.mxu2  ;;  %v6623_v13 = vld [vmem:[#allocation3 + $0xc9] sm:$0xff]  ;;  %8521 = vst [vmem:[#allocation9_spill] sm:$0xff] %v6719_v61 }
 0x3de   : > { %v2261_v28 = vmul.f32 %v6310_v54, %v2214_v46  ;;  %2730 = vrot.lane.b32.xlu1 %v6619_v9, %s4567_s30  ;;  %2726 = vrot.lane.b32.xlu2 %v6621_v59, %s4567_s30  ;;  %v6721_v46 = vld [vmem:[#allocation3 + $0x4a] sm:$0xff] }
 0x3df   : > { %2722 = vrot.lane.b32.xlu0 %v6623_v13, %s4567_s30 }
 0x3e0   : > { %v2296_v16 = vadd.f32 %v6323_v10, %v2261_v28 }
 0x3e2   : > { %v2328_v29 = vmax.f32 %v2296_v16, 0.0  ;;  %v6727_v16 = vld [vmem:[#allocation3 + $0x7a] sm:$0xff] }
 0x3e3   : > { %v6649_v30 = vld [vmem:[#allocation3 + $0x141] sm:$0xff] }
 0x3e4   : > { %2361 = vst.msk [vmem:[#allocation3 + $0x151] sm:$0xff] %vm279_vm0, %v2328_v29  ;;  %v6729_v29 = vld [vmem:[#allocation3 + $0x62] sm:$0xff] }
 0x3e5   : > { %v2217_v4 = vpop.f32.mrf.mxu2 }
 0x3e6   : > { %v2262_v35 = vmul.f32 %v6310_v54, %v2217_v4  ;;  %2736 = vrot.lane.b32.xlu1 %v6634_v58, %s4567_s30  ;;  %2732 = vrot.lane.b32.xlu2 %v6636_v23, %s4567_s30  ;;  %v6735_v4 = vld [vmem:[#allocation3 + $0x6a] sm:$0xff] }
 0x3e7   : > { %2728 = vrot.lane.b32.xlu0 %v6643_v44, %s4567_s30 }
 0x3e8   : > { %v2297_v37 = vadd.f32 %v6323_v10, %v2262_v35  ;;  %v6739_v35 = vpop.permute.xlu1 %2694 }
 0x3e9   : > { %8523 = vst [vmem:[#allocation12_spill] sm:$0xff] %v6739_v35 }
 0x3ea   : > { %v2329_v0 = vmax.f32 %v2297_v37, 0.0 }
 0x3eb   : > { %v6664_v38 = vld [vmem:[#allocation3 + $0x151] sm:$0xff] }
 0x3ec   : > { %2362 = vst.msk [vmem:[#allocation3 + $0x159] sm:$0xff] %vm279_vm0, %v2329_v0  ;;  %v6743_v0 = vld [vmem:[#allocation3 + $0x9a] sm:$0xff] }
 0x3ed   : > { %v2220_v53 = vpop.f32.mrf.mxu2 }
 0x3ee   : > { %v2263_v36 = vmul.f32 %v6310_v54, %v2220_v53  ;;  %2742 = vrot.lane.b32.xlu1 %v6649_v30, %s4567_s30  ;;  %2738 = vrot.lane.b32.xlu2 %v6651_v11, %s4567_s30  ;;  %v6745_v53 = vld [vmem:[#allocation3 + $0x82] sm:$0xff] }
 0x3ef   : > { %2734 = vrot.lane.b32.xlu0 %v6658_v12, %s4567_s30 }
 0x3f0   : > { %v2298_v14 = vadd.f32 %v6323_v10, %v2263_v36  ;;  %v6751_v36 = vld [vmem:[#allocation3 + $0x92] sm:$0xff] }
 0x3f2   : > { %v2330_v56 = vmax.f32 %v2298_v14, 0.0 }
 0x3f3   : > { %v6680_v27 = vld [vmem:[#allocation3 + $0x159] sm:$0xff] }
 0x3f4   : > { %2363 = vst.msk [vmem:[#allocation3 + $0x169] sm:$0xff] %vm279_vm0, %v2330_v56  ;;  %v6833_v24 = vld [vmem:[#allocation3 + $0x152] sm:$0xff] }
 0x3f5   : > { %v2223_v47 = vpop.f32.mrf.mxu2  ;;  %8540 = vst [vmem:[#allocation64_spill] sm:$0xff] %v6833_v24 }
 0x3f6   : > { %v2264_v31 = vmul.f32 %v6310_v54, %v2223_v47  ;;  %2744 = vrot.lane.b32.xlu2 %v6664_v38, %s4567_s30  ;;  %v6759_v47 = vpop.permute.xlu0 %2692 }
 0x3f7   : > { %2740 = vrot.lane.b32.xlu0 %v6669_v21, %s4567_s30  ;;  %8527 = vst [vmem:[#allocation5_spill] sm:$0xff] %v6759_v47  ;;  %v6831_v47 = vld [vmem:[#allocation3 + $0x13a] sm:$0xff] }
 0x3f8   : > { %v2299_v34 = vadd.f32 %v6323_v10, %v2264_v31  ;;  %v6755_v14 = vpop.permute.xlu1 %2700  ;;  %v6761_v31 = vld [vmem:[#allocation3 + $0xaa] sm:$0xff]  ;;  %8539 = vst [vmem:[#allocation63_spill] sm:$0xff] %v6831_v47 }
 0x3f9   : > { %8525 = vst [vmem:[#allocation4_spill] sm:$0xff] %v6755_v14  ;;  %v6815_v14 = vld [vmem:[#allocation3 + $0x112] sm:$0xff] }
 0x3fa   : > { %v2331_v33 = vmax.f32 %v2299_v34, 0.0  ;;  %v6763_v34 = vld [vmem:[#allocation3 + $0xc2] sm:$0xff] }
 0x3fb   : > { %v6674_v52 = vld [vmem:[#allocation3 + $0x169] sm:$0xff] }
 0x3fc   : > { %2364 = vst.msk [vmem:[#allocation3 + $0x171] sm:$0xff] %vm279_vm0, %v2331_v33  ;;  %2748 = vrot.lane.b32.xlu1 %v6674_v52, %s4567_s30  ;;  %v6769_v33 = vld [vmem:[#allocation3 + $0xb2] sm:$0xff] }
 0x3fd   : > { %v2226_v15 = vpop.f32.mrf.mxu2 }
 0x3fe   : > { %v2265_v45 = vmul.f32 %v6310_v54, %v2226_v15 }
 0x3ff   : > { %2746 = vrot.lane.b32.xlu0 %v6680_v27, %s4567_s30 }
 0x400   : > { %v2300_v18 = vadd.f32 %v6323_v10, %v2265_v45 }
 0x402   : > { %v2332_v48 = vmax.f32 %v2300_v18, 0.0  ;;  %v6777_v18 = vpop.permute.xlu0 %2698 }
 0x403   : > { %v6685_v63 = vld [vmem:[#allocation3 + $0x171] sm:$0xff]  ;;  %8530 = vst [vmem:[#allocation27_spill] sm:$0xff] %v6777_v18 }
 0x404   : > { %2365 = vst.msk [vmem:[#allocation3 + $0x181] sm:$0xff] %vm279_vm0, %v2332_v48  ;;  %2818 = vrot.lane.b32.xlu1 %v2432_v39, %s4568_s8  ;;  %2750 = vrot.lane.b32.xlu2 %v6685_v63, %s4567_s30  ;;  %v6779_v39 = vld [vmem:[#allocation3 + $0xca] sm:$0xff]  ;;  %v6781_v48 = vld [vmem:[#allocation3 + $0xe2] sm:$0xff] }
 0x405   : > { %v2229_v60 = vpop.f32.mrf.mxu2  ;;  %v6817_v18 = vld [vmem:[#allocation3 + $0x12a] sm:$0xff] }
 0x406   : > { %v2266_v49 = vmul.f32 %v6310_v54, %v2229_v60  ;;  %v6709_v54 = vpop.permute.xlu2 %2696  ;;  %8536 = vst [vmem:[#allocation79_spill] sm:$0xff] %v6817_v18 }
 0x407   : > { %2816 = vrot.lane.b32.xlu0 %v2431_v17, %s4568_s8  ;;  %8520 = vst [vmem:[#allocation52_spill] sm:$0xff] %v6709_v54  ;;  %v6787_v17 = vld [vmem:[#allocation3 + $0xda] sm:$0xff]  ;;  %v6823_v54 = vld [vmem:[#allocation3 + $0x122] sm:$0xff] }
 0x408   : > { %v2301_v55 = vadd.f32 %v6323_v10, %v2266_v49  ;;  %v6711_v10 = vld [vmem:[#allocation3 + $0x52] sm:$0xff] }
 0x40a   : > { %v2333_v8 = vmax.f32 %v2301_v55, 0.0  ;;  %v6795_v55 = vpop.permute.xlu0 %2704 }
 0x40b   : > { %8533 = vst [vmem:[#allocation14_spill] sm:$0xff] %v6795_v55 }
 0x40c   : > { %2366 = vst.msk [vmem:[#allocation3 + $0x189] sm:$0xff] %vm279_vm0, %v2333_v8  ;;  %2824 = vrot.lane.b32.xlu1 %v6696_v43, %s4568_s8  ;;  %2820 = vrot.lane.b32.xlu2 %v6698_v3, %s4568_s8  ;;  %v6797_v8 = vld [vmem:[#allocation3 + $0xf2] sm:$0xff] }
 0x40e   : > { %v6725_v28 = vpop.permute.xlu2 %2702 }
 0x40f   : > { %2822 = vrot.lane.b32.xlu0 %v6705_v42, %s4568_s8  ;;  %8522 = vst [vmem:[#allocation55_spill] sm:$0xff] %v6725_v28 }
 0x410   : > { %v6773_v15 = vpop.permute.xlu1 %2706 }
 0x411   : > { %8528 = vst [vmem:[#allocation59_spill] sm:$0xff] %v6773_v15  ;;  %v6805_v15 = vld [vmem:[#allocation3 + $0xfa] sm:$0xff] }
 0x414   : > { %2830 = vrot.lane.b32.xlu1 %v6711_v10, %s4568_s8  ;;  %2826 = vrot.lane.b32.xlu2 %v6713_v26, %s4568_s8 }
 0x416   : > { %v6741_v37 = vpop.permute.xlu2 %2708 }
 0x417   : > { %2828 = vrot.lane.b32.xlu0 %v6721_v46, %s4568_s8  ;;  %8524 = vst [vmem:[#allocation40_spill] sm:$0xff] %v6741_v37  ;;  %v6799_v37 = vld [vmem:[#allocation3 + $0x10a] sm:$0xff] }
 0x41c   : > { %2836 = vrot.lane.b32.xlu1 %v6727_v16, %s4568_s8  ;;  %2832 = vrot.lane.b32.xlu2 %v6729_v29, %s4568_s8 }
 0x41e   : > { %v6757_v56 = vpop.permute.xlu2 %2714 }
 0x41f   : > { %2834 = vrot.lane.b32.xlu0 %v6735_v4, %s4568_s8  ;;  %8526 = vst [vmem:[#allocation56_spill] sm:$0xff] %v6757_v56  ;;  %v6849_v56 = vld [vmem:[#allocation3 + $0x15a] sm:$0xff] }
 0x420   : > { %v6811_v28 = vpop.permute.xlu0 %2710  ;;  %8545 = vst [vmem:[#allocation143_spill] sm:$0xff] %v6849_v56 }
 0x421   : > { %8534 = vst [vmem:[#allocation15_spill] sm:$0xff] %v6811_v28 }
 0x424   : > { %2842 = vrot.lane.b32.xlu1 %v6743_v0, %s4568_s8  ;;  %2838 = vrot.lane.b32.xlu2 %v6745_v53, %s4568_s8 }
 0x427   : > { %2840 = vrot.lane.b32.xlu0 %v6751_v36, %s4568_s8 }
 0x428   : > { %v6791_v60 = vpop.permute.xlu1 %2712 }
 0x429   : > { %8531 = vst [vmem:[#allocation45_spill] sm:$0xff] %v6791_v60 }
 0x42c   : > { %2844 = vrot.lane.b32.xlu2 %v6761_v31, %s4568_s8  ;;  %2848 = vrot.lane.b32.xlu1 %v6763_v34, %s4568_s8 }
 0x42f   : > { %2846 = vrot.lane.b32.xlu0 %v6769_v33, %s4568_s8 }
 0x430   : > { %v6775_v45 = vpop.permute.xlu2 %2720 }
 0x431   : > { %8529 = vst [vmem:[#allocation13_spill] sm:$0xff] %v6775_v45  ;;  %v6841_v45 = vld [vmem:[#allocation3 + $0x142] sm:$0xff] }
 0x432   : > { %8542 = vst [vmem:[#allocation62_spill] sm:$0xff] %v6841_v45 }
 0x434   : > { %2850 = vrot.lane.b32.xlu2 %v6779_v39, %s4568_s8  ;;  %2854 = vrot.lane.b32.xlu1 %v6781_v48, %s4568_s8 }
 0x437   : > { %2852 = vrot.lane.b32.xlu0 %v6787_v17, %s4568_s8 }
 0x438   : > { %v6793_v49 = vpop.permute.xlu2 %2726  ;;  %v6829_v28 = vpop.permute.xlu0 %2716 }
 0x439   : > { %8532 = vst [vmem:[#allocation76_spill] sm:$0xff] %v6793_v49 }
 0x43a   : > { %8538 = vst [vmem:[#allocation28_spill] sm:$0xff] %v6829_v28  ;;  %v2462_v28 = vld [vmem:[#allocation3 + $0x172] sm:$0xff] }
 0x43c   : > { %2856 = vrot.lane.b32.xlu2 %v6797_v8, %s4568_s8  ;;  %2860 = vrot.lane.b32.xlu1 %v6799_v37, %s4568_s8 }
 0x43f   : > { %2858 = vrot.lane.b32.xlu0 %v6805_v15, %s4568_s8 }
 0x440   : > { %v6809_v60 = vpop.permute.xlu1 %2718  ;;  %v6813_v55 = vpop.permute.xlu2 %2732 }
 0x441   : > { %8535 = vst [vmem:[#allocation60_spill] sm:$0xff] %v6813_v55 }
 0x444   : > { %2862 = vrot.lane.b32.xlu2 %v6815_v14, %s4568_s8  ;;  %2866 = vrot.lane.b32.xlu1 %v6817_v18, %s4568_s8 }
 0x447   : > { %2864 = vrot.lane.b32.xlu0 %v6823_v54, %s4568_s8 }
 0x448   : > { %v6827_v35 = vpop.permute.xlu1 %2724  ;;  %v6835_v61 = vpop.permute.xlu2 %2738 }
 0x449   : > { %8537 = vst [vmem:[#allocation6_spill] sm:$0xff] %v6827_v35 }
 0x44a   : > { %8541 = vst [vmem:[#allocation25_spill] sm:$0xff] %v6835_v61 }
 0x44c   : > { %2868 = vrot.lane.b32.xlu2 %v6831_v47, %s4568_s8  ;;  %2872 = vrot.lane.b32.xlu1 %v6833_v24, %s4568_s8  ;;  %v2461_v24 = vld [vmem:[#allocation3 + $0x16a] sm:$0xff]  ;;  %v6859_v47 = vld [vmem:[#allocation3 + $0x18] sm:$0xff] }
 0x44d   : > { %8548 = vst [vmem:[#allocation16_spill] sm:$0xff] %v6859_v47 }
 0x44f   : > { %2870 = vrot.lane.b32.xlu0 %v6841_v45, %s4568_s8 }
 0x450   : > { %v6847_v49 = vpop.permute.xlu1 %2730  ;;  %v6854_v61 = vpop.permute.xlu2 %2744 }
 0x451   : > { %v6845_v55 = vpop.permute.xlu0 %2722  ;;  %8544 = vst [vmem:[#allocation133_spill] sm:$0xff] %v6847_v49  ;;  %v2370_v49 = vld [vmem:[#allocation3 + $0x20] sm:$0xff] }
 0x452   : > { %8543 = vst [vmem:[#allocation66_spill] sm:$0xff] %v6845_v55  ;;  %v2371_v55 = vld [vmem:[#allocation3 + $0x30] sm:$0xff] }
 0x453   : > { %8546 = vst [vmem:[#allocation152_spill] sm:$0xff] %v6854_v61  ;;  %v2372_v61 = vld [vmem:[#allocation3 + $0x38] sm:$0xff] }
 0x454   : > { %2874 = vrot.lane.b32.xlu2 %v6849_v56, %s4568_s8  ;;  %2878 = vrot.lane.b32.xlu1 %v2462_v28, %s4568_s8 }
 0x457   : > { %2876 = vrot.lane.b32.xlu0 %v2461_v24, %s4568_s8  ;;  %v2374_v24 = vld [vmem:[#allocation3 + $0x50] sm:$0xff] }
 0x458   : > { %v6861_v45 = vpop.permute.xlu1 %2736 }
 0x459   : > { %v6857_v35 = vpop.permute.xlu0 %2728  ;;  %8549 = vst [vmem:[#allocation33_spill] sm:$0xff] %v6861_v45 }
 0x45a   : > { %8547 = vst [vmem:[#allocation164_spill] sm:$0xff] %v6857_v35  ;;  %v2373_v35 = vld [vmem:[#allocation3 + $0x48] sm:$0xff] }
 0x45c   : > { %2944 = vrot.lane.b32.xlu2 %v6859_v47, %s4569_s9  ;;  %2948 = vrot.lane.b32.xlu1 %v2371_v55, %s4569_s9  ;;  %v2375_v47 = vld [vmem:[#allocation3 + $0x60] sm:$0xff] }
 0x45e   : > { %v6866_v56 = vpop.permute.xlu2 %2750 }
 0x45f   : > { %8550 = vst [vmem:[#allocation50_spill] sm:$0xff] %v6866_v56  ;;  %2946 = vrot.lane.b32.xlu0 %v2370_v49, %s4569_s9  ;;  %v2377_v56 = vld [vmem:[#allocation3 + $0x78] sm:$0xff]  ;;  %v2376_v49 = vld [vmem:[#allocation3 + $0x68] sm:$0xff] }
 0x460   : > { %v6873_v45 = vpop.permute.xlu1 %2742 }
 0x461   : > { %v6869_v28 = vpop.permute.xlu0 %2734  ;;  %8552 = vst [vmem:[#allocation93_spill] sm:$0xff] %v6873_v45  ;;  %v6955_v45 = vld [vmem:[#allocation3 + $0x128] sm:$0xff] }
 0x462   : > { %8551 = vst [vmem:[#allocation80_spill] sm:$0xff] %v6869_v28 }
 0x463   : > { %8579 = vst [vmem:[#allocation95_spill] sm:$0xff] %v6955_v45 }
 0x464   : > { %2950 = vrot.lane.b32.xlu2 %v2372_v61, %s4569_s9  ;;  %2954 = vrot.lane.b32.xlu1 %v2374_v24, %s4569_s9 }
 0x466   : > { %v6875_v18 = vpop.permute.xlu2 %2820 }
 0x467   : > { %8553 = vst [vmem:[#allocation94_spill] sm:$0xff] %v6875_v18  ;;  %2952 = vrot.lane.b32.xlu0 %v2373_v35, %s4569_s9  ;;  %v6889_v18 = vld [vmem:[#allocation3 + $0x98] sm:$0xff]  ;;  %v2378_v35 = vld [vmem:[#allocation3 + $0x80] sm:$0xff] }
 0x468   : > { %8558 = vst [vmem:[#allocation134_spill] sm:$0xff] %v6889_v18 }
 0x469   : > { %v6878_v55 = vpop.permute.xlu0 %2740 }
 0x46a   : > { %8554 = vst [vmem:[#allocation113_spill] sm:$0xff] %v6878_v55 }
 0x46c   : > { %2956 = vrot.lane.b32.xlu2 %v2375_v47, %s4569_s9  ;;  %2960 = vrot.lane.b32.xlu1 %v2377_v56, %s4569_s9  ;;  %v2379_v47 = vld [vmem:[#allocation3 + $0x90] sm:$0xff] }
 0x46e   : > { %v6882_v28 = vpop.permute.xlu1 %2748  ;;  %v6884_v61 = vpop.permute.xlu2 %2826 }
 0x46f   : > { %8555 = vst [vmem:[#allocation31_spill] sm:$0xff] %v6882_v28  ;;  %2958 = vrot.lane.b32.xlu0 %v2376_v49, %s4569_s9  ;;  %v6901_v49 = vld [vmem:[#allocation3 + $0xc0] sm:$0xff]  ;;  %v6939_v28 = vld [vmem:[#allocation3 + $0xf0] sm:$0xff] }
 0x470   : > { %8556 = vst [vmem:[#allocation49_spill] sm:$0xff] %v6884_v61 }
 0x471   : > { %v6887_v24 = vpop.permute.xlu0 %2746  ;;  %8562 = vst [vmem:[#allocation18_spill] sm:$0xff] %v6901_v49 }
 0x472   : > { %8557 = vst [vmem:[#allocation121_spill] sm:$0xff] %v6887_v24  ;;  %v6903_v24 = vld [vmem:[#allocation3 + $0xa8] sm:$0xff] }
 0x473   : > { %8563 = vst [vmem:[#allocation65_spill] sm:$0xff] %v6903_v24 }
 0x474   : > { %2962 = vrot.lane.b32.xlu2 %v2378_v35, %s4569_s9  ;;  %2966 = vrot.lane.b32.xlu1 %v6889_v18, %s4569_s9  ;;  %v6909_v35 = vld [vmem:[#allocation3 + $0xb0] sm:$0xff]  ;;  %8574 = vst [vmem:[#allocation158_spill] sm:$0xff] %v6939_v28 }
 0x476   : > { %v6894_v55 = vpop.permute.xlu1 %2818  ;;  %v6896_v56 = vpop.permute.xlu2 %2832 }
 0x477   : > { %8559 = vst [vmem:[#allocation135_spill] sm:$0xff] %v6894_v55  ;;  %2964 = vrot.lane.b32.xlu0 %v2379_v47, %s4569_s9 }
 0x478   : > { %8560 = vst [vmem:[#allocation156_spill] sm:$0xff] %v6896_v56  ;;  %v6919_v56 = vld [vmem:[#allocation3 + $0xe0] sm:$0xff] }
 0x479   : > { %v6899_v61 = vpop.permute.xlu0 %2816  ;;  %8567 = vst [vmem:[#allocation114_spill] sm:$0xff] %v6919_v56 }
 0x47a   : > { %8561 = vst [vmem:[#allocation17_spill] sm:$0xff] %v6899_v61  ;;  %v6921_v61 = vld [vmem:[#allocation3 + $0xc8] sm:$0xff] }
 0x47b   : > { %8568 = vst [vmem:[#allocation115_spill] sm:$0xff] %v6921_v61 }
 0x47c   : > { %2968 = vrot.lane.b32.xlu2 %v6903_v24, %s4569_s9  ;;  %2972 = vrot.lane.b32.xlu1 %v6901_v49, %s4569_s9  ;;  %v6927_v49 = vld [vmem:[#allocation3 + $0xd8] sm:$0xff]  ;;  %v6937_v24 = vld [vmem:[#allocation3 + $0x108] sm:$0xff] }
 0x47d   : > { %8569 = vst [vmem:[#allocation120_spill] sm:$0xff] %v6927_v49 }
 0x47e   : > { %v6911_v18 = vpop.permute.xlu1 %2824  ;;  %v6913_v55 = vpop.permute.xlu2 %2838  ;;  %8573 = vst [vmem:[#allocation157_spill] sm:$0xff] %v6937_v24 }
 0x47f   : > { %8564 = vst [vmem:[#allocation83_spill] sm:$0xff] %v6911_v18  ;;  %2970 = vrot.lane.b32.xlu0 %v6909_v35, %s4569_s9 }
 0x480   : > { %8565 = vst [vmem:[#allocation91_spill] sm:$0xff] %v6913_v55 }
 0x481   : > { %v6917_v47 = vpop.permute.xlu0 %2822 }
 0x482   : > { %8566 = vst [vmem:[#allocation102_spill] sm:$0xff] %v6917_v47 }
 0x484   : > { %2974 = vrot.lane.b32.xlu2 %v6921_v61, %s4569_s9  ;;  %2978 = vrot.lane.b32.xlu1 %v6919_v56, %s4569_s9  ;;  %v6945_v56 = vld [vmem:[#allocation3 + $0xf8] sm:$0xff]  ;;  %v6957_v61 = vld [vmem:[#allocation3 + $0x110] sm:$0xff] }
 0x485   : > { %8575 = vst [vmem:[#allocation8_spill] sm:$0xff] %v6945_v56 }
 0x486   : > { %v6929_v18 = vpop.permute.xlu1 %2830  ;;  %v6931_v55 = vpop.permute.xlu2 %2844  ;;  %8580 = vst [vmem:[#allocation104_spill] sm:$0xff] %v6957_v61 }
 0x487   : > { %8570 = vst [vmem:[#allocation123_spill] sm:$0xff] %v6929_v18  ;;  %2976 = vrot.lane.b32.xlu0 %v6927_v49, %s4569_s9  ;;  %v2494_v49 = vld [vmem:[#allocation3 + $0x188] sm:$0xff] }
 0x488   : > { %8571 = vst [vmem:[#allocation131_spill] sm:$0xff] %v6931_v55 }
 0x489   : > { %v6935_v47 = vpop.permute.xlu0 %2828 }
 0x48a   : > { %8572 = vst [vmem:[#allocation144_spill] sm:$0xff] %v6935_v47 }
 0x48c   : > { %2980 = vrot.lane.b32.xlu2 %v6939_v28, %s4569_s9  ;;  %2984 = vrot.lane.b32.xlu1 %v6937_v24, %s4569_s9  ;;  %v6963_v24 = vld [vmem:[#allocation3 + $0x120] sm:$0xff]  ;;  %v6973_v28 = vld [vmem:[#allocation3 + $0x138] sm:$0xff] }
 0x48d   : > { %8581 = vst [vmem:[#allocation111_spill] sm:$0xff] %v6963_v24 }
 0x48e   : > { %v6947_v18 = vpop.permute.xlu1 %2836  ;;  %v6949_v55 = vpop.permute.xlu2 %2850  ;;  %8585 = vst [vmem:[#allocation136_spill] sm:$0xff] %v6973_v28 }
 0x48f   : > { %8576 = vst [vmem:[#allocation34_spill] sm:$0xff] %v6947_v18  ;;  %2982 = vrot.lane.b32.xlu0 %v6945_v56, %s4569_s9  ;;  %v2395_v56 = vld [vmem:[#allocation3 + $0x150] sm:$0xff] }
 0x490   : > { %8577 = vst [vmem:[#allocation68_spill] sm:$0xff] %v6949_v55 }
 0x491   : > { %v6953_v47 = vpop.permute.xlu0 %2834 }
 0x492   : > { %8578 = vst [vmem:[#allocation69_spill] sm:$0xff] %v6953_v47 }
 0x494   : > { %2986 = vrot.lane.b32.xlu2 %v6957_v61, %s4569_s9  ;;  %2990 = vrot.lane.b32.xlu1 %v6955_v45, %s4569_s9  ;;  %v6978_v45 = vld [vmem:[#allocation3 + $0x140] sm:$0xff] }
 0x495   : > { %8586 = vst [vmem:[#allocation146_spill] sm:$0xff] %v6978_v45 }
 0x496   : > { %v6965_v18 = vpop.permute.xlu1 %2842  ;;  %v6967_v55 = vpop.permute.xlu2 %2856 }
 0x497   : > { %8582 = vst [vmem:[#allocation118_spill] sm:$0xff] %v6965_v18  ;;  %2988 = vrot.lane.b32.xlu0 %v6963_v24, %s4569_s9  ;;  %v6988_v24 = vld [vmem:[#allocation3 + $0x158] sm:$0xff] }
 0x498   : > { %8583 = vst [vmem:[#allocation72_spill] sm:$0xff] %v6967_v55 }
 0x499   : > { %v6971_v47 = vpop.permute.xlu0 %2840  ;;  %8589 = vst [vmem:[#allocation36_spill] sm:$0xff] %v6988_v24 }
 0x49a   : > { %8584 = vst [vmem:[#allocation67_spill] sm:$0xff] %v6971_v47  ;;  %v2398_v47 = vld [vmem:[#allocation3 + $0x170] sm:$0xff] }
 0x49c   : > { %2992 = vrot.lane.b32.xlu2 %v6973_v28, %s4569_s9  ;;  %2996 = vrot.lane.b32.xlu1 %v2395_v56, %s4569_s9  ;;  %v6993_v56 = vld [vmem:[#allocation3 + $0x168] sm:$0xff] }
 0x49e   : > { %v6980_v61 = vpop.permute.xlu2 %2862  ;;  %v6982_v18 = vpop.permute.xlu1 %2848 }
 0x49f   : > { %8587 = vst [vmem:[#allocation154_spill] sm:$0xff] %v6980_v61  ;;  %2994 = vrot.lane.b32.xlu0 %v6978_v45, %s4569_s9  ;;  %v2493_v45 = vld [vmem:[#allocation3 + $0x180] sm:$0xff] }
 0x4a0   : > { %8588 = vst [vmem:[#allocation19_spill] sm:$0xff] %v6982_v18 }
 0x4a1   : > { %v6986_v55 = vpop.permute.xlu0 %2846 }
 0x4a4   : > { %2998 = vrot.lane.b32.xlu2 %v6988_v24, %s4569_s9  ;;  %3002 = vrot.lane.b32.xlu1 %v2398_v47, %s4569_s9 }
 0x4a6   : > { %v6995_v28 = vpop.permute.xlu2 %2868  ;;  %v6997_v61 = vpop.permute.xlu1 %2854 }
 0x4a7   : > { %8590 = vst [vmem:[#allocation54_spill] sm:$0xff] %v6995_v28  ;;  %3000 = vrot.lane.b32.xlu0 %v6993_v56, %s4569_s9 }
 0x4a8   : > { %8591 = vst [vmem:[#allocation84_spill] sm:$0xff] %v6997_v61 }
 0x4a9   : > { %v7001_v18 = vpop.permute.xlu0 %2852 }
 0x4ac   : > { %3004 = vrot.lane.b32.xlu2 %v2493_v45, %s4569_s9  ;;  %3072 = vrot.lane.b32.xlu1 %v6388_v40, %s4570_s10 }
 0x4ae   : > { %v7006_v24 = vpop.permute.xlu2 %2874  ;;  %v7008_v47 = vpop.permute.xlu1 %2860 }
 0x4af   : > { %3006 = vrot.lane.b32.xlu0 %v2494_v49, %s4569_s9 }
 0x4b1   : > { %v7011_v28 = vpop.permute.xlu0 %2858 }
 0x4b4   : > { %3074 = vrot.lane.b32.xlu2 %v6449_v19, %s4570_s10  ;;  %3078 = vrot.lane.b32.xlu1 %v6495_v1, %s4570_s10 }
 0x4b6   : > { %v7017_v61 = vpop.permute.xlu2 %2944  ;;  %v7019_v45 = vpop.permute.xlu1 %2866 }
 0x4b7   : > { %3076 = vrot.lane.b32.xlu0 %v6472_v20, %s4570_s10 }
 0x4b9   : > { %v7023_v40 = vpop.permute.xlu0 %2864 }
 0x4bc   : > { %3080 = vrot.lane.b32.xlu2 %v6510_v50, %s4570_s10  ;;  %3084 = vrot.lane.b32.xlu1 %v6527_v32, %s4570_s10 }
 0x4be   : > { %v7029_v49 = vpop.permute.xlu2 %2950  ;;  %v7031_v19 = vpop.permute.xlu1 %2872 }
 0x4bf   : > { %8592 = vst [vmem:[#allocation96_spill] sm:$0xff] %v7031_v19  ;;  %3082 = vrot.lane.b32.xlu0 %v6517_v7, %s4570_s10 }
 0x4c1   : > { %v7035_v1 = vpop.permute.xlu0 %2870 }
 0x4c4   : > { %3086 = vrot.lane.b32.xlu2 %v6537_v25, %s4570_s10  ;;  %3090 = vrot.lane.b32.xlu1 %v6557_v22, %s4570_s10 }
 0x4c6   : > { %v7041_v20 = vpop.permute.xlu2 %2956  ;;  %v7043_v50 = vpop.permute.xlu1 %2878 }
 0x4c7   : > { %8593 = vst [vmem:[#allocation97_spill] sm:$0xff] %v7041_v20  ;;  %3088 = vrot.lane.b32.xlu0 %v6547_v2, %s4570_s10 }
 0x4c8   : > { %8594 = vst [vmem:[#allocation116_spill] sm:$0xff] %v7043_v50  ;;  %v7121_v50 = vld [vmem:[#allocation3 + $0x181] sm:$0xff] }
 0x4c9   : > { %v7047_v32 = vpop.permute.xlu0 %2876 }
 0x4cc   : > { %3092 = vrot.lane.b32.xlu2 %v6567_v62, %s4570_s10  ;;  %3096 = vrot.lane.b32.xlu1 %v6587_v51, %s4570_s10 }
 0x4ce   : > { %v7053_v7 = vpop.permute.xlu2 %2962  ;;  %v7055_v25 = vpop.permute.xlu1 %2948 }
 0x4cf   : > { %8595 = vst [vmem:[#allocation38_spill] sm:$0xff] %v7053_v7  ;;  %3094 = vrot.lane.b32.xlu0 %v6577_v6, %s4570_s10 }
 0x4d1   : > { %v7059_v22 = vpop.permute.xlu0 %2946 }
 0x4d4   : > { %3098 = vrot.lane.b32.xlu2 %v6597_v5, %s4570_s10  ;;  %3102 = vrot.lane.b32.xlu1 %v6623_v13, %s4570_s10 }
 0x4d6   : > { %v7065_v2 = vpop.permute.xlu2 %2968  ;;  %v7067_v62 = vpop.permute.xlu1 %2954 }
 0x4d7   : > { %8596 = vst [vmem:[#allocation57_spill] sm:$0xff] %v7065_v2  ;;  %3100 = vrot.lane.b32.xlu0 %v6609_v57, %s4570_s10 }
 0x4d9   : > { %v7071_v51 = vpop.permute.xlu0 %2952 }
 0x4dc   : > { %3104 = vrot.lane.b32.xlu2 %v6607_v41, %s4570_s10  ;;  %3108 = vrot.lane.b32.xlu1 %v6643_v44, %s4570_s10 }
 0x4de   : > { %v7077_v6 = vpop.permute.xlu2 %2974  ;;  %v7079_v5 = vpop.permute.xlu1 %2960 }
 0x4df   : > { %8597 = vst [vmem:[#allocation124_spill] sm:$0xff] %v7079_v5  ;;  %3106 = vrot.lane.b32.xlu0 %v6621_v59, %s4570_s10 }
 0x4e1   : > { %v7083_v13 = vpop.permute.xlu0 %2958 }
 0x4e2   : > { %8598 = vst [vmem:[#allocation137_spill] sm:$0xff] %v7083_v13  ;;  %v8619_v13 = vld [vmem:[#allocation115_spill] sm:$0xff] }
 0x4e4   : > { %3110 = vrot.lane.b32.xlu2 %v6619_v9, %s4570_s10  ;;  %3114 = vrot.lane.b32.xlu1 %v6658_v12, %s4570_s10 }
 0x4e6   : > { %v7089_v57 = vpop.permute.xlu2 %2980  ;;  %v7091_v41 = vpop.permute.xlu1 %2966 }
 0x4e7   : > { %8599 = vst [vmem:[#allocation138_spill] sm:$0xff] %v7091_v41  ;;  %3112 = vrot.lane.b32.xlu0 %v6636_v23, %s4570_s10 }
 0x4e9   : > { %v7095_v44 = vpop.permute.xlu0 %2964 }
 0x4ea   : > { %8600 = vst [vmem:[#allocation159_spill] sm:$0xff] %v7095_v44 }
 0x4ec   : > { %3116 = vrot.lane.b32.xlu2 %v6634_v58, %s4570_s10  ;;  %3120 = vrot.lane.b32.xlu1 %v6669_v21, %s4570_s10 }
 0x4ee   : > { %v7101_v59 = vpop.permute.xlu2 %2986  ;;  %v7103_v9 = vpop.permute.xlu1 %2972 }
 0x4ef   : > { %3118 = vrot.lane.b32.xlu0 %v6651_v11, %s4570_s10 }
 0x4f1   : > { %v7107_v12 = vpop.permute.xlu0 %2970 }
 0x4f4   : > { %3122 = vrot.lane.b32.xlu2 %v6649_v30, %s4570_s10  ;;  %3126 = vrot.lane.b32.xlu1 %v6680_v27, %s4570_s10 }
 0x4f6   : > { %v7113_v23 = vpop.permute.xlu2 %2992  ;;  %v7115_v58 = vpop.permute.xlu1 %2978 }
 0x4f7   : > { %3124 = vrot.lane.b32.xlu0 %v6664_v38, %s4570_s10  ;;  %v7135_v38 = vld [vmem:[#allocation3 + $0x189] sm:$0xff] }
 0x4f8   : > { %8601 = vst [vmem:[#allocation21_spill] sm:$0xff] %v7135_v38 }
 0x4f9   : > { %v7119_v21 = vpop.permute.xlu0 %2976 }
 0x4fc   : > { %3128 = vrot.lane.b32.xlu2 %v6674_v52, %s4570_s10  ;;  %3132 = vrot.lane.b32.xlu1 %v7121_v50, %s4570_s10 }
 0x4fe   : > { %v7127_v30 = vpop.permute.xlu2 %2998  ;;  %v7129_v11 = vpop.permute.xlu1 %2984 }
 0x4ff   : > { %3130 = vrot.lane.b32.xlu0 %v6685_v63, %s4570_s10 }
 0x501   : > { %v7133_v27 = vpop.permute.xlu0 %2982 }
 0x504   : > { %3134 = vrot.lane.b32.xlu2 %v7135_v38, %s4570_s10  ;;  %3202 = vrot.lane.b32.xlu1 %v6705_v42, %s4571_s11  ;;  %v2560_v38 = vld [vmem:[#allocation3 + $0x30] sm:$0xff] }
 0x506   : > { %v7141_v52 = vpop.permute.xlu2 %3004  ;;  %v7143_v2 = vpop.permute.xlu1 %2990 }
 0x507   : > { %3200 = vrot.lane.b32.xlu0 %v6698_v3, %s4571_s11 }
 0x509   : > { %v7147_v19 = vpop.permute.xlu0 %2988 }
 0x50c   : > { %3204 = vrot.lane.b32.xlu2 %v6696_v43, %s4571_s11  ;;  %3208 = vrot.lane.b32.xlu1 %v6721_v46, %s4571_s11 }
 0x50e   : > { %v7153_v63 = vpop.permute.xlu2 %3074  ;;  %v7155_v41 = vpop.permute.xlu1 %2996 }
 0x50f   : > { %3206 = vrot.lane.b32.xlu0 %v6713_v26, %s4571_s11 }
 0x511   : > { %v7159_v42 = vpop.permute.xlu0 %2994 }
 0x514   : > { %3210 = vrot.lane.b32.xlu2 %v6711_v10, %s4571_s11  ;;  %3214 = vrot.lane.b32.xlu1 %v6735_v4, %s4571_s11 }
 0x516   : > { %v7165_v3 = vpop.permute.xlu2 %3080  ;;  %v7167_v44 = vpop.permute.xlu1 %3002 }
 0x517   : > { %3212 = vrot.lane.b32.xlu0 %v6729_v29, %s4571_s11 }
 0x519   : > { %v7171_v46 = vpop.permute.xlu0 %3000 }
 0x51a   : > { %8602 = vst [vmem:[#allocation22_spill] sm:$0xff] %v7171_v46  ;;  %v3695_v46 = vsel %vm279_vm0, %v6909_v35, %v6809_v60  ;;  %v8613_v60 = vld [vmem:[#allocation63_spill] sm:$0xff] }
 0x51c   : > { %3216 = vrot.lane.b32.xlu2 %v6727_v16, %s4571_s11  ;;  %3220 = vrot.lane.b32.xlu1 %v6751_v36, %s4571_s11 }
 0x51e   : > { %v7177_v7 = vpop.permute.xlu2 %3086  ;;  %v7179_v10 = vpop.permute.xlu1 %3072 }
 0x51f   : > { %8603 = vst [vmem:[#allocation70_spill] sm:$0xff] %v7177_v7  ;;  %3218 = vrot.lane.b32.xlu0 %v6745_v53, %s4571_s11  ;;  %v8615_v7 = vld [vmem:[#allocation120_spill] sm:$0xff] }
 0x521   : > { %v7183_v4 = vpop.permute.xlu0 %3006 }
 0x522   : > { %8604 = vst [vmem:[#allocation85_spill] sm:$0xff] %v7183_v4 }
 0x524   : > { %3222 = vrot.lane.b32.xlu2 %v6743_v0, %s4571_s11  ;;  %3226 = vrot.lane.b32.xlu1 %v6769_v33, %s4571_s11 }
 0x526   : > { %v7189_v29 = vpop.permute.xlu2 %3092  ;;  %v7191_v16 = vpop.permute.xlu1 %3078 }
 0x527   : > { %8605 = vst [vmem:[#allocation92_spill] sm:$0xff] %v7189_v29  ;;  %3224 = vrot.lane.b32.xlu0 %v6761_v31, %s4571_s11  ;;  %v8611_v29 = vld [vmem:[#allocation79_spill] sm:$0xff] }
 0x529   : > { %v7195_v36 = vpop.permute.xlu0 %3076 }
 0x52c   : > { %3228 = vrot.lane.b32.xlu2 %v6763_v34, %s4571_s11  ;;  %3232 = vrot.lane.b32.xlu1 %v6787_v17, %s4571_s11 }
 0x52e   : > { %v7201_v53 = vpop.permute.xlu2 %3098  ;;  %v7203_v0 = vpop.permute.xlu1 %3084 }
 0x52f   : > { %8606 = vst [vmem:[#allocation105_spill] sm:$0xff] %v7203_v0  ;;  %3230 = vrot.lane.b32.xlu0 %v6779_v39, %s4571_s11 }
 0x531   : > { %v7207_v33 = vpop.permute.xlu0 %3082 }
 0x534   : > { %3234 = vrot.lane.b32.xlu2 %v6781_v48, %s4571_s11  ;;  %3238 = vrot.lane.b32.xlu1 %v6805_v15, %s4571_s11 }
 0x536   : > { %v7213_v31 = vpop.permute.xlu2 %3104  ;;  %v7215_v34 = vpop.permute.xlu1 %3090 }
 0x537   : > { %8607 = vst [vmem:[#allocation20_spill] sm:$0xff] %v7215_v34  ;;  %3236 = vrot.lane.b32.xlu0 %v6797_v8, %s4571_s11  ;;  %v8612_v34 = vld [vmem:[#allocation62_spill] sm:$0xff] }
 0x539   : > { %v7219_v17 = vpop.permute.xlu0 %3088 }
 0x53a   : > { %8608 = vst [vmem:[#allocation24_spill] sm:$0xff] %v7219_v17 }
 0x53c   : > { %3240 = vrot.lane.b32.xlu2 %v6799_v37, %s4571_s11  ;;  %3244 = vrot.lane.b32.xlu1 %v6823_v54, %s4571_s11  ;;  %v3727_v54 = vsel %vm1782_vm4, %v3695_v46, %v6986_v55  ;;  %v8616_v55 = vld [vmem:[#allocation64_spill] sm:$0xff] }
 0x53e   : > { %v7225_v39 = vpop.permute.xlu2 %3110  ;;  %v7227_v48 = vpop.permute.xlu1 %3096 }
 0x53f   : > { %8609 = vst [vmem:[#allocation71_spill] sm:$0xff] %v7227_v48  ;;  %3242 = vrot.lane.b32.xlu0 %v6815_v14, %s4571_s11  ;;  %v3759_v48 = vsel %vm1815_vm5, %v3727_v54, %v7077_v6  ;;  %v8617_v6 = vld [vmem:[#allocation158_spill] sm:$0xff] }
 0x541   : > { %v7231_v4 = vpop.permute.xlu0 %3094 }
 0x542   : > { %8610 = vst [vmem:[#allocation125_spill] sm:$0xff] %v7231_v4 }
 0x544   : > { %3246 = vrot.lane.b32.xlu2 %v8611_v29, %s4571_s11  ;;  %3250 = vrot.lane.b32.xlu1 %v8612_v34, %s4571_s11  ;;  %v8614_v29 = vld [vmem:[#allocation6_spill] sm:$0xff] }
 0x545   : > { %v3698_v34 = vsel %vm279_vm0, %v8615_v7, %v8614_v29  ;;  %v8620_v29 = vld [vmem:[#allocation143_spill] sm:$0xff] }
 0x546   : > { %v7244_v17 = vpop.permute.xlu2 %3116  ;;  %v3103_v5 = vpop.permute.xlu1 %3102  ;;  %v3730_v46 = vsel %vm1782_vm4, %v3698_v34, %v7001_v18 }
 0x547   : > { %v7247_v4 = vsel %vm1848_vm7, %v3759_v48, %v3103_v5  ;;  %3248 = vrot.lane.b32.xlu0 %v8613_v60, %s4571_s11  ;;  %v3762_v5 = vsel %vm1815_vm5, %v3730_v46, %v7089_v57  ;;  %v8618_v60 = vld [vmem:[#allocation66_spill] sm:$0xff]  ;;  %v2608_v46 = vld [vmem:[#allocation3 + $0xf1] sm:$0xff] }
 0x548   : > { %v3697_v0 = vsel %vm279_vm0, %v8619_v13, %v8618_v60 }
 0x549   : > { %v7251_v35 = vpop.permute.xlu0 %3100 }
 0x54c   : > { %3252 = vrot.lane.b32.xlu2 %v8616_v55, %s4571_s11  ;;  %3360 = vrot.lane.b32.xlu1 %v8617_v6, %s4572_s12  ;;  %v8621_v55 = vld [vmem:[#allocation68_spill] sm:$0xff] }
 0x54d   : > { %v3729_v20 = vsel %vm1782_vm4, %v3697_v0, %v8621_v55  ;;  %v2561_v55 = vld [vmem:[#allocation3 + $0x38] sm:$0xff] }
 0x54e   : > { %v7264_v48 = vpop.permute.xlu2 %3122  ;;  %v3109_v54 = vpop.permute.xlu1 %3108  ;;  %v3761_v18 = vsel %vm1815_vm5, %v3729_v20, %v7115_v58  ;;  %v2592_v20 = vld [vmem:[#allocation3 + $0x31] sm:$0xff] }
 0x54f   : > { %v7270_v7 = vsel %vm1848_vm7, %v3762_v5, %v3109_v54  ;;  %3254 = vrot.lane.b32.xlu0 %v8620_v29, %s4571_s11  ;;  %v2609_v29 = vld [vmem:[#allocation3 + $0xf9] sm:$0xff] }
 0x551   : > { %v3107_v57 = vpop.permute.xlu0 %3106 }
 0x552   : > { %v7279_v34 = vsel %vm1848_vm7, %v3761_v18, %v3107_v57  ;;  %v8626_v18 = vld [vmem:[#allocation146_spill] sm:$0xff] }
 0x554   : > { %3488 = vrot.lane.b32.xlu2 %v2608_v46, %s4573_s13  ;;  %3328 = vrot.lane.b32.xlu1 %v2560_v38, %s4572_s12  ;;  %v8624_v38 = vld [vmem:[#allocation8_spill] sm:$0xff] }
 0x556   : > { %v7283_v13 = vpop.permute.xlu2 %3128  ;;  %v7285_v5 = vpop.permute.xlu1 %3114 }
 0x557   : > { %8622 = vst [vmem:[#allocation132_spill] sm:$0xff] %v7283_v13  ;;  %3616 = vrot.lane.b32.xlu0 %v6797_v8, %s4574_s14  ;;  %v8625_v8 = vld [vmem:[#allocation93_spill] sm:$0xff] }
 0x558   : > { %v3707_v57 = vsel %vm279_vm0, %v8626_v18, %v8625_v8  ;;  %v8627_v18 = vld [vmem:[#allocation31_spill] sm:$0xff] }
 0x559   : > { %v7289_v0 = vpop.permute.xlu0 %3112 }
 0x55c   : > { %3456 = vrot.lane.b32.xlu2 %v2592_v20, %s4573_s13  ;;  %3584 = vrot.lane.b32.xlu1 %v6696_v43, %s4574_s14  ;;  %v3739_v43 = vsel %vm1782_vm4, %v3707_v57, %v7035_v1  ;;  %v8629_v57 = vld [vmem:[#allocation121_spill] sm:$0xff] }
 0x55d   : > { %v3771_v46 = vsel %vm1815_vm5, %v3739_v43, %v7127_v30  ;;  %v8630_v43 = vld [vmem:[#allocation36_spill] sm:$0xff] }
 0x55e   : > { %v7294_v58 = vpop.permute.xlu2 %3134  ;;  %v7296_v54 = vpop.permute.xlu1 %3120 }
 0x55f   : > { %8623 = vst [vmem:[#allocation147_spill] sm:$0xff] %v7294_v58  ;;  %3362 = vrot.lane.b32.xlu0 %v8624_v38, %s4572_s12 }
 0x561   : > { %v7300_v60 = vpop.permute.xlu0 %3118 }
 0x564   : > { %3490 = vrot.lane.b32.xlu2 %v2609_v29, %s4573_s13  ;;  %3330 = vrot.lane.b32.xlu1 %v2561_v55, %s4572_s12  ;;  %v2593_v29 = vld [vmem:[#allocation3 + $0x39] sm:$0xff]  ;;  %v3710_v55 = vsel %vm279_vm0, %v6993_v56, %v8627_v18 }
 0x565   : > { %v3742_v1 = vsel %vm1782_vm4, %v3710_v55, %v7047_v32  ;;  %v2610_v55 = vld [vmem:[#allocation3 + $0x109] sm:$0xff] }
 0x566   : > { %v7311_v20 = vpop.permute.xlu2 %3204  ;;  %v3127_v58 = vpop.permute.xlu1 %3126  ;;  %v3774_v30 = vsel %vm1815_vm5, %v3742_v1, %v7141_v52  ;;  %v2562_v1 = vld [vmem:[#allocation3 + $0x48] sm:$0xff] }
 0x567   : > { %v7314_v13 = vsel %vm1848_vm7, %v3771_v46, %v3127_v58  ;;  %3618 = vrot.lane.b32.xlu0 %v6805_v15, %s4574_s14  ;;  %v3709_v46 = vsel %vm279_vm0, %v8630_v43, %v8629_v57  ;;  %v2626_v57 = vld [vmem:[#allocation3 + $0x4a] sm:$0xff] }
 0x569   : > { %v7318_v8 = vpop.permute.xlu0 %3124 }
 0x56c   : > { %3458 = vrot.lane.b32.xlu2 %v2593_v29, %s4573_s13  ;;  %3586 = vrot.lane.b32.xlu1 %v6713_v26, %s4574_s14  ;;  %v8632_v29 = vld [vmem:[#allocation157_spill] sm:$0xff]  ;;  %v3741_v26 = vsel %vm1782_vm4, %v3709_v46, %v7006_v24 }
 0x56d   : > { %v3773_v32 = vsel %vm1815_vm5, %v3741_v26, %v7167_v44  ;;  %v2594_v44 = vld [vmem:[#allocation3 + $0x49] sm:$0xff] }
 0x56e   : > { %v7330_v58 = vpop.permute.xlu2 %3210  ;;  %v3133_v15 = vpop.permute.xlu1 %3132  ;;  %v8636_v26 = vld [vmem:[#allocation104_spill] sm:$0xff] }
 0x56f   : > { %8628 = vst [vmem:[#allocation160_spill] sm:$0xff] %v7330_v58  ;;  %v7336_v56 = vsel %vm1848_vm7, %v3774_v30, %v3133_v15  ;;  %3364 = vrot.lane.b32.xlu0 %v8632_v29, %s4572_s12 }
 0x570   : > { %8631 = vst [vmem:[#allocation161_spill] sm:$0xff] %v7336_v56  ;;  %v2563_v56 = vld [vmem:[#allocation3 + $0x50] sm:$0xff] }
 0x571   : > { %v3131_v52 = vpop.permute.xlu0 %3130 }
 0x572   : > { %v7345_v18 = vsel %vm1848_vm7, %v3773_v32, %v3131_v52  ;;  %v8637_v52 = vld [vmem:[#allocation28_spill] sm:$0xff] }
 0x573   : > { %8633 = vst [vmem:[#allocation11_spill] sm:$0xff] %v7345_v18  ;;  %v8639_v18 = vld [vmem:[#allocation131_spill] sm:$0xff] }
 0x574   : > { %3492 = vrot.lane.b32.xlu2 %v2610_v55, %s4573_s13  ;;  %3332 = vrot.lane.b32.xlu1 %v2562_v1, %s4572_s12  ;;  %v8638_v55 = vld [vmem:[#allocation65_spill] sm:$0xff] }
 0x575   : > { %v2611_v1 = vld [vmem:[#allocation3 + $0x111] sm:$0xff] }
 0x576   : > { %v7349_v30 = vpop.permute.xlu2 %3216  ;;  %v7351_v15 = vpop.permute.xlu1 %3202 }
 0x577   : > { %8634 = vst [vmem:[#allocation37_spill] sm:$0xff] %v7349_v30  ;;  %3620 = vrot.lane.b32.xlu0 %v6799_v37, %s4574_s14  ;;  %v3694_v37 = vsel %vm279_vm0, %v8638_v55, %v8637_v52  ;;  %v2595_v55 = vld [vmem:[#allocation3 + $0x51] sm:$0xff] }
 0x579   : > { %v7355_v24 = vpop.permute.xlu0 %3200 }
 0x57c   : > { %3460 = vrot.lane.b32.xlu2 %v2594_v44, %s4573_s13  ;;  %3588 = vrot.lane.b32.xlu1 %v2626_v57, %s4574_s14  ;;  %v3726_v44 = vsel %vm1782_vm4, %v3694_v37, %v8639_v18  ;;  %v2627_v37 = vld [vmem:[#allocation3 + $0x52] sm:$0xff] }
 0x57d   : > { %v3758_v57 = vsel %vm1815_vm5, %v3726_v44, %v7103_v9  ;;  %v8648_v44 = vld [vmem:[#allocation164_spill] sm:$0xff] }
 0x57e   : > { %v7359_v43 = vpop.permute.xlu2 %3222  ;;  %v7361_v46 = vpop.permute.xlu1 %3208 }
 0x57f   : > { %8635 = vst [vmem:[#allocation74_spill] sm:$0xff] %v7359_v43  ;;  %3366 = vrot.lane.b32.xlu0 %v8636_v26, %s4572_s12  ;;  %v3790_v43 = vsel %vm1848_vm7, %v3758_v57, %v7251_v35  ;;  %v3700_v57 = vsel %vm279_vm0, %v8617_v6, %v8648_v44 }
 0x581   : > { %v7365_v32 = vpop.permute.xlu0 %3206 }
 0x584   : > { %3494 = vrot.lane.b32.xlu2 %v2611_v1, %s4573_s13  ;;  %3334 = vrot.lane.b32.xlu1 %v2563_v56, %s4572_s12  ;;  %v8644_v56 = vld [vmem:[#allocation111_spill] sm:$0xff]  ;;  %v8647_v1 = vld [vmem:[#allocation134_spill] sm:$0xff] }
 0x586   : > { %v3229_v30 = vpop.permute.xlu2 %3228  ;;  %v7378_v58 = vpop.permute.xlu1 %3214 }
 0x587   : > { %8640 = vst [vmem:[#allocation75_spill] sm:$0xff] %v7378_v58  ;;  %v7381_v52 = vsel %vm1881_vm6, %v3790_v43, %v3229_v30  ;;  %3622 = vrot.lane.b32.xlu0 %v6815_v14, %s4574_s14  ;;  %v8646_v43 = vld [vmem:[#allocation56_spill] sm:$0xff] }
 0x588   : > { %8641 = vst [vmem:[#allocation98_spill] sm:$0xff] %v7381_v52  ;;  %v3693_v14 = vsel %vm279_vm0, %v8647_v1, %v8646_v43  ;;  %v2564_v52 = vld [vmem:[#allocation3 + $0x60] sm:$0xff] }
 0x589   : > { %v7385_v18 = vpop.permute.xlu0 %3212 }
 0x58a   : > { %8642 = vst [vmem:[#allocation106_spill] sm:$0xff] %v7385_v18  ;;  %v8650_v18 = vld [vmem:[#allocation72_spill] sm:$0xff] }
 0x58c   : > { %3462 = vrot.lane.b32.xlu2 %v2595_v55, %s4573_s13  ;;  %3590 = vrot.lane.b32.xlu1 %v2627_v37, %s4574_s14  ;;  %v2612_v55 = vld [vmem:[#allocation3 + $0x121] sm:$0xff] }
 0x58d   : > { %v8649_v37 = vld [vmem:[#allocation118_spill] sm:$0xff] }
 0x58e   : > { %v7389_v9 = vpop.permute.xlu2 %3234  ;;  %v7391_v35 = vpop.permute.xlu1 %3220  ;;  %v3725_v58 = vsel %vm1782_vm4, %v3693_v14, %v8649_v37  ;;  %v2644_v37 = vld [vmem:[#allocation3 + $0x122] sm:$0xff] }
 0x58f   : > { %8643 = vst [vmem:[#allocation112_spill] sm:$0xff] %v7391_v35  ;;  %3368 = vrot.lane.b32.xlu0 %v8644_v56, %s4572_s12  ;;  %v3732_v35 = vsel %vm1782_vm4, %v3700_v57, %v8650_v18 }
 0x590   : > { %v3764_v43 = vsel %vm1815_vm5, %v3732_v35, %v7129_v11  ;;  %v8651_v11 = vld [vmem:[#allocation80_spill] sm:$0xff]  ;;  %v2628_v35 = vld [vmem:[#allocation3 + $0x62] sm:$0xff] }
 0x591   : > { %v7395_v30 = vpop.permute.xlu0 %3218  ;;  %v3796_v1 = vsel %vm1848_vm7, %v3764_v43, %v7289_v0  ;;  %v8652_v0 = vld [vmem:[#allocation154_spill] sm:$0xff] }
 0x592   : > { %8645 = vst [vmem:[#allocation119_spill] sm:$0xff] %v7395_v30  ;;  %v3757_v30 = vsel %vm1815_vm5, %v3725_v58, %v7107_v12  ;;  %v2596_v58 = vld [vmem:[#allocation3 + $0x61] sm:$0xff] }
 0x593   : > { %v3789_v6 = vsel %vm1848_vm7, %v3757_v30, %v7201_v53  ;;  %v3703_v53 = vsel %vm279_vm0, %v8636_v26, %v8651_v11  ;;  %v8654_v11 = vld [vmem:[#allocation114_spill] sm:$0xff] }
 0x594   : > { %3496 = vrot.lane.b32.xlu2 %v2612_v55, %s4573_s13  ;;  %3336 = vrot.lane.b32.xlu1 %v2564_v52, %s4572_s12  ;;  %v3735_v30 = vsel %vm1782_vm4, %v3703_v53, %v8652_v0 }
 0x595   : > { %v3767_v57 = vsel %vm1815_vm5, %v3735_v30, %v7143_v2  ;;  %v3940_v2 = vld [vmem:[%s8088_s4 + $0x20] sm:$0xf] }
 0x596   : > { %v3241_v14 = vpop.permute.xlu2 %3240  ;;  %v3227_v44 = vpop.permute.xlu1 %3226  ;;  %v3799_v55 = vsel %vm1848_vm7, %v3767_v57, %v7300_v60  ;;  %v3939_v60 = vld [vmem:[%s8088_s4 + $0x18] sm:$0xff]  ;;  %4490 = vmatpush.msk.msra.mxu3 %vm2115_vm3, %v3940_v2  ;;  %4448 = vmatpush.msk.msra.mxu1 %vm2115_vm3, %v3940_v2 }
 0x597   : > { %v7418_v18 = vsel %vm1881_vm6, %v3796_v1, %v3241_v14  ;;  %v7421_v52 = vsel %vm1881_vm6, %v3789_v6, %v3227_v44  ;;  %3624 = vrot.lane.b32.xlu0 %v2644_v37, %s4574_s14  ;;  %v2581_v1 = vld [vmem:[#allocation3 + $0x128] sm:$0xff]  ;;  %v8653_v37 = vld [vmem:[#allocation76_spill] sm:$0xff] }
 0x598   : > { %v3699_v53 = vsel %vm279_vm0, %v8654_v11, %v8653_v37  ;;  %v2613_v30 = vld [vmem:[#allocation3 + $0x129] sm:$0xff]  ;;  %4491 = vmatpush.msra.mxu3 %v3939_v60  ;;  %4052 = vmatpush.msra.mxu1 %v3939_v60 }
 0x599   : > { %v7424_v12 = vpop.permute.xlu0 %3224  ;;  %v2565_v57 = vld [vmem:[#allocation3 + $0x68] sm:$0xff] }
 0x59c   : > { %3464 = vrot.lane.b32.xlu2 %v2596_v58, %s4573_s13  ;;  %3592 = vrot.lane.b32.xlu1 %v2628_v35, %s4574_s14  ;;  %v8655_v58 = vld [vmem:[#allocation113_spill] sm:$0xff]  ;;  %v8656_v35 = vld [vmem:[#allocation136_spill] sm:$0xff] }
 0x59d   : > { %v3706_v0 = vsel %vm279_vm0, %v8656_v35, %v8655_v58 }
 0x59e   : > { %v3247_v43 = vpop.permute.xlu2 %3246  ;;  %v7437_v6 = vpop.permute.xlu1 %3232 }
 0x59f   : > { %v7440_v26 = vsel %vm1881_vm6, %v3799_v55, %v3247_v43  ;;  %3370 = vrot.lane.b32.xlu0 %v2581_v1, %s4572_s12  ;;  %v8658_v43 = vld [vmem:[#allocation84_spill] sm:$0xff] }
 0x5a0   : > { %v3731_v1 = vsel %vm1782_vm4, %v3699_v53, %v8658_v43  ;;  %v2629_v43 = vld [vmem:[#allocation3 + $0x6a] sm:$0xff] }
 0x5a1   : > { %v3231_v14 = vpop.permute.xlu0 %3230  ;;  %v3763_v37 = vsel %vm1815_vm5, %v3731_v1, %v7133_v27 }
 0x5a2   : > { %v7445_v44 = vsel %vm1881_vm6, %v7247_v4, %v3231_v14  ;;  %v8657_v4 = vld [vmem:[#allocation54_spill] sm:$0xff]  ;;  %v3795_v11 = vsel %vm1848_vm7, %v3763_v37, %v7225_v39  ;;  %v3936_v39 = vld [vmem:[%s8088_s4] sm:$0xff]  ;;  %v8660_v37 = vld [vmem:[#allocation133_spill] sm:$0xff] }
 0x5a3   : > { %v3738_v55 = vsel %vm1782_vm4, %v3706_v0, %v8657_v4  ;;  %v3938_v14 = vld [vmem:[%s8088_s4 + $0x10] sm:$0xff] }
 0x5a4   : > { %3498 = vrot.lane.b32.xlu2 %v2613_v30, %s4573_s13  ;;  %3338 = vrot.lane.b32.xlu1 %v2565_v57, %s4572_s12  ;;  %v3770_v2 = vsel %vm1815_vm5, %v3738_v55, %v7155_v41  ;;  %v2645_v30 = vld [vmem:[#allocation3 + $0x12a] sm:$0xff]  ;;  %v3937_v41 = vld [vmem:[%s8088_s4 + $0x8] sm:$0xff] }
 0x5a5   : > { %v3802_v53 = vsel %vm1848_vm7, %v3770_v2, %v7318_v8  ;;  %4492 = vmatpush.msra.mxu3 %v3938_v14  ;;  %4053 = vmatpush.msra.mxu1 %v3938_v14  ;;  %v8659_v8 = vld [vmem:[#allocation60_spill] sm:$0xff]  ;;  %v3701_v2 = vsel %vm279_vm0, %v8624_v38, %v8660_v37 }
 0x5a6   : > { %v3253_v58 = vpop.permute.xlu2 %3252  ;;  %v3239_v0 = vpop.permute.xlu1 %3238  ;;  %v3702_v60 = vsel %vm279_vm0, %v8632_v29, %v8659_v8  ;;  %v2597_v55 = vld [vmem:[#allocation3 + $0x69] sm:$0xff]  ;;  %v2566_v8 = vld [vmem:[#allocation3 + $0x78] sm:$0xff] }
 0x5a7   : > { %v7479_v57 = vsel %vm1881_vm6, %v3802_v53, %v3253_v58  ;;  %v7482_v4 = vsel %vm1881_vm6, %v3795_v11, %v3239_v0  ;;  %3626 = vrot.lane.b32.xlu0 %v2645_v30, %s4574_s14  ;;  %4493 = vmatpush.msra.mxu3 %v3937_v41  ;;  %v3734_v1 = vsel %vm1782_vm4, %v3702_v60, %v7008_v47  ;;  %v8661_v30 = vld [vmem:[#allocation25_spill] sm:$0xff] }
 0x5a8   : > { %4054 = vmatpush.msra.mxu1 %v3937_v41  ;;  %v3766_v14 = vsel %vm1815_vm5, %v3734_v1, %v7147_v19  ;;  %v3733_v47 = vsel %vm1782_vm4, %v3701_v2, %v7011_v28  ;;  %v8662_v41 = vld [vmem:[#allocation95_spill] sm:$0xff] }
 0x5a9   : > { %v7488_v27 = vpop.permute.xlu0 %3236  ;;  %4494 = vmatpush.msra.mxu3 %v3936_v39  ;;  %v3798_v29 = vsel %vm1848_vm7, %v3766_v14, %v7244_v17  ;;  %v3765_v19 = vsel %vm1815_vm5, %v3733_v47, %v7101_v59  ;;  %v3705_v28 = vsel %vm279_vm0, %v8662_v41, %v8661_v30  ;;  %v2646_v14 = vld [vmem:[#allocation3 + $0x13a] sm:$0xff]  ;;  %v8666_v30 = vld [vmem:[#allocation19_spill] sm:$0xff] }
 0x5aa   : > { %4055 = vmatpush.msra.mxu1 %v3936_v39  ;;  %v3797_v38 = vsel %vm1848_vm7, %v3765_v19, %v7285_v5  ;;  %v2614_v39 = vld [vmem:[#allocation3 + $0x139] sm:$0xff]  ;;  %v3737_v60 = vsel %vm1782_vm4, %v3705_v28, %v7019_v45 }
 0x5ab   : > { %v3769_v59 = vsel %vm1815_vm5, %v3737_v60, %v7159_v42  ;;  %v8663_v5 = vld [vmem:[#allocation33_spill] sm:$0xff]  ;;  %v2583_v19 = vld [vmem:[#allocation3 + $0x140] sm:$0xff] }
 0x5ac   : > { %3466 = vrot.lane.b32.xlu2 %v2597_v55, %s4573_s13  ;;  %3594 = vrot.lane.b32.xlu1 %v2629_v43, %s4574_s14  ;;  %v3801_v55 = vsel %vm1848_vm7, %v3769_v59, %v7264_v48  ;;  %v2615_v60 = vld [vmem:[#allocation3 + $0x141] sm:$0xff] }
 0x5ad   : > { %v2567_v59 = vld [vmem:[#allocation3 + $0x80] sm:$0xff] }
 0x5ae   : > { %v3489_v11 = vpop.permute.xlu2 %3488  ;;  %v3245_v53 = vpop.permute.xlu1 %3244 }
 0x5af   : > { %v7510_v58 = vsel %vm1881_vm6, %v3798_v29, %v3245_v53  ;;  %3372 = vrot.lane.b32.xlu0 %v8656_v35, %s4572_s12  ;;  %v3704_v35 = vsel %vm279_vm0, %v8644_v56, %v8663_v5  ;;  %v2598_v29 = vld [vmem:[#allocation3 + $0x79] sm:$0xff] }
 0x5b0   : > { %v3736_v45 = vsel %vm1782_vm4, %v3704_v35, %v7023_v40  ;;  %v2630_v53 = vld [vmem:[#allocation3 + $0x7a] sm:$0xff] }
 0x5b1   : > { %v3243_v0 = vpop.permute.xlu0 %3242  ;;  %v3768_v42 = vsel %vm1815_vm5, %v3736_v45, %v7113_v23  ;;  %v8665_v23 = vld [vmem:[#allocation18_spill] sm:$0xff] }
 0x5b2   : > { %v7519_v17 = vsel %vm1881_vm6, %v3797_v38, %v3243_v0  ;;  %v3800_v56 = vsel %vm1848_vm7, %v3768_v42, %v7296_v54  ;;  %v8664_v38 = vld [vmem:[#allocation13_spill] sm:$0xff] }
 0x5b3   : > { %v3696_v0 = vsel %vm279_vm0, %v8665_v23, %v8664_v38  ;;  %v8668_v42 = vld [vmem:[#allocation17_spill] sm:$0xff]  ;;  %v2599_v38 = vld [vmem:[#allocation3 + $0x81] sm:$0xff] }
 0x5b4   : > { %3500 = vrot.lane.b32.xlu2 %v2614_v39, %s4573_s13  ;;  %3340 = vrot.lane.b32.xlu1 %v2566_v8, %s4572_s12  ;;  %v3728_v41 = vsel %vm1782_vm4, %v3696_v0, %v8666_v30  ;;  %v2367_v39 = vld [vmem:[#allocation3] sm:$0xff]  ;;  %v2584_v0 = vld [vmem:[#allocation3 + $0x150] sm:$0xff]  ;;  %v2368_v30 = vld [vmem:[#allocation3 + $0x8] sm:$0xff] }
 0x5b5   : > { %v3760_v8 = vsel %vm1815_vm5, %v3728_v41, %v7119_v21  ;;  %v2647_v21 = vld [vmem:[#allocation3 + $0x142] sm:$0xff]  ;;  %v2616_v41 = vld [vmem:[#allocation3 + $0x151] sm:$0xff] }
 0x5b6   : > { %v3457_v43 = vpop.permute.xlu2 %3456  ;;  %v3251_v1 = vpop.permute.xlu1 %3250  ;;  %v3792_v5 = vsel %vm1848_vm7, %v3760_v8, %v7213_v31  ;;  %v2631_v23 = vld [vmem:[#allocation3 + $0x82] sm:$0xff]  ;;  %v3825_v8 = vsel %vm1881_vm6, %v7279_v34, %v7389_v9 }
 0x5b7   : > { %v7538_v37 = vsel %vm1881_vm6, %v3801_v55, %v3251_v1  ;;  %3628 = vrot.lane.b32.xlu0 %v2646_v14, %s4574_s14  ;;  %v3824_v35 = vsel %vm1881_vm6, %v3792_v5, %v7437_v6  ;;  %v8667_v55 = vld [vmem:[#allocation9_spill] sm:$0xff] }
 0x5b9   : > { %v3249_v2 = vpop.permute.xlu0 %3248 }
 0x5ba   : > { %v7546_v48 = vsel %vm1881_vm6, %v3800_v56, %v3249_v2 }
 0x5bc   : > { %3468 = vrot.lane.b32.xlu2 %v2598_v29, %s4573_s13  ;;  %3596 = vrot.lane.b32.xlu1 %v2630_v53, %s4574_s14 }
 0x5be   : > { %v3491_v40 = vpop.permute.xlu2 %3490  ;;  %v3361_v47 = vpop.permute.xlu1 %3360 }
 0x5bf   : > { %3374 = vrot.lane.b32.xlu0 %v2583_v19, %s4572_s12  ;;  %v3856_v1 = vsel %vm1914_vm8, %v3824_v35, %v3361_v47 }
 0x5c0   : > { %v3888_v29 = vsel %vm1947_vm10, %v3856_v1, %v3489_v11 }
 0x5c1   : > { %v3255_v54 = vpop.permute.xlu0 %3254 }
 0x5c2   : > { %v7558_v28 = vsel %vm1881_vm6, %v7314_v13, %v3255_v54  ;;  %v3680_v13 = vsel %vm279_vm0, %v2367_v39, %v8667_v55  ;;  %v2568_v39 = vld [vmem:[#allocation3 + $0x90] sm:$0xff] }
 0x5c3   : > { %v3712_v56 = vsel %vm1782_vm4, %v3680_v13, %v8668_v42  ;;  %v2648_v55 = vld [vmem:[#allocation3 + $0x152] sm:$0xff]  ;;  %v8670_v13 = vld [vmem:[#allocation135_spill] sm:$0xff] }
 0x5c4   : > { %3502 = vrot.lane.b32.xlu2 %v2615_v60, %s4573_s13  ;;  %3342 = vrot.lane.b32.xlu1 %v2567_v59, %s4572_s12  ;;  %v3744_v31 = vsel %vm1815_vm5, %v3712_v56, %v7017_v61  ;;  %v8669_v60 = vld [vmem:[#allocation10_spill] sm:$0xff] }
 0x5c5   : > { %v3776_v2 = vsel %vm1848_vm7, %v3744_v31, %v7179_v10 }
 0x5c6   : > { %v3459_v14 = vpop.permute.xlu2 %3458  ;;  %v3329_v45 = vpop.permute.xlu1 %3328  ;;  %v3808_v53 = vsel %vm1881_vm6, %v3776_v2, %v7355_v24  ;;  %v2600_v2 = vld [vmem:[#allocation3 + $0x91] sm:$0xff] }
 0x5c7   : > { %3630 = vrot.lane.b32.xlu0 %v2647_v21, %s4574_s14  ;;  %v3840_v19 = vsel %vm1914_vm8, %v3808_v53, %v3329_v45 }
 0x5c8   : > { %v3872_v11 = vsel %vm1947_vm10, %v3840_v19, %v3457_v43  ;;  %v3681_v43 = vsel %vm279_vm0, %v2368_v30, %v8669_v60  ;;  %v2569_v19 = vld [vmem:[#allocation3 + $0x98] sm:$0xff]  ;;  %v8673_v30 = vld [vmem:[#allocation94_spill] sm:$0xff] }
 0x5c9   : > { %v3617_v6 = vpop.permute.xlu0 %3616  ;;  %v3713_v1 = vsel %vm1782_vm4, %v3681_v43, %v8670_v13  ;;  %v2586_v13 = vld [vmem:[#allocation3 + $0x168] sm:$0xff] }
 0x5ca   : > { %v3920_v47 = vsel %vm1980_vm9, %v3888_v29, %v3617_v6  ;;  %v3745_v45 = vsel %vm1815_vm5, %v3713_v1, %v7059_v22  ;;  %v2632_v6 = vld [vmem:[#allocation3 + $0x92] sm:$0xff] }
 0x5cb   : > { %4465 = vmatmul.msk.f32.vlgmr.msra.gmra.mxu3 %vm2018_vm11, %v3920_v47  ;;  %v3777_v21 = vsel %vm1848_vm7, %v3745_v45, %v7153_v63  ;;  %v2585_v29 = vld [vmem:[#allocation3 + $0x158] sm:$0xff]  ;;  %v2618_v45 = vld [vmem:[#allocation3 + $0x169] sm:$0xff] }
 0x5cc   : > { %3470 = vrot.lane.b32.xlu2 %v2599_v38, %s4573_s13  ;;  %3598 = vrot.lane.b32.xlu1 %v2631_v23, %s4574_s14  ;;  %v3809_v42 = vsel %vm1881_vm6, %v3777_v21, %v7351_v15  ;;  %v2617_v47 = vld [vmem:[#allocation3 + $0x159] sm:$0xff]  ;;  %v3826_v38 = vsel %vm1881_vm6, %v7270_v7, %v7488_v27  ;;  %v2570_v21 = vld [vmem:[#allocation3 + $0xa8] sm:$0xff] }
 0x5cd   : > { %v8671_v23 = vld [vmem:[#allocation5_spill] sm:$0xff] }
 0x5ce   : > { %v3493_v61 = vpop.permute.xlu2 %3492  ;;  %v3585_v10 = vpop.permute.xlu1 %3584 }
 0x5cf   : > { %3376 = vrot.lane.b32.xlu0 %v2584_v0, %s4572_s12  ;;  %v3904_v24 = vsel %vm1980_vm9, %v3872_v11, %v3585_v10  ;;  %v8672_v10 = vld [vmem:[#allocation16_spill] sm:$0xff] }
 0x5d0   : > { %4449 = vmatmul.msk.f32.vlgmr.msra.gmra.mxu1 %vm2018_vm11, %v3904_v24 }
 0x5d1   : > { %v3363_v54 = vpop.permute.xlu0 %3362 }
 0x5d2   : > { %v3857_v59 = vsel %vm1914_vm8, %v3825_v8, %v3363_v54  ;;  %v2649_v54 = vld [vmem:[#allocation3 + $0x15a] sm:$0xff] }
 0x5d3   : > { %v3889_v9 = vsel %vm1947_vm10, %v3857_v59, %v3491_v40 }
 0x5d4   : > { %3504 = vrot.lane.b32.xlu2 %v2616_v41, %s4573_s13  ;;  %3344 = vrot.lane.b32.xlu1 %v2568_v39, %s4572_s12 }
 0x5d6   : > { %v3461_v5 = vpop.permute.xlu2 %3460  ;;  %v3331_v35 = vpop.permute.xlu1 %3330 }
 0x5d7   : > { %3632 = vrot.lane.b32.xlu0 %v2648_v55, %s4574_s14  ;;  %v3841_v31 = vsel %vm1914_vm8, %v3809_v42, %v3331_v35  ;;  %v2601_v35 = vld [vmem:[#allocation3 + $0x99] sm:$0xff] }
 0x5d8   : > { %v3873_v40 = vsel %vm1947_vm10, %v3841_v31, %v3459_v14  ;;  %v3682_v14 = vsel %vm279_vm0, %v8672_v10, %v8671_v23  ;;  %v2633_v55 = vld [vmem:[#allocation3 + $0x9a] sm:$0xff]  ;;  %v2634_v23 = vld [vmem:[#allocation3 + $0xaa] sm:$0xff] }
 0x5d9   : > { %v3619_v34 = vpop.permute.xlu0 %3618  ;;  %v3714_v41 = vsel %vm1782_vm4, %v3682_v14, %v8673_v30  ;;  %v2587_v10 = vld [vmem:[#allocation3 + $0x170] sm:$0xff] }
 0x5da   : > { %v3921_v56 = vsel %vm1980_vm9, %v3889_v9, %v3619_v34  ;;  %v3746_v39 = vsel %vm1815_vm5, %v3714_v41, %v7055_v25  ;;  %v4546_v34 = vld [vmem:[#allocation3 + $0x20] sm:$0xff]  ;;  %v8674_v9 = vld [vmem:[#allocation12_spill] sm:$0xff] }
 0x5db   : > { %4466 = vmatmul.msk.f32.gmra.mxu3 %vm2018_vm11, %v3921_v56  ;;  %v3778_v7 = vsel %vm1848_vm7, %v3746_v39, %v7195_v36  ;;  %v3683_v42 = vsel %vm279_vm0, %v4546_v34, %v8674_v9  ;;  %v8676_v30 = vld [vmem:[#allocation52_spill] sm:$0xff]  ;;  %v4548_v34 = vld [vmem:[#allocation3 + $0x38] sm:$0xff]  ;;  %v8678_v9 = vld [vmem:[#allocation27_spill] sm:$0xff] }
 0x5dc   : > { %3472 = vrot.lane.b32.xlu2 %v2600_v2, %s4573_s13  ;;  %3600 = vrot.lane.b32.xlu1 %v2632_v6, %s4574_s14  ;;  %v3810_v60 = vsel %vm1881_vm6, %v3778_v7, %v7311_v20  ;;  %v2650_v2 = vld [vmem:[#allocation3 + $0x16a] sm:$0xff]  ;;  %v8675_v6 = vld [vmem:[#allocation102_spill] sm:$0xff] }
 0x5de   : > { %v3495_v22 = vpop.permute.xlu2 %3494  ;;  %v3587_v63 = vpop.permute.xlu1 %3586 }
 0x5df   : > { %3378 = vrot.lane.b32.xlu0 %v2585_v29, %s4572_s12  ;;  %v3905_v15 = vsel %vm1980_vm9, %v3873_v40, %v3587_v63  ;;  %v3715_v63 = vsel %vm1782_vm4, %v3683_v42, %v8675_v6  ;;  %v3685_v42 = vsel %vm279_vm0, %v4548_v34, %v8678_v9 }
 0x5e0   : > { %4450 = vmatmul.msk.f32.gmra.mxu1 %vm2018_vm11, %v3905_v15  ;;  %v3747_v29 = vsel %vm1815_vm5, %v3715_v63, %v7029_v49 }
 0x5e1   : > { %v3365_v53 = vpop.permute.xlu0 %3364  ;;  %v3779_v40 = vsel %vm1848_vm7, %v3747_v29, %v7191_v16 }
 0x5e2   : > { %v3858_v0 = vsel %vm1914_vm8, %v3826_v38, %v3365_v53  ;;  %v2602_v38 = vld [vmem:[#allocation3 + $0xa9] sm:$0xff] }
 0x5e3   : > { %v3890_v8 = vsel %vm1947_vm10, %v3858_v0, %v3493_v61  ;;  %v2619_v0 = vld [vmem:[#allocation3 + $0x171] sm:$0xff] }
 0x5e4   : > { %3506 = vrot.lane.b32.xlu2 %v2617_v47, %s4573_s13  ;;  %3346 = vrot.lane.b32.xlu1 %v2569_v19, %s4572_s12 }
 0x5e6   : > { %v3463_v11 = vpop.permute.xlu2 %3462  ;;  %v3333_v24 = vpop.permute.xlu1 %3332 }
 0x5e7   : > { %3634 = vrot.lane.b32.xlu0 %v2649_v54, %s4574_s14  ;;  %v3842_v59 = vsel %vm1914_vm8, %v3810_v60, %v3333_v24  ;;  %v2571_v24 = vld [vmem:[#allocation3 + $0xb0] sm:$0xff] }
 0x5e8   : > { %v3874_v61 = vsel %vm1947_vm10, %v3842_v59, %v3461_v5  ;;  %v4547_v54 = vld [vmem:[#allocation3 + $0x30] sm:$0xff] }
 0x5e9   : > { %v3621_v27 = vpop.permute.xlu0 %3620  ;;  %v3684_v41 = vsel %vm279_vm0, %v4547_v54, %v8676_v30  ;;  %v2636_v30 = vld [vmem:[#allocation3 + $0xc2] sm:$0xff] }
 0x5ea   : > { %v3922_v43 = vsel %vm1980_vm9, %v3890_v8, %v3621_v27  ;;  %v2651_v27 = vld [vmem:[#allocation3 + $0x172] sm:$0xff]  ;;  %v8677_v8 = vld [vmem:[#allocation83_spill] sm:$0xff] }
 0x5eb   : > { %4467 = vmatmul.msk.f32.gmra.mxu3 %vm2018_vm11, %v3922_v43  ;;  %v3716_v60 = vsel %vm1782_vm4, %v3684_v41, %v8677_v8  ;;  %v8683_v41 = vld [vmem:[#allocation144_spill] sm:$0xff] }
 0x5ec   : > { %3474 = vrot.lane.b32.xlu2 %v2601_v35, %s4573_s13  ;;  %3602 = vrot.lane.b32.xlu1 %v2633_v55, %s4574_s14  ;;  %v3748_v43 = vsel %vm1815_vm5, %v3716_v60, %v7071_v51 }
 0x5ed   : > { %v3780_v59 = vsel %vm1848_vm7, %v3748_v43, %v7165_v3  ;;  %v2603_v3 = vld [vmem:[#allocation3 + $0xb1] sm:$0xff] }
 0x5ee   : > { %v3497_v25 = vpop.permute.xlu2 %3496  ;;  %v3589_v36 = vpop.permute.xlu1 %3588 }
 0x5ef   : > { %3380 = vrot.lane.b32.xlu0 %v2586_v13, %s4572_s12  ;;  %v3906_v20 = vsel %vm1980_vm9, %v3874_v61, %v3589_v36  ;;  %v2588_v61 = vld [vmem:[#allocation3 + $0x180] sm:$0xff] }
 0x5f0   : > { %4451 = vmatmul.msk.f32.gmra.mxu1 %vm2018_vm11, %v3906_v20 }
 0x5f1   : > { %v3367_v1 = vpop.permute.xlu0 %3366 }
 0x5f2   : > { %v3859_v5 = vsel %vm1914_vm8, %v7482_v4, %v3367_v1  ;;  %v3811_v4 = vsel %vm1881_vm6, %v3779_v40, %v7365_v32 }
 0x5f3   : > { %v3891_v53 = vsel %vm1947_vm10, %v3859_v5, %v3495_v22 }
 0x5f4   : > { %3508 = vrot.lane.b32.xlu2 %v2618_v45, %s4573_s13  ;;  %3348 = vrot.lane.b32.xlu1 %v2570_v21, %s4572_s12  ;;  %v2635_v45 = vld [vmem:[#allocation3 + $0xb2] sm:$0xff]  ;;  %v2652_v21 = vld [vmem:[#allocation3 + $0x182] sm:$0xff] }
 0x5f6   : > { %v3465_v56 = vpop.permute.xlu2 %3464  ;;  %v3335_v31 = vpop.permute.xlu1 %3334 }
 0x5f7   : > { %3636 = vrot.lane.b32.xlu0 %v2650_v2, %s4574_s14  ;;  %v3843_v19 = vsel %vm1914_vm8, %v3811_v4, %v3335_v31 }
 0x5f8   : > { %v3875_v22 = vsel %vm1947_vm10, %v3843_v19, %v3463_v11  ;;  %v2572_v19 = vld [vmem:[#allocation3 + $0xc0] sm:$0xff] }
 0x5f9   : > { %v3623_v15 = vpop.permute.xlu0 %3622 }
 0x5fa   : > { %v3923_v47 = vsel %vm1980_vm9, %v3891_v53, %v3623_v15  ;;  %v8680_v53 = vld [vmem:[#allocation160_spill] sm:$0xff] }
 0x5fb   : > { %4468 = vmatmul.msk.f32.gmra.mxu3 %vm2018_vm11, %v3923_v47 }
 0x5fc   : > { %3476 = vrot.lane.b32.xlu2 %v2602_v38, %s4573_s13  ;;  %3604 = vrot.lane.b32.xlu1 %v2634_v23, %s4574_s14 }
 0x5fe   : > { %v3499_v49 = vpop.permute.xlu2 %3498  ;;  %v3591_v16 = vpop.permute.xlu1 %3590 }
 0x5ff   : > { %3382 = vrot.lane.b32.xlu0 %v2587_v10, %s4572_s12  ;;  %v3907_v32 = vsel %vm1980_vm9, %v3875_v22, %v3591_v16  ;;  %v2589_v16 = vld [vmem:[#allocation3 + $0x188] sm:$0xff]  ;;  %v8681_v10 = vld [vmem:[#allocation21_spill] sm:$0xff] }
 0x600   : > { %4452 = vmatmul.msk.f32.gmra.mxu1 %vm2018_vm11, %v3907_v32  ;;  %v4549_v22 = vld [vmem:[#allocation3 + $0x48] sm:$0xff]  ;;  %v8682_v32 = vld [vmem:[#allocation4_spill] sm:$0xff] }
 0x601   : > { %v3369_v14 = vpop.permute.xlu0 %3368 }
 0x602   : > { %v3860_v11 = vsel %vm1914_vm8, %v7418_v18, %v3369_v14  ;;  %v3812_v18 = vsel %vm1881_vm6, %v3780_v59, %v7361_v46  ;;  %v3686_v14 = vsel %vm279_vm0, %v4549_v22, %v8682_v32  ;;  %v8686_v59 = vld [vmem:[#allocation106_spill] sm:$0xff] }
 0x603   : > { %v3892_v55 = vsel %vm1947_vm10, %v3860_v11, %v3497_v25  ;;  %v3718_v11 = vsel %vm1782_vm4, %v3686_v14, %v8683_v41  ;;  %v2606_v14 = vld [vmem:[#allocation3 + $0xd9] sm:$0xff] }
 0x604   : > { %3510 = vrot.lane.b32.xlu2 %v2619_v0, %s4573_s13  ;;  %3350 = vrot.lane.b32.xlu1 %v2571_v24, %s4572_s12 }
 0x606   : > { %v3467_v39 = vpop.permute.xlu2 %3466  ;;  %v3337_v7 = vpop.permute.xlu1 %3336 }
 0x607   : > { %3638 = vrot.lane.b32.xlu0 %v2651_v27, %s4574_s14  ;;  %v3844_v13 = vsel %vm1914_vm8, %v3812_v18, %v3337_v7  ;;  %v2653_v18 = vld [vmem:[#allocation3 + $0x18a] sm:$0xff] }
 0x608   : > { %v3876_v1 = vsel %vm1947_vm10, %v3844_v13, %v3465_v56 }
 0x609   : > { %v3625_v35 = vpop.permute.xlu0 %3624 }
 0x60a   : > { %v3924_v36 = vsel %vm1980_vm9, %v3892_v55, %v3625_v35 }
 0x60b   : > { %4469 = vmatmul.msk.f32.gmra.mxu3 %vm2018_vm11, %v3924_v36 }
 0x60c   : > { %3256 = vrot.lane.b32.xlu2 %v2650_v2, %s4571_s11  ;;  %3384 = vrot.lane.b32.xlu1 %v2588_v61, %s4572_s12  ;;  %v8679_v2 = vld [vmem:[#allocation49_spill] sm:$0xff]  ;;  %v2573_v61 = vld [vmem:[#allocation3 + $0xc8] sm:$0xff] }
 0x60d   : > { %v3717_v6 = vsel %vm1782_vm4, %v3685_v42, %v8679_v2  ;;  %v8689_v2 = vld [vmem:[#allocation137_spill] sm:$0xff] }
 0x60e   : > { %v3501_v51 = vpop.permute.xlu2 %3500  ;;  %v3593_v20 = vpop.permute.xlu1 %3592  ;;  %v3749_v63 = vsel %vm1815_vm5, %v3717_v6, %v7067_v62 }
 0x60f   : > { %3478 = vrot.lane.b32.xlu0 %v2603_v3, %s4573_s13  ;;  %v3908_v46 = vsel %vm1980_vm9, %v3876_v1, %v3593_v20  ;;  %v3781_v29 = vsel %vm1848_vm7, %v3749_v63, %v7207_v33  ;;  %v2605_v1 = vld [vmem:[#allocation3 + $0xc9] sm:$0xff]  ;;  %v8690_v63 = vld [vmem:[#allocation70_spill] sm:$0xff] }
 0x610   : > { %4453 = vmatmul.msk.f32.gmra.mxu1 %vm2018_vm11, %v3908_v46  ;;  %v2637_v46 = vld [vmem:[#allocation3 + $0xca] sm:$0xff] }
 0x611   : > { %v3371_v25 = vpop.permute.xlu0 %3370 }
 0x612   : > { %v3861_v5 = vsel %vm1914_vm8, %v7519_v17, %v3371_v25  ;;  %v3813_v17 = vsel %vm1881_vm6, %v3781_v29, %v8680_v53  ;;  %v2590_v25 = vld [vmem:[#allocation3 + $0x198] sm:$0xff] }
 0x613   : > { %v3893_v15 = vsel %vm1947_vm10, %v3861_v5, %v3499_v49  ;;  %v2622_v53 = vld [vmem:[#allocation3 + $0x199] sm:$0xff] }
 0x614   : > { %3606 = vrot.lane.b32.xlu2 %v2635_v45, %s4574_s14  ;;  %3640 = vrot.lane.b32.xlu1 %v2652_v21, %s4574_s14  ;;  %v4550_v45 = vld [vmem:[#allocation3 + $0x50] sm:$0xff] }
 0x616   : > { %v3469_v56 = vpop.permute.xlu2 %3468  ;;  %v3339_v31 = vpop.permute.xlu1 %3338 }
 0x617   : > { %3512 = vrot.lane.b32.xlu0 %v7121_v50, %s4573_s13  ;;  %v3845_v47 = vsel %vm1914_vm8, %v3813_v17, %v3339_v31  ;;  %v2604_v50 = vld [vmem:[#allocation3 + $0xc1] sm:$0xff] }
 0x618   : > { %v3877_v38 = vsel %vm1947_vm10, %v3845_v47, %v3467_v39  ;;  %v8684_v39 = vld [vmem:[#allocation97_spill] sm:$0xff]  ;;  %v8691_v17 = vld [vmem:[#allocation75_spill] sm:$0xff] }
 0x619   : > { %v3627_v40 = vpop.permute.xlu0 %3626  ;;  %v3750_v7 = vsel %vm1815_vm5, %v3718_v11, %v8684_v39  ;;  %v8694_v11 = vld [vmem:[#allocation124_spill] sm:$0xff] }
 0x61a   : > { %v3925_v4 = vsel %vm1980_vm9, %v3893_v15, %v3627_v40 }
 0x61b   : > { %4470 = vmatmul.msk.f32.gmra.mxu3 %vm2018_vm11, %v3925_v4 }
 0x61c   : > { %3352 = vrot.lane.b32.xlu2 %v2572_v19, %s4572_s12  ;;  %3480 = vrot.lane.b32.xlu1 %v2604_v50, %s4573_s13  ;;  %v2574_v19 = vld [vmem:[#allocation3 + $0xd8] sm:$0xff] }
 0x61d   : > { %v2654_v50 = vld [vmem:[#allocation3 + $0x19a] sm:$0xff] }
 0x61e   : > { %v3503_v62 = vpop.permute.xlu2 %3502  ;;  %v3595_v33 = vpop.permute.xlu1 %3594 }
 0x61f   : > { %3258 = vrot.lane.b32.xlu0 %v2651_v27, %s4571_s11  ;;  %v3909_v23 = vsel %vm1980_vm9, %v3877_v38, %v3595_v33  ;;  %v8685_v27 = vld [vmem:[#allocation105_spill] sm:$0xff] }
 0x620   : > { %4454 = vmatmul.msk.f32.gmra.mxu1 %vm2018_vm11, %v3909_v23  ;;  %v3782_v8 = vsel %vm1848_vm7, %v3750_v7, %v8685_v27 }
 0x621   : > { %v3373_v49 = vpop.permute.xlu0 %3372 }
 0x622   : > { %v3862_v0 = vsel %vm1914_vm8, %v7510_v58, %v3373_v49  ;;  %v3814_v58 = vsel %vm1881_vm6, %v3782_v8, %v8686_v59  ;;  %v8695_v8 = vld [vmem:[#allocation24_spill] sm:$0xff] }
 0x623   : > { %v3894_v43 = vsel %vm1947_vm10, %v3862_v0, %v3501_v51  ;;  %v4551_v0 = vld [vmem:[#allocation3 + $0x60] sm:$0xff]  ;;  %v7794_v59 = vld [vmem:[%s8089_s5] ss:$0 sm:$0xff] }
 0x624   : > { %3386 = vrot.lane.b32.xlu2 %v2589_v16, %s4572_s12  ;;  %3514 = vrot.lane.b32.xlu1 %v8681_v10, %s4573_s13  ;;  %v2591_v16 = vld [vmem:[#allocation3 + $0x1a0] sm:$0xff] }
 0x626   : > { %v3471_v24 = vpop.permute.xlu2 %3470  ;;  %v3341_v54 = vpop.permute.xlu1 %3340 }
 0x627   : > { %3608 = vrot.lane.b32.xlu0 %v2636_v30, %s4574_s14  ;;  %v3846_v55 = vsel %vm1914_vm8, %v3814_v58, %v3341_v54  ;;  %v8693_v30 = vld [vmem:[#allocation156_spill] sm:$0xff]  ;;  %v8696_v58 = vld [vmem:[#allocation37_spill] sm:$0xff] }
 0x628   : > { %v3878_v20 = vsel %vm1947_vm10, %v3846_v55, %v3469_v56  ;;  %v8688_v56 = vld [vmem:[#allocation123_spill] sm:$0xff]  ;;  %v2638_v55 = vld [vmem:[#allocation3 + $0xda] sm:$0xff] }
 0x629   : > { %v3629_v60 = vpop.permute.xlu0 %3628 }
 0x62a   : > { %v3926_v35 = vsel %vm1980_vm9, %v3894_v43, %v3629_v60 }
 0x62b   : > { %4471 = vmatmul.msk.f32.gmra.mxu3 %vm2018_vm11, %v3926_v35 }
 0x62c   : > { %3642 = vrot.lane.b32.xlu2 %v2653_v18, %s4574_s14  ;;  %3260 = vrot.lane.b32.xlu1 %v2652_v21, %s4571_s11  ;;  %v8687_v21 = vld [vmem:[#allocation55_spill] sm:$0xff] }
 0x62d   : > { %v3687_v34 = vsel %vm279_vm0, %v4550_v45, %v8687_v21 }
 0x62e   : > { %v3505_v36 = vpop.permute.xlu2 %3504  ;;  %v3597_v13 = vpop.permute.xlu1 %3596  ;;  %v3719_v31 = vsel %vm1782_vm4, %v3687_v34, %v8688_v56  ;;  %v4169_v34 = vld [vmem:[#allocation2 + $0xd9] sm:$0xff] }
 0x62f   : > { %3354 = vrot.lane.b32.xlu0 %v2573_v61, %s4572_s12  ;;  %v3910_v51 = vsel %vm1980_vm9, %v3878_v20, %v3597_v13  ;;  %v3751_v6 = vsel %vm1815_vm5, %v3719_v31, %v8689_v2  ;;  %v2623_v13 = vld [vmem:[#allocation3 + $0x1a1] sm:$0xff] }
 0x630   : > { %4455 = vmatmul.msk.f32.gmra.mxu1 %vm2018_vm11, %v3910_v51  ;;  %v3783_v29 = vsel %vm1848_vm7, %v3751_v6, %v8690_v63  ;;  %v2575_v2 = vld [vmem:[#allocation3 + $0xe0] sm:$0xff] }
 0x631   : > { %v3375_v3 = vpop.permute.xlu0 %3374  ;;  %v2639_v6 = vld [vmem:[#allocation3 + $0xe2] sm:$0xff] }
 0x632   : > { %v3863_v9 = vsel %vm1914_vm8, %v7440_v26, %v3375_v3  ;;  %v3815_v26 = vsel %vm1881_vm6, %v3783_v29, %v8691_v17  ;;  %v4552_v17 = vld [vmem:[#allocation3 + $0x68] sm:$0xff] }
 0x633   : > { %v3895_v15 = vsel %vm1947_vm10, %v3863_v9, %v3503_v62 }
 0x634   : > { %3482 = vrot.lane.b32.xlu2 %v2605_v1, %s4573_s13  ;;  %3610 = vrot.lane.b32.xlu1 %v2637_v46, %s4574_s14  ;;  %v4153_v1 = vld [vmem:[#allocation2 + $0x19] sm:$0xff] }
 0x636   : > { %v3473_v42 = vpop.permute.xlu2 %3472  ;;  %v3343_v5 = vpop.permute.xlu1 %3342 }
 0x637   : > { %3388 = vrot.lane.b32.xlu0 %v2590_v25, %s4572_s12  ;;  %v3847_v47 = vsel %vm1914_vm8, %v3815_v26, %v3343_v5  ;;  %v8697_v26 = vld [vmem:[#allocation59_spill] sm:$0xff] }
 0x638   : > { %v3879_v62 = vsel %vm1947_vm10, %v3847_v47, %v3471_v24  ;;  %v8692_v24 = vld [vmem:[#allocation14_spill] sm:$0xff] }
 0x639   : > { %v3631_v40 = vpop.permute.xlu0 %3630  ;;  %v3688_v54 = vsel %vm279_vm0, %v4551_v0, %v8692_v24 }
 0x63a   : > { %v3927_v4 = vsel %vm1980_vm9, %v3895_v15, %v3631_v40  ;;  %v3720_v41 = vsel %vm1782_vm4, %v3688_v54, %v8693_v30 }
 0x63b   : > { %4472 = vmatmul.msk.f32.gmra.mxu3 %vm2018_vm11, %v3927_v4  ;;  %v3752_v39 = vsel %vm1815_vm5, %v3720_v41, %v8694_v11  ;;  %v3689_v4 = vsel %vm279_vm0, %v4552_v17, %v8697_v26  ;;  %v4154_v41 = vld [vmem:[#allocation2 + $0x21] sm:$0xff] }
 0x63c   : > { %3516 = vrot.lane.b32.xlu2 %v2622_v53, %s4573_s13  ;;  %3356 = vrot.lane.b32.xlu1 %v2574_v19, %s4572_s12  ;;  %v3784_v60 = vsel %vm1848_vm7, %v3752_v39, %v8695_v8  ;;  %v2607_v53 = vld [vmem:[#allocation3 + $0xe1] sm:$0xff]  ;;  %v8698_v19 = vld [vmem:[#allocation69_spill] sm:$0xff] }
 0x63d   : > { %v3816_v35 = vsel %vm1881_vm6, %v3784_v60, %v8696_v58 }
 0x63e   : > { %v7768_v33 = vpop.permute.xlu2 %3506  ;;  %v3599_v38 = vpop.permute.xlu1 %3598 }
 0x63f   : > { %3644 = vrot.lane.b32.xlu0 %v2654_v50, %s4574_s14  ;;  %v3911_v23 = vsel %vm1980_vm9, %v3879_v62, %v3599_v38  ;;  %v3721_v50 = vsel %vm1782_vm4, %v3689_v4, %v8698_v19  ;;  %v8699_v38 = vld [vmem:[#allocation38_spill] sm:$0xff] }
 0x640   : > { %4456 = vmatmul.msk.f32.gmra.mxu1 %vm2018_vm11, %v3911_v23  ;;  %v3753_v62 = vsel %vm1815_vm5, %v3721_v50, %v8699_v38  ;;  %v4171_v4 = vld [vmem:[#allocation2 + $0xf1] sm:$0xff] }
 0x641   : > { %v3377_v49 = vpop.permute.xlu0 %3376 }
 0x642   : > { %v3864_v10 = vsel %vm1914_vm8, %v7546_v48, %v3377_v49  ;;  %v2655_v48 = vld [vmem:[#allocation3 + $0x1a2] sm:$0xff]  ;;  %v8700_v49 = vld [vmem:[#allocation20_spill] sm:$0xff] }
 0x643   : > { %v3896_v27 = vsel %vm1947_vm10, %v3864_v10, %v3505_v36  ;;  %v7805_v36 = vld [vmem:[%s8090_s6] ss:$0 sm:$0xff] }
 0x644   : > { %3262 = vrot.lane.b32.xlu2 %v2653_v18, %s4571_s11  ;;  %3390 = vrot.lane.b32.xlu1 %v2591_v16, %s4572_s12  ;;  %v3785_v16 = vsel %vm1848_vm7, %v3753_v62, %v8700_v49 }
 0x646   : > { %v7778_v22 = vpop.permute.xlu2 %3474  ;;  %v3345_v32 = vpop.permute.xlu1 %3344 }
 0x647   : > { %3484 = vrot.lane.b32.xlu0 %v2606_v14, %s4573_s13  ;;  %v3848_v18 = vsel %vm1914_vm8, %v3816_v35, %v3345_v32  ;;  %v8701_v32 = vld [vmem:[#allocation119_spill] sm:$0xff] }
 0x648   : > { %v3880_v45 = vsel %vm1947_vm10, %v3848_v18, %v3473_v42  ;;  %v3817_v14 = vsel %vm1881_vm6, %v3785_v16, %v8701_v32 }
 0x649   : > { %v3633_v7 = vpop.permute.xlu0 %3632 }
 0x64a   : > { %v3928_v43 = vsel %vm1980_vm9, %v3896_v27, %v3633_v7  ;;  %v4170_v27 = vld [vmem:[#allocation2 + $0xe1] sm:$0xff] }
 0x64b   : > { %4473 = vmatmul.msk.f32.gmra.mxu3 %vm2018_vm11, %v3928_v43 }
 0x64c   : > { %3612 = vrot.lane.b32.xlu2 %v2638_v55, %s4574_s14  ;;  %3646 = vrot.lane.b32.xlu1 %v2655_v48, %s4574_s14 }
 0x64d   : > { %v4057_v61 = vpop.f32.mrf.mxu1 }
 0x64e   : > { %v4188_v20 = vmul.f32 %v7794_v59, %v4057_v61  ;;  %v4105_v51 = vpop.f32.mrf.mxu3  ;;  %v7808_v3 = vpop.permute.xlu2 %3508  ;;  %v8702_v61 = vld [vmem:[#allocation40_spill] sm:$0xff] }
 0x64f   : > { %v4204_v46 = vmul.f32 %v7794_v59, %v4105_v51  ;;  %v3601_v25 = vpop.permute.xlu1 %3600  ;;  %3518 = vrot.lane.b32.xlu0 %v2623_v13, %s4573_s13  ;;  %v4553_v13 = vld [vmem:[#allocation3 + $0x78] sm:$0xff] }
 0x650   : > { %v4223_v21 = vadd.f32 %v7805_v36, %v4188_v20  ;;  %v3912_v9 = vsel %vm1980_vm9, %v3880_v45, %v3601_v25  ;;  %v3690_v20 = vsel %vm279_vm0, %v4553_v13, %v8702_v61  ;;  %v8704_v25 = vld [vmem:[#allocation159_spill] sm:$0xff] }
 0x651   : > { %v4239_v5 = vadd.f32 %v7805_v36, %v4204_v46  ;;  %4457 = vmatmul.msk.f32.gmra.mxu1 %vm2018_vm11, %v3912_v9  ;;  %v3379_v56 = vpop.permute.xlu0 %3378  ;;  %v8705_v9 = vld [vmem:[#allocation92_spill] sm:$0xff] }
 0x652   : > { %v4255_v31 = vadd.f32 %v4223_v21, %v4153_v1  ;;  %v3865_v40 = vsel %vm1914_vm8, %v7538_v37, %v3379_v56  ;;  %v8703_v1 = vld [vmem:[#allocation34_spill] sm:$0xff] }
 0x653   : > { %v4271_v42 = vadd.f32 %v4239_v5, %v4169_v34  ;;  %v3897_v37 = vsel %vm1947_vm10, %v3865_v40, %v7768_v33  ;;  %v3722_v46 = vsel %vm1782_vm4, %v3690_v20, %v8703_v1 }
 0x654   : > { %v4287_v63 = vmax.f32 %v4255_v31, 0.0  ;;  %3358 = vrot.lane.b32.xlu2 %v2575_v2, %s4572_s12  ;;  %3614 = vrot.lane.b32.xlu1 %v2639_v6, %s4574_s14  ;;  %v3754_v45 = vsel %vm1815_vm5, %v3722_v46, %v8704_v25  ;;  %v8706_v31 = vld [vmem:[#allocation112_spill] sm:$0xff] }
 0x655   : > { %v4303_v29 = vmax.f32 %v4271_v42, 0.0 }
 0x656   : > { %4319 = vst.msk [vmem:[%s7822_s16] sm:$0xff] %vm279_vm0, %v4287_v63  ;;  %v3477_v15 = vpop.permute.xlu2 %3476 }
 0x657   : > { %4335 = vst.msk [vmem:[%s7822_s16 + $0x80] sm:$0xff] %vm279_vm0, %v4303_v29  ;;  %v3347_v47 = vpop.permute.xlu1 %3346  ;;  %3486 = vrot.lane.b32.xlu0 %v2607_v53, %s4573_s13 }
 0x658   : > { %v3849_v0 = vsel %vm1914_vm8, %v3817_v14, %v3347_v47 }
 0x659   : > { %v3635_v23 = vpop.permute.xlu0 %3634  ;;  %v3881_v39 = vsel %vm1947_vm10, %v3849_v0, %v7778_v22  ;;  %v4554_v0 = vld [vmem:[#allocation3 + $0x80] sm:$0xff] }
 0x65a   : > { %v3929_v10 = vsel %vm1980_vm9, %v3897_v37, %v3635_v23 }
 0x65b   : > { %4474 = vmatmul.msk.f32.gmra.mxu3 %vm2018_vm11, %v3929_v10 }
 0x65d   : > { %v4060_v24 = vpop.f32.mrf.mxu1 }
 0x65e   : > { %v4189_v54 = vmul.f32 %v7794_v59, %v4060_v24  ;;  %v4108_v30 = vpop.f32.mrf.mxu3  ;;  %v3511_v48 = vpop.permute.xlu2 %3510  ;;  %v8707_v24 = vld [vmem:[#allocation15_spill] sm:$0xff] }
 0x65f   : > { %v4205_v33 = vmul.f32 %v7794_v59, %v4108_v30  ;;  %v3603_v11 = vpop.permute.xlu1 %3602  ;;  %v8708_v30 = vld [vmem:[#allocation91_spill] sm:$0xff] }
 0x660   : > { %v4224_v7 = vadd.f32 %v7805_v36, %v4189_v54  ;;  %v3913_v8 = vsel %vm1980_vm9, %v3881_v39, %v3603_v11  ;;  %v3691_v54 = vsel %vm279_vm0, %v4554_v0, %v8707_v24  ;;  %v8709_v11 = vld [vmem:[#allocation138_spill] sm:$0xff] }
 0x661   : > { %v4240_v60 = vadd.f32 %v7805_v36, %v4205_v33  ;;  %4458 = vmatmul.msk.f32.gmra.mxu1 %vm2018_vm11, %v3913_v8  ;;  %v3381_v43 = vpop.permute.xlu0 %3380 }
 0x662   : > { %v4256_v58 = vadd.f32 %v4224_v7, %v4154_v41  ;;  %v3866_v22 = vsel %vm1914_vm8, %v7479_v57, %v3381_v43  ;;  %v3786_v57 = vsel %vm1848_vm7, %v3754_v45, %v8705_v9  ;;  %v3723_v41 = vsel %vm1782_vm4, %v3691_v54, %v8708_v30  ;;  %v4555_v45 = vld [vmem:[#allocation3 + $0x150] sm:$0xff]  ;;  %v8717_v54 = vld [vmem:[#allocation67_spill] sm:$0xff] }
 0x663   : > { %v4272_v35 = vadd.f32 %v4240_v60, %v4170_v27  ;;  %v3898_v34 = vsel %vm1947_vm10, %v3866_v22, %v7808_v3  ;;  %v3818_v42 = vsel %vm1881_vm6, %v3786_v57, %v8706_v31  ;;  %v4155_v3 = vld [vmem:[#allocation2 + $0x31] sm:$0xff]  ;;  %v4156_v60 = vld [vmem:[#allocation2 + $0x39] sm:$0xff] }
 0x664   : > { %v4288_v55 = vmax.f32 %v4256_v58, 0.0  ;;  %v4172_v22 = vld [vmem:[#allocation2 + $0xf9] sm:$0xff] }
 0x665   : > { %v4304_v18 = vmax.f32 %v4272_v35, 0.0  ;;  %v8711_v35 = vld [vmem:[#allocation74_spill] sm:$0xff]  ;;  %v8713_v57 = vld [vmem:[#allocation96_spill] sm:$0xff] }
 0x666   : > { %4320 = vst.msk [vmem:[%s7822_s16 + $0x8] sm:$0xff] %vm279_vm0, %v4288_v55  ;;  %v7872_v5 = vpop.permute.xlu2 %3256 }
 0x667   : > { %4336 = vst.msk [vmem:[%s7822_s16 + $0x88] sm:$0xff] %vm279_vm0, %v4304_v18  ;;  %v3349_v51 = vpop.permute.xlu1 %3348 }
 0x668   : > { %v3850_v2 = vsel %vm1914_vm8, %v3818_v42, %v3349_v51  ;;  %v8714_v42 = vld [vmem:[#allocation22_spill] sm:$0xff] }
 0x669   : > { %v3637_v21 = vpop.permute.xlu0 %3636  ;;  %v3882_v17 = vsel %vm1947_vm10, %v3850_v2, %v3477_v15 }
 0x66a   : > { %v3930_v56 = vsel %vm1980_vm9, %v3898_v34, %v3637_v21  ;;  %v8712_v21 = vld [vmem:[#allocation152_spill] sm:$0xff] }
 0x66b   : > { %4475 = vmatmul.msk.f32.gmra.mxu3 %vm2018_vm11, %v3930_v56  ;;  %v3708_v34 = vsel %vm279_vm0, %v4555_v45, %v8712_v21  ;;  %v4174_v21 = vld [vmem:[#allocation2 + $0x111] sm:$0xff] }
 0x66c   : > { %v3740_v56 = vsel %vm1782_vm4, %v3708_v34, %v8713_v57 }
 0x66d   : > { %v4063_v6 = vpop.f32.mrf.mxu1  ;;  %v3772_v2 = vsel %vm1815_vm5, %v3740_v56, %v8714_v42 }
 0x66e   : > { %v4190_v63 = vmul.f32 %v7794_v59, %v4063_v6  ;;  %v4111_v29 = vpop.f32.mrf.mxu3  ;;  %v3607_v37 = vpop.permute.xlu2 %3606  ;;  %v8715_v6 = vld [vmem:[#allocation132_spill] sm:$0xff] }
 0x66f   : > { %v4206_v40 = vmul.f32 %v7794_v59, %v4111_v29  ;;  %v3605_v53 = vpop.permute.xlu1 %3604 }
 0x670   : > { %v4225_v26 = vadd.f32 %v7805_v36, %v4190_v63  ;;  %v3914_v47 = vsel %vm1980_vm9, %v3882_v17, %v3605_v53  ;;  %v3804_v63 = vsel %vm1848_vm7, %v3772_v2, %v8715_v6 }
 0x671   : > { %v4241_v19 = vadd.f32 %v7805_v36, %v4206_v40  ;;  %4459 = vmatmul.msk.f32.gmra.mxu1 %vm2018_vm11, %v3914_v47  ;;  %v3383_v50 = vpop.permute.xlu0 %3382 }
 0x672   : > { %v4257_v38 = vadd.f32 %v4225_v26, %v4155_v3  ;;  %v3867_v15 = vsel %vm1914_vm8, %v7558_v28, %v3383_v50  ;;  %v3755_v28 = vsel %vm1815_vm5, %v3723_v41, %v8709_v11  ;;  %v3836_v3 = vsel %vm1881_vm6, %v3804_v63, %v7872_v5 }
 0x673   : > { %v4273_v62 = vadd.f32 %v4241_v19, %v4171_v4  ;;  %v3899_v32 = vsel %vm1947_vm10, %v3867_v15, %v3511_v48  ;;  %v8710_v48 = vld [vmem:[#allocation125_spill] sm:$0xff] }
 0x674   : > { %v4289_v23 = vmax.f32 %v4257_v38, 0.0  ;;  %v3787_v8 = vsel %vm1848_vm7, %v3755_v28, %v8710_v48  ;;  %v4157_v38 = vld [vmem:[#allocation2 + $0x49] sm:$0xff]  ;;  %v8720_v48 = vld [vmem:[#allocation71_spill] sm:$0xff] }
 0x675   : > { %v4305_v49 = vmax.f32 %v4273_v62, 0.0  ;;  %v3819_v55 = vsel %vm1881_vm6, %v3787_v8, %v8711_v35  ;;  %v8719_v28 = vld [vmem:[#allocation57_spill] sm:$0xff] }
 0x676   : > { %4321 = vst.msk [vmem:[%s7822_s16 + $0x10] sm:$0xff] %vm279_vm0, %v4289_v23  ;;  %v3353_v39 = vpop.permute.xlu2 %3352 }
 0x677   : > { %4337 = vst.msk [vmem:[%s7822_s16 + $0x90] sm:$0xff] %vm279_vm0, %v4305_v49  ;;  %v3351_v16 = vpop.permute.xlu1 %3350 }
 0x678   : > { %v3851_v13 = vsel %vm1914_vm8, %v3819_v55, %v3351_v16 }
 0x679   : > { %v3639_v10 = vpop.permute.xlu0 %3638 }
 0x67a   : > { %v3931_v14 = vsel %vm1980_vm9, %v3899_v32, %v3639_v10  ;;  %v4556_v32 = vld [vmem:[#allocation3 + $0x90] sm:$0xff] }
 0x67b   : > { %4476 = vmatmul.msk.f32.gmra.mxu3 %vm2018_vm11, %v3931_v14  ;;  %v8716_v14 = vld [vmem:[#allocation45_spill] sm:$0xff] }
 0x67c   : > { %v3692_v0 = vsel %vm279_vm0, %v4556_v32, %v8716_v14 }
 0x67d   : > { %v4066_v33 = vpop.f32.mrf.mxu1  ;;  %v3724_v30 = vsel %vm1782_vm4, %v3692_v0, %v8717_v54  ;;  %v8722_v54 = vld [vmem:[#allocation98_spill] sm:$0xff] }
 0x67e   : > { %v4191_v7 = vmul.f32 %v7794_v59, %v4066_v33  ;;  %v4114_v27 = vpop.f32.mrf.mxu3  ;;  %v3387_v40 = vpop.permute.xlu2 %3386  ;;  %v8718_v33 = vld [vmem:[#allocation11_spill] sm:$0xff] }
 0x67f   : > { %v4207_v43 = vmul.f32 %v7794_v59, %v4114_v27  ;;  %v3385_v58 = vpop.permute.xlu1 %3384 }
 0x680   : > { %v4226_v18 = vadd.f32 %v7805_v36, %v4191_v7  ;;  %v3868_v53 = vsel %vm1914_vm8, %v3836_v3, %v3385_v58  ;;  %v3756_v7 = vsel %vm1815_vm5, %v3724_v30, %v8719_v28 }
 0x681   : > { %v4242_v61 = vadd.f32 %v7805_v36, %v4207_v43  ;;  %v3479_v20 = vpop.permute.xlu0 %3478  ;;  %v3788_v8 = vsel %vm1848_vm7, %v3756_v7, %v8720_v48  ;;  %v4557_v7 = vld [vmem:[#allocation3 + $0x170] sm:$0xff] }
 0x682   : > { %v4258_v51 = vadd.f32 %v4226_v18, %v4156_v60  ;;  %v3883_v1 = vsel %vm1947_vm10, %v3851_v13, %v3479_v20  ;;  %v3820_v60 = vsel %vm1881_vm6, %v3788_v8, %v7424_v12  ;;  %v8724_v8 = vld [vmem:[#allocation116_spill] sm:$0xff] }
 0x683   : > { %v4274_v46 = vadd.f32 %v4242_v61, %v4172_v22  ;;  %v3915_v25 = vsel %vm1980_vm9, %v3883_v1, %v3607_v37  ;;  %v4173_v37 = vld [vmem:[#allocation2 + $0x109] sm:$0xff]  ;;  %v3852_v35 = vsel %vm1914_vm8, %v3820_v60, %v3353_v39  ;;  %v4158_v1 = vld [vmem:[#allocation2 + $0x51] sm:$0xff] }
 0x684   : > { %v4290_v9 = vmax.f32 %v4258_v51, 0.0  ;;  %4460 = vmatmul.msk.f32.gmra.mxu1 %vm2018_vm11, %v3915_v25 }
 0x685   : > { %v4306_v31 = vmax.f32 %v4274_v46, 0.0 }
 0x686   : > { %4322 = vst.msk [vmem:[%s7822_s16 + $0x18] sm:$0xff] %vm279_vm0, %v4290_v9  ;;  %v3643_v16 = vpop.permute.xlu2 %3642 }
 0x687   : > { %4338 = vst.msk [vmem:[%s7822_s16 + $0x98] sm:$0xff] %vm279_vm0, %v4306_v31  ;;  %v3641_v29 = vpop.permute.xlu1 %3640 }
 0x689   : > { %v3513_v17 = vpop.permute.xlu0 %3512 }
 0x68a   : > { %v3900_v26 = vsel %vm1947_vm10, %v3868_v53, %v3513_v17  ;;  %v8721_v53 = vld [vmem:[#allocation161_spill] sm:$0xff] }
 0x68b   : > { %v3932_v4 = vsel %vm1980_vm9, %v3900_v26, %v3641_v29 }
 0x68c   : > { %4477 = vmatmul.msk.f32.gmra.mxu3 %vm2018_vm11, %v3932_v4 }
 0x68d   : > { %v4069_v47 = vpop.f32.mrf.mxu1 }
 0x68e   : > { %v4192_v19 = vmul.f32 %v7794_v59, %v4069_v47  ;;  %v4117_v50 = vpop.f32.mrf.mxu3  ;;  %v3483_v12 = vpop.permute.xlu2 %3482 }
 0x68f   : > { %v4208_v62 = vmul.f32 %v7794_v59, %v4117_v50  ;;  %v3481_v23 = vpop.permute.xlu1 %3480 }
 0x690   : > { %v4227_v5 = vadd.f32 %v7805_v36, %v4192_v19  ;;  %v3884_v18 = vsel %vm1947_vm10, %v3852_v35, %v3481_v23  ;;  %v4159_v19 = vld [vmem:[#allocation2 + $0x61] sm:$0xff] }
 0x691   : > { %v4243_v49 = vadd.f32 %v7805_v36, %v4208_v62  ;;  %v3259_v15 = vpop.permute.xlu0 %3258 }
 0x692   : > { %v4259_v10 = vadd.f32 %v4227_v5, %v4157_v38  ;;  %v3837_v11 = vsel %vm1881_vm6, %v8718_v33, %v3259_v15  ;;  %v4175_v5 = vld [vmem:[#allocation2 + $0x121] sm:$0xff] }
 0x693   : > { %v4275_v24 = vadd.f32 %v4243_v49, %v4173_v37  ;;  %v3869_v58 = vsel %vm1914_vm8, %v3837_v11, %v3387_v40 }
 0x694   : > { %v4291_v41 = vmax.f32 %v4259_v10, 0.0 }
 0x695   : > { %v4307_v27 = vmax.f32 %v4275_v24, 0.0 }
 0x696   : > { %4323 = vst.msk [vmem:[%s7822_s16 + $0x20] sm:$0xff] %vm279_vm0, %v4291_v41  ;;  %v3517_v6 = vpop.permute.xlu2 %3516 }
 0x697   : > { %4339 = vst.msk [vmem:[%s7822_s16 + $0xa0] sm:$0xff] %vm279_vm0, %v4307_v27  ;;  %v3515_v43 = vpop.permute.xlu1 %3514  ;;  %v8723_v27 = vld [vmem:[#allocation50_spill] sm:$0xff] }
 0x698   : > { %v3901_v55 = vsel %vm1947_vm10, %v3869_v58, %v3515_v43  ;;  %v3711_v48 = vsel %vm279_vm0, %v4557_v7, %v8723_v27  ;;  %v8725_v58 = vld [vmem:[#allocation85_spill] sm:$0xff]  ;;  %v4179_v7 = vld [vmem:[#allocation2 + $0x151] sm:$0xff] }
 0x699   : > { %v3609_v22 = vpop.permute.xlu0 %3608  ;;  %v3933_v13 = vsel %vm1980_vm9, %v3901_v55, %v3643_v16  ;;  %v3743_v60 = vsel %vm1782_vm4, %v3711_v48, %v8724_v8 }
 0x69a   : > { %4478 = vmatmul.msk.f32.gmra.mxu3 %vm2018_vm11, %v3933_v13  ;;  %v3916_v61 = vsel %vm1980_vm9, %v3884_v18, %v3609_v22  ;;  %v3775_v35 = vsel %vm1815_vm5, %v3743_v60, %v8725_v58  ;;  %v8726_v22 = vld [vmem:[#allocation147_spill] sm:$0xff] }
 0x69b   : > { %4461 = vmatmul.msk.f32.gmra.mxu1 %vm2018_vm11, %v3916_v61  ;;  %v3807_v13 = vsel %vm1848_vm7, %v3775_v35, %v8726_v22  ;;  %v4160_v61 = vld [vmem:[#allocation2 + $0x69] sm:$0xff] }
 0x69d   : > { %v4072_v20 = vpop.f32.mrf.mxu1 }
 0x69e   : > { %v4193_v51 = vmul.f32 %v7794_v59, %v4072_v20  ;;  %v4120_v39 = vpop.f32.mrf.mxu3  ;;  %v3263_v62 = vpop.permute.xlu2 %3262 }
 0x69f   : > { %v4209_v46 = vmul.f32 %v7794_v59, %v4120_v39  ;;  %v3261_v25 = vpop.permute.xlu1 %3260  ;;  %v3839_v20 = vsel %vm1881_vm6, %v3807_v13, %v3263_v62  ;;  %v4176_v39 = vld [vmem:[#allocation2 + $0x129] sm:$0xff] }
 0x6a0   : > { %v4228_v45 = vadd.f32 %v7805_v36, %v4193_v51  ;;  %v3838_v17 = vsel %vm1881_vm6, %v8721_v53, %v3261_v25 }
 0x6a1   : > { %v4244_v34 = vadd.f32 %v7805_v36, %v4209_v46  ;;  %v3355_v9 = vpop.permute.xlu0 %3354 }
 0x6a2   : > { %v4260_v57 = vadd.f32 %v4228_v45, %v4158_v1  ;;  %v3853_v42 = vsel %vm1914_vm8, %v7421_v52, %v3355_v9 }
 0x6a3   : > { %v4276_v56 = vadd.f32 %v4244_v34, %v4174_v21  ;;  %v3885_v29 = vsel %vm1947_vm10, %v3853_v42, %v3483_v12 }
 0x6a4   : > { %v4292_v31 = vmax.f32 %v4260_v57, 0.0 }
 0x6a5   : > { %v4308_v2 = vmax.f32 %v4276_v56, 0.0 }
 0x6a6   : > { %4324 = vst.msk [vmem:[%s7822_s16 + $0x28] sm:$0xff] %vm279_vm0, %v4292_v31  ;;  %v3613_v33 = vpop.permute.xlu2 %3612 }
 0x6a7   : > { %4340 = vst.msk [vmem:[%s7822_s16 + $0xa8] sm:$0xff] %vm279_vm0, %v4308_v2  ;;  %v3611_v63 = vpop.permute.xlu1 %3610 }
 0x6a8   : > { %v3917_v3 = vsel %vm1980_vm9, %v3885_v29, %v3611_v63 }
 0x6a9   : > { %4462 = vmatmul.msk.f32.gmra.mxu1 %vm2018_vm11, %v3917_v3  ;;  %v3389_v40 = vpop.permute.xlu0 %3388 }
 0x6aa   : > { %v3870_v52 = vsel %vm1914_vm8, %v3838_v17, %v3389_v40 }
 0x6ab   : > { %v3902_v15 = vsel %vm1947_vm10, %v3870_v52, %v3517_v6  ;;  %v4161_v52 = vld [vmem:[#allocation2 + $0x79] sm:$0xff] }
 0x6ad   : > { %v4075_v26 = vpop.f32.mrf.mxu1 }
 0x6ae   : > { %v4194_v4 = vmul.f32 %v7794_v59, %v4075_v26  ;;  %v4123_v47 = vpop.f32.mrf.mxu3  ;;  %v3359_v42 = vpop.permute.xlu2 %3358 }
 0x6af   : > { %v4210_v50 = vmul.f32 %v7794_v59, %v4123_v47  ;;  %v3357_v38 = vpop.permute.xlu1 %3356  ;;  %v3855_v2 = vsel %vm1914_vm8, %v7445_v44, %v3359_v42  ;;  %v4165_v42 = vld [vmem:[#allocation2 + $0xa9] sm:$0xff] }
 0x6b0   : > { %v4229_v23 = vadd.f32 %v7805_v36, %v4194_v4  ;;  %v3854_v30 = vsel %vm1914_vm8, %v8722_v54, %v3357_v38  ;;  %v4177_v4 = vld [vmem:[#allocation2 + $0x139] sm:$0xff] }
 0x6b1   : > { %v4245_v37 = vadd.f32 %v7805_v36, %v4210_v50  ;;  %v3645_v49 = vpop.permute.xlu0 %3644 }
 0x6b2   : > { %v4261_v16 = vadd.f32 %v4229_v23, %v4159_v19  ;;  %v3934_v10 = vsel %vm1980_vm9, %v3902_v15, %v3645_v49  ;;  %v4162_v15 = vld [vmem:[#allocation2 + $0x81] sm:$0xff] }
 0x6b3   : > { %v4277_v32 = vadd.f32 %v4245_v37, %v4175_v5  ;;  %4479 = vmatmul.msk.f32.gmra.mxu3 %vm2018_vm11, %v3934_v10 }
 0x6b4   : > { %v4293_v14 = vmax.f32 %v4261_v16, 0.0  ;;  %v4178_v16 = vld [vmem:[#allocation2 + $0x141] sm:$0xff] }
 0x6b5   : > { %v4309_v0 = vmax.f32 %v4277_v32, 0.0 }
 0x6b6   : > { %4325 = vst.msk [vmem:[%s7822_s16 + $0x30] sm:$0xff] %vm279_vm0, %v4293_v14 }
 0x6b7   : > { %4341 = vst.msk [vmem:[%s7822_s16 + $0xb0] sm:$0xff] %vm279_vm0, %v4309_v0  ;;  %v3391_v24 = vpop.permute.xlu1 %3390 }
 0x6b8   : > { %v3871_v46 = vsel %vm1914_vm8, %v3839_v20, %v3391_v24  ;;  %v4164_v20 = vld [vmem:[#allocation2 + $0x99] sm:$0xff] }
 0x6b9   : > { %v3485_v41 = vpop.permute.xlu0 %3484 }
 0x6ba   : > { %v3886_v11 = vsel %vm1947_vm10, %v3854_v30, %v3485_v41 }
 0x6bb   : > { %v3918_v28 = vsel %vm1980_vm9, %v3886_v11, %v3613_v33 }
 0x6bc   : > { %4463 = vmatmul.msk.f32.gmra.mxu1 %vm2018_vm11, %v3918_v28  ;;  %v4163_v28 = vld [vmem:[#allocation2 + $0x91] sm:$0xff] }
 0x6bd   : > { %v4078_v43 = vpop.f32.mrf.mxu1 }
 0x6be   : > { %v4195_v55 = vmul.f32 %v7794_v59, %v4078_v43  ;;  %v4126_v18 = vpop.f32.mrf.mxu3 }
 0x6bf   : > { %v4211_v12 = vmul.f32 %v7794_v59, %v4126_v18  ;;  %v3647_v1 = vpop.permute.xlu1 %3646  ;;  %v4180_v18 = vld [vmem:[#allocation2 + $0x159] sm:$0xff] }
 0x6c0   : > { %v4230_v51 = vadd.f32 %v7805_v36, %v4195_v55 }
 0x6c1   : > { %v4246_v25 = vadd.f32 %v7805_v36, %v4211_v12  ;;  %v3519_v45 = vpop.permute.xlu0 %3518 }
 0x6c2   : > { %v4262_v21 = vadd.f32 %v4230_v51, %v4160_v61  ;;  %v3903_v34 = vsel %vm1947_vm10, %v3871_v46, %v3519_v45 }
 0x6c3   : > { %v4278_v9 = vadd.f32 %v4246_v25, %v4176_v39  ;;  %v3935_v57 = vsel %vm1980_vm9, %v3903_v34, %v3647_v1 }
 0x6c4   : > { %v4294_v56 = vmax.f32 %v4262_v21, 0.0  ;;  %4480 = vmatmul.msk.f32.gmra.mxu3 %vm2018_vm11, %v3935_v57  ;;  %v4181_v21 = vld [vmem:[#allocation2 + $0x169] sm:$0xff] }
 0x6c5   : > { %v4310_v31 = vmax.f32 %v4278_v9, 0.0 }
 0x6c6   : > { %4326 = vst.msk [vmem:[%s7822_s16 + $0x38] sm:$0xff] %vm279_vm0, %v4294_v56 }
 0x6c7   : > { %4342 = vst.msk [vmem:[%s7822_s16 + $0xb8] sm:$0xff] %vm279_vm0, %v4310_v31  ;;  %v3615_v63 = vpop.permute.xlu1 %3614 }
 0x6c9   : > { %v3487_v6 = vpop.permute.xlu0 %3486 }
 0x6ca   : > { %v3887_v29 = vsel %vm1947_vm10, %v3855_v2, %v3487_v6 }
 0x6cb   : > { %v3919_v3 = vsel %vm1980_vm9, %v3887_v29, %v3615_v63 }
 0x6cc   : > { %4464 = vmatmul.msk.f32.gmra.mxu1 %vm2018_vm11, %v3919_v3 }
 0x6ce   : > { %v4081_v40 = vpop.f32.mrf.mxu1  ;;  %v4129_v53 = vpop.f32.mrf.mxu3 }
 0x6cf   : > { %v4196_v17 = vmul.f32 %v7794_v59, %v4081_v40  ;;  %v4212_v26 = vmul.f32 %v7794_v59, %v4129_v53  ;;  %v4182_v40 = vld [vmem:[#allocation2 + $0x171] sm:$0xff] }
 0x6d1   : > { %v4231_v44 = vadd.f32 %v7805_v36, %v4196_v17  ;;  %v4247_v47 = vadd.f32 %v7805_v36, %v4212_v26 }
 0x6d3   : > { %v4263_v19 = vadd.f32 %v4231_v44, %v4161_v52  ;;  %v4279_v50 = vadd.f32 %v4247_v47, %v4177_v4  ;;  %v4166_v44 = vld [vmem:[#allocation2 + $0xb1] sm:$0xff] }
 0x6d5   : > { %v4295_v38 = vmax.f32 %v4263_v19, 0.0  ;;  %v4311_v62 = vmax.f32 %v4279_v50, 0.0 }
 0x6d7   : > { %4327 = vst.msk [vmem:[%s7822_s16 + $0x40] sm:$0xff] %vm279_vm0, %v4295_v38 }
 0x6d8   : > { %4343 = vst.msk [vmem:[%s7822_s16 + $0xc0] sm:$0xff] %vm279_vm0, %v4311_v62 }
 0x6de   : > { %v4084_v23 = vpop.f32.mrf.mxu1  ;;  %v4132_v5 = vpop.f32.mrf.mxu3 }
 0x6df   : > { %v4197_v37 = vmul.f32 %v7794_v59, %v4084_v23  ;;  %v4213_v49 = vmul.f32 %v7794_v59, %v4132_v5  ;;  %v4183_v23 = vld [vmem:[#allocation2 + $0x181] sm:$0xff] }
 0x6e1   : > { %v4232_v10 = vadd.f32 %v7805_v36, %v4197_v37  ;;  %v4248_v32 = vadd.f32 %v7805_v36, %v4213_v49 }
 0x6e3   : > { %v4264_v14 = vadd.f32 %v4232_v10, %v4162_v15  ;;  %v4280_v0 = vadd.f32 %v4248_v32, %v4178_v16  ;;  %v4167_v16 = vld [vmem:[#allocation2 + $0xc1] sm:$0xff] }
 0x6e5   : > { %v4296_v24 = vmax.f32 %v4264_v14, 0.0  ;;  %v4312_v54 = vmax.f32 %v4280_v0, 0.0 }
 0x6e7   : > { %4328 = vst.msk [vmem:[%s7822_s16 + $0x48] sm:$0xff] %vm279_vm0, %v4296_v24 }
 0x6e8   : > { %4344 = vst.msk [vmem:[%s7822_s16 + $0xc8] sm:$0xff] %vm279_vm0, %v4312_v54 }
 0x6ee   : > { %v4087_v30 = vpop.f32.mrf.mxu1  ;;  %v4135_v41 = vpop.f32.mrf.mxu3 }
 0x6ef   : > { %v4198_v33 = vmul.f32 %v7794_v59, %v4087_v30  ;;  %v4214_v11 = vmul.f32 %v7794_v59, %v4135_v41  ;;  %v4184_v30 = vld [vmem:[#allocation2 + $0x189] sm:$0xff] }
 0x6f1   : > { %v4233_v27 = vadd.f32 %v7805_v36, %v4198_v33  ;;  %v4249_v48 = vadd.f32 %v7805_v36, %v4214_v11 }
 0x6f3   : > { %v4265_v8 = vadd.f32 %v4233_v27, %v4163_v28  ;;  %v4281_v60 = vadd.f32 %v4249_v48, %v4179_v7  ;;  %v4168_v28 = vld [vmem:[#allocation2 + $0xc9] sm:$0xff] }
 0x6f5   : > { %v4297_v43 = vmax.f32 %v4265_v8, 0.0  ;;  %v4313_v58 = vmax.f32 %v4281_v60, 0.0 }
 0x6f7   : > { %4329 = vst.msk [vmem:[%s7822_s16 + $0x50] sm:$0xff] %vm279_vm0, %v4297_v43 }
 0x6f8   : > { %4345 = vst.msk [vmem:[%s7822_s16 + $0xd0] sm:$0xff] %vm279_vm0, %v4313_v58 }
 0x6fe   : > { %v4138_v35 = vpop.f32.mrf.mxu3 }
 0x6ff   : > { %v4215_v55 = vmul.f32 %v7794_v59, %v4138_v35 }
 0x701   : > { %v4250_v22 = vadd.f32 %v7805_v36, %v4215_v55  ;;  %v4090_v13 = vpop.f32.mrf.mxu1 }
 0x702   : > { %v4199_v61 = vmul.f32 %v7794_v59, %v4090_v13 }
 0x703   : > { %v4282_v12 = vadd.f32 %v4250_v22, %v4180_v18 }
 0x704   : > { %v4234_v51 = vadd.f32 %v7805_v36, %v4199_v61 }
 0x705   : > { %v4314_v39 = vmax.f32 %v4282_v12, 0.0 }
 0x706   : > { %v4266_v1 = vadd.f32 %v4234_v51, %v4164_v20 }
 0x707   : > { %4346 = vst.msk [vmem:[%s7822_s16 + $0xd8] sm:$0xff] %vm279_vm0, %v4314_v39 }
 0x708   : > { %v4298_v46 = vmax.f32 %v4266_v1, 0.0 }
 0x70a   : > { %4330 = vst.msk [vmem:[%s7822_s16 + $0x58] sm:$0xff] %vm279_vm0, %v4298_v46 }
 0x70f   : > { %v4141_v25 = vpop.f32.mrf.mxu3 }
 0x710   : > { %v4216_v45 = vmul.f32 %v7794_v59, %v4141_v25 }
 0x712   : > { %v4251_v34 = vadd.f32 %v7805_v36, %v4216_v45 }
 0x714   : > { %v4283_v9 = vadd.f32 %v4251_v34, %v4181_v21 }
 0x716   : > { %v4315_v57 = vmax.f32 %v4283_v9, 0.0 }
 0x718   : > { %4347 = vst.msk [vmem:[%s7822_s16 + $0xe0] sm:$0xff] %vm279_vm0, %v4315_v57  ;;  %v4093_v56 = vpop.f32.mrf.mxu1 }
 0x719   : > { %v4200_v31 = vmul.f32 %v7794_v59, %v4093_v56 }
 0x71b   : > { %v4235_v2 = vadd.f32 %v7805_v36, %v4200_v31 }
 0x71d   : > { %v4267_v6 = vadd.f32 %v4235_v2, %v4165_v42  ;;  %v4144_v63 = vpop.f32.mrf.mxu3 }
 0x71e   : > { %v4217_v29 = vmul.f32 %v7794_v59, %v4144_v63 }
 0x71f   : > { %v4299_v3 = vmax.f32 %v4267_v6, 0.0 }
 0x720   : > { %v4252_v53 = vadd.f32 %v7805_v36, %v4217_v29 }
 0x721   : > { %4331 = vst.msk [vmem:[%s7822_s16 + $0x60] sm:$0xff] %vm279_vm0, %v4299_v3 }
 0x722   : > { %v4284_v17 = vadd.f32 %v4252_v53, %v4182_v40 }
 0x724   : > { %v4316_v26 = vmax.f32 %v4284_v17, 0.0 }
 0x726   : > { %4348 = vst.msk [vmem:[%s7822_s16 + $0xe8] sm:$0xff] %vm279_vm0, %v4316_v26  ;;  %v4096_v52 = vpop.f32.mrf.mxu1 }
 0x727   : > { %v4201_v4 = vmul.f32 %v7794_v59, %v4096_v52 }
 0x729   : > { %v4236_v47 = vadd.f32 %v7805_v36, %v4201_v4 }
 0x72b   : > { %v4268_v19 = vadd.f32 %v4236_v47, %v4166_v44 }
 0x72d   : > { %v4300_v50 = vmax.f32 %v4268_v19, 0.0 }
 0x72f   : > { %4332 = vst.msk [vmem:[%s7822_s16 + $0x68] sm:$0xff] %vm279_vm0, %v4300_v50 }
 0x736   : > { %v4147_v38 = vpop.f32.mrf.mxu3 }
 0x737   : > { %v4218_v62 = vmul.f32 %v7794_v59, %v4147_v38 }
 0x739   : > { %v4253_v5 = vadd.f32 %v7805_v36, %v4218_v62  ;;  %v4099_v37 = vpop.f32.mrf.mxu1 }
 0x73a   : > { %v4202_v49 = vmul.f32 %v7794_v59, %v4099_v37 }
 0x73b   : > { %v4285_v15 = vadd.f32 %v4253_v5, %v4183_v23 }
 0x73c   : > { %v4237_v10 = vadd.f32 %v7805_v36, %v4202_v49 }
 0x73d   : > { %v4317_v32 = vmax.f32 %v4285_v15, 0.0 }
 0x73e   : > { %v4269_v14 = vadd.f32 %v4237_v10, %v4167_v16 }
 0x73f   : > { %4349 = vst.msk [vmem:[%s7822_s16 + $0xf0] sm:$0xff] %vm279_vm0, %v4317_v32 }
 0x740   : > { %v4301_v0 = vmax.f32 %v4269_v14, 0.0 }
 0x742   : > { %4333 = vst.msk [vmem:[%s7822_s16 + $0x70] sm:$0xff] %vm279_vm0, %v4301_v0 }
 0x747   : > { %v4150_v24 = vpop.f32.mrf.mxu3 }
 0x748   : > { %v4219_v54 = vmul.f32 %v7794_v59, %v4150_v24 }
 0x749   : > { %v4102_v41 = vpop.f32.mrf.mxu1 }
 0x74a   : > { %v4254_v33 = vadd.f32 %v7805_v36, %v4219_v54  ;;  %v4203_v11 = vmul.f32 %v7794_v59, %v4102_v41 }
 0x74c   : > { %v4286_v7 = vadd.f32 %v4254_v33, %v4184_v30  ;;  %v4238_v27 = vadd.f32 %v7805_v36, %v4203_v11 }
 0x74e   : > { %v4318_v48 = vmax.f32 %v4286_v7, 0.0  ;;  %v4270_v8 = vadd.f32 %v4238_v27, %v4168_v28 }
 0x750   : > { %4350 = vst.msk [vmem:[%s7822_s16 + $0xf8] sm:$0xff] %vm279_vm0, %v4318_v48  ;;  %v4302_v60 = vmax.f32 %v4270_v8, 0.0 }
 0x752   : > { %4334 = vst.msk [vmem:[%s7822_s16 + $0x78] sm:$0xff] %vm279_vm0, %v4302_v60 }
 0x753 PF: > { %s17_s24 = sadd.s32 1, %s4564_s24  }
 0x754   : > { %p14_p4 = scmp.ge.s32.totalorder %s17_s24, 4  }
 0x756   :  { %16 = sbr.rel (!%p14_p4) target bundleno = 1 (0x1), region = 84 }

</bundles_post_ra>
